<compile_context>
chip_gen: v7x
topology: tpu7x:2x2x1
jax: 0.10.0
libtpu: 0.0.40
codegen_flags: <defaults>
</compile_context>

<pallas_src>
import functools
import math

import jax
import jax.numpy as jnp
from jax import lax
from jax.experimental import pallas as pl
from jax.experimental.pallas import tpu as pltpu


def _encoder_layer_kernel(
    x_ref, mask_ref,
    wqkv_ref, bqkv_ref, wo_ref, bo_ref,
    g1_ref, be1_ref,
    w1_ref, b1_ref, w2_ref, b2_ref,
    g2_ref, be2_ref,
    out_ref, *rest,
    n_heads: int, q_tile: int, eps: float = 1e-5,
    approx_recip: bool = True, has_attn: bool = True,
):
    if has_attn:
        attn_ref, k_ref, v_ref = rest
    else:
        attn_ref = None
        k_ref, v_ref = rest

    i = pl.program_id(1)
    S, D = x_ref.shape
    H = n_heads
    dk = D // H
    TQ = q_tile
    cdt = wqkv_ref.dtype                          # MXU compute dtype (bf16/f32)
    scale = jnp.float32(1.0 / math.sqrt(dk))

    # ---- K/V projection: once per batch element, cached in VMEM scratch ----
    @pl.when(i == 0)
    def _():
        xs = x_ref[...].astype(cdt)               # no f32 up-cast of full seq
        kv = jnp.dot(xs, wqkv_ref[:, D:], preferred_element_type=jnp.float32)
        kv = kv + bqkv_ref[:, D:].astype(jnp.float32)
        k_ref[...] = kv[:, :D].astype(k_ref.dtype)
        v_ref[...] = kv[:, D:].astype(v_ref.dtype)

    # ---- Query tile rows, read from the resident sequence block -------------
    row0 = pl.multiple_of(i * TQ, TQ)
    xq = x_ref[pl.ds(row0, TQ), :]                # (TQ, D)
    xq_f32 = xq.astype(jnp.float32)               # residual path stays f32

    q = jnp.dot(xq.astype(cdt), wqkv_ref[:, :D],
                preferred_element_type=jnp.float32)
    q = (q + bqkv_ref[:, :D].astype(jnp.float32)) * scale    # scale folded once

    # Mask bias hoisted out of the head loop: one add per score element.
    mask_bias = jnp.where(mask_ref[...] == 0,
                          jnp.float32(-1e10), jnp.float32(0.0))   # (1, S)

    # ---- Per-head attention; accumulate Wo projection per head --------------
    attn_out = jnp.broadcast_to(bo_ref[...].astype(jnp.float32), (TQ, D))
    for h in range(H):
        lo, hi = h * dk, (h + 1) * dk
        qh = q[:, lo:hi].astype(cdt)              # (TQ, dk)
        kh = k_ref[:, lo:hi]                      # (S,  dk) in cdt
        vh = v_ref[:, lo:hi]                      # (S,  dk) in cdt

        # q @ k^T via contraction dims (no transpose copy)
        s = lax.dot_general(qh, kh, (((1,), (1,)), ((), ())),
                            preferred_element_type=jnp.float32)   # (TQ, S)
        s = s + mask_bias

        m = jnp.max(s, axis=-1, keepdims=True)
        e = jnp.exp(s - m)
        denom = jnp.sum(e, axis=-1, keepdims=True)
        p = e * pl.reciprocal(denom, approx=approx_recip)         # (TQ, S)

        if attn_ref is not None:
            attn_ref[h] = p.astype(attn_ref.dtype)

        ph = jnp.dot(p.astype(cdt), vh, preferred_element_type=jnp.float32)
        attn_out = attn_out + jnp.dot(ph.astype(cdt), wo_ref[lo:hi, :],
                                      preferred_element_type=jnp.float32)

    # ---- Residual + LayerNorm 1 (f32) ----------------------------------------
    y = xq_f32 + attn_out
    mu = jnp.mean(y, axis=-1, keepdims=True)
    var = jnp.mean((y - mu) ** 2, axis=-1, keepdims=True)
    y = (y - mu) * lax.rsqrt(var + eps)
    y = y * g1_ref[...].astype(jnp.float32) + be1_ref[...].astype(jnp.float32)

    # ---- Position-wise FFN (MXU in cdt, f32 accumulation) --------------------
    hdn = jnp.dot(y.astype(cdt), w1_ref[...],
                  preferred_element_type=jnp.float32) + b1_ref[...].astype(jnp.float32)
    hdn = jnp.maximum(hdn, 0.0)
    f = jnp.dot(hdn.astype(cdt), w2_ref[...],
                preferred_element_type=jnp.float32) + b2_ref[...].astype(jnp.float32)

    # ---- Residual + LayerNorm 2 (f32) ----------------------------------------
    z = y + f
    mu2 = jnp.mean(z, axis=-1, keepdims=True)
    var2 = jnp.mean((z - mu2) ** 2, axis=-1, keepdims=True)
    z = (z - mu2) * lax.rsqrt(var2 + eps)
    z = z * g2_ref[...].astype(jnp.float32) + be2_ref[...].astype(jnp.float32)

    out_ref[...] = z.astype(out_ref.dtype)


def prepare_encoder_weights(params, compute_dtype=jnp.bfloat16):
    """One-time weight preparation (fused QKV + dtype casts). Hoist out of the
    per-call path so the concat/cast HBM round-trip does not repeat."""
    wqkv = jnp.concatenate([params["wq"], params["wk"], params["wv"]],
                           axis=1).astype(compute_dtype)
    bqkv = jnp.concatenate([params["bq"], params["bk"], params["bv"]],
                           axis=1).astype(jnp.float32)
    return (
        wqkv, bqkv,
        params["wo"].astype(compute_dtype), params["bo"].astype(jnp.float32),
        params["ln1_g"].astype(jnp.float32), params["ln1_b"].astype(jnp.float32),
        params["w1"].astype(compute_dtype), params["b1"].astype(jnp.float32),
        params["w2"].astype(compute_dtype), params["b2"].astype(jnp.float32),
        params["ln2_g"].astype(jnp.float32), params["ln2_b"].astype(jnp.float32),
    )


def _vmem_cap_bytes():
    # Generation-aware VMEM ceiling (128 MiB on v5e/v6e, 64 MiB on v7x) with
    # headroom for compiler-internal scratch.
    try:
        cap = int(pltpu.get_tpu_info().vmem_capacity_bytes)
        return max(cap - (8 << 20), 32 << 20)
    except Exception:
        return 64 << 20


def _default_q_tile(S):
    for t in (256, 128, 64, 32, 16, 8):
        if t <= S and S % t == 0:
            return t
    return S


def encoder_layer(src, src_mask, params=None, *, n_heads, weights=None,
                  compute_dtype=jnp.bfloat16, q_tile=None, approx_recip=True,
                  return_attn=True, attn_dtype=jnp.float32,
                  single_buffer_weights=True):
    """src: (B, S, D) float32; src_mask: (B, 1, 1, S) int-like."""
    B, S, D = src.shape
    H = n_heads
    assert D % H == 0

    if weights is None:
        assert params is not None
        weights = prepare_encoder_weights(params, compute_dtype)
    compute_dtype = weights[0].dtype
    d_ffn = weights[6].shape[1]

    TQ = q_tile if q_tile is not None else _default_q_tile(S)
    assert S % TQ == 0 and (TQ % 8 == 0 or TQ == S), "bad query tile size"
    n_q = S // TQ

    mask2d = src_mask.reshape(B, 1, S).astype(jnp.int32)

    kernel = functools.partial(_encoder_layer_kernel, n_heads=H, q_tile=TQ,
                               approx_recip=approx_recip, has_attn=return_attn)

    def build_and_run(single_buffer):
        def rep(a):  # replicated (constant index_map) weight block
            idx = lambda b, i: (0, 0)
            if single_buffer:
                try:
                    return pl.BlockSpec(a.shape, idx, pipeline_mode=pl.Buffered(1))
                except Exception:
                    return pl.BlockSpec(a.shape, idx)
            return pl.BlockSpec(a.shape, idx)

        in_specs = [
            pl.BlockSpec((None, S, D), lambda b, i: (b, 0, 0)),   # full sequence
            pl.BlockSpec((None, 1, S), lambda b, i: (b, 0, 0)),   # key mask
        ] + [rep(a) for a in weights]

        out_specs = [pl.BlockSpec((None, TQ, D), lambda b, i: (b, i, 0))]
        out_shapes = [jax.ShapeDtypeStruct((B, S, D), src.dtype)]
        if return_attn:
            out_specs.append(
                pl.BlockSpec((None, H, TQ, S), lambda b, i: (b, 0, i, 0)))
            out_shapes.append(jax.ShapeDtypeStruct((B, H, S, S), attn_dtype))

        scratch = [pltpu.VMEM((S, D), compute_dtype),   # cached K projection
                   pltpu.VMEM((S, D), compute_dtype)]   # cached V projection

        # VMEM budget from the actual block footprint, clamped to the chip cap.
        cdt_b = jnp.dtype(compute_dtype).itemsize
        wbytes = sum(int(a.size) * a.dtype.itemsize for a in weights)
        blk = 2 * (S * D * 4 + S * 4 + TQ * D * 4)            # x, mask, out (x2 buf)
        blk += (1 if single_buffer else 2) * wbytes
        if return_attn:
            blk += 2 * H * TQ * S * jnp.dtype(attn_dtype).itemsize
        blk += 2 * S * D * cdt_b                               # K/V scratch
        inter = (5 * TQ * S + TQ * d_ffn + 8 * TQ * D + 2 * S * D) * 4
        vmem_limit = int(min(_vmem_cap_bytes(),
                             max(32 << 20, blk + inter + (4 << 20))))

        return pl.pallas_call(
            kernel,
            out_shape=tuple(out_shapes),
            grid_spec=pltpu.PrefetchScalarGridSpec(
                num_scalar_prefetch=0,
                grid=(B, n_q),
                in_specs=in_specs,
                out_specs=tuple(out_specs),
                scratch_shapes=scratch,
            ),
            compiler_params=pltpu.CompilerParams(
                # inner axis carries the cached K/V scratch -> must be arbitrary
                dimension_semantics=("parallel", "arbitrary"),
                vmem_limit_bytes=vmem_limit),
        )(src, mask2d, *weights)

    if single_buffer_weights:
        try:
            results = build_and_run(True)
        except Exception:
            results = build_and_run(False)  # fallback if Buffered(1) unsupported
    else:
        results = build_and_run(False)

    if return_attn:
        out, attn = results
        return out, attn
    (out,) = results
    return out


def encoder_layer_ref(src, src_mask, params, *, n_heads):
    """Pure-JAX f32 reference (eval-mode, dropout = identity)."""
    B, S, D = src.shape
    H = n_heads
    dk = D // H
    eps = 1e-5

    def lin(x, w, b):
        return x @ w + b[0]

    q = lin(src, params["wq"], params["bq"]).reshape(B, S, H, dk).transpose(0, 2, 1, 3)
    k = lin(src, params["wk"], params["bk"]).reshape(B, S, H, dk).transpose(0, 2, 1, 3)
    v = lin(src, params["wv"], params["bv"]).reshape(B, S, H, dk).transpose(0, 2, 1, 3)
    scores = jnp.einsum("bhqd,bhkd->bhqk", q, k) / math.sqrt(dk)
    scores = jnp.where(src_mask == 0, -1e10, scores)
    probs = jax.nn.softmax(scores, axis=-1)
    a = jnp.einsum("bhqk,bhkd->bhqd", probs, v).transpose(0, 2, 1, 3).reshape(B, S, D)
    attn_out = lin(a, params["wo"], params["bo"])

    def ln(x, g, b):
        mu = x.mean(-1, keepdims=True)
        var = ((x - mu) ** 2).mean(-1, keepdims=True)
        return (x - mu) * lax.rsqrt(var + eps) * g[0] + b[0]

    y = ln(src + attn_out, params["ln1_g"], params["ln1_b"])
    f = lin(jnp.maximum(lin(y, params["w1"], params["b1"]), 0.0),
            params["w2"], params["b2"])
    z = ln(y + f, params["ln2_g"], params["ln2_b"])
    return z, probs


if __name__ == "__main__":
    B, S, D, H, F = 2, 16, 32, 4, 64
    TQ = 8  # two query tiles per batch element -> exercises KV caching across i

    key = jax.random.PRNGKey(0)
    ks = jax.random.split(key, 12)
    sc = 0.1
    params = {
        "wq": jax.random.normal(ks[0], (D, D), jnp.float32) * sc,
        "bq": jax.random.normal(ks[1], (1, D), jnp.float32) * sc,
        "wk": jax.random.normal(ks[2], (D, D), jnp.float32) * sc,
        "bk": jax.random.normal(ks[3], (1, D), jnp.float32) * sc,
        "wv": jax.random.normal(ks[4], (D, D), jnp.float32) * sc,
        "bv": jax.random.normal(ks[5], (1, D), jnp.float32) * sc,
        "wo": jax.random.normal(ks[6], (D, D), jnp.float32) * sc,
        "bo": jax.random.normal(ks[7], (1, D), jnp.float32) * sc,
        "ln1_g": jnp.ones((1, D), jnp.float32),
        "ln1_b": jnp.zeros((1, D), jnp.float32),
        "w1": jax.random.normal(ks[8], (D, F), jnp.float32) * sc,
        "b1": jax.random.normal(ks[9], (1, F), jnp.float32) * sc,
        "w2": jax.random.normal(ks[10], (F, D), jnp.float32) * sc,
        "b2": jax.random.normal(ks[11], (1, D), jnp.float32) * sc,
        "ln2_g": jnp.ones((1, D), jnp.float32),
        "ln2_b": jnp.zeros((1, D), jnp.float32),
    }

    src = jax.random.normal(jax.random.PRNGKey(42), (B, S, D), jnp.float32)
    # mask: (B, 1, 1, S) — last three key positions of batch 1 are padding
    mask = jnp.ones((B, 1, 1, S), jnp.int32).at[1, :, :, -3:].set(0)

    out_ref, attn_probs_ref = encoder_layer_ref(src, mask, params, n_heads=H)

    # 1) Exact-semantics path: f32 compute, exact softmax reciprocal, f32 probs.
    out32, attn32 = encoder_layer(src, mask, params, n_heads=H, q_tile=TQ,
                                  compute_dtype=jnp.float32, approx_recip=False,
                                  attn_dtype=jnp.float32)
    out32 = jax.block_until_ready(out32)
    attn32 = jax.block_until_ready(attn32)
    assert out32.shape == (B, S, D) and attn32.shape == (B, H, S, S)
    assert jnp.allclose(out32, out_ref, atol=1e-4, rtol=1e-4)
    assert jnp.allclose(attn32, attn_probs_ref, atol=1e-5, rtol=1e-4)

    # 2) Performance path: prepared bf16 weights, approx recip, bf16 attn probs.
    bf16_weights = prepare_encoder_weights(params, jnp.bfloat16)  # prep once
    out_bf, attn_bf = encoder_layer(src, mask, n_heads=H, q_tile=TQ,
                                    weights=bf16_weights,
                                    attn_dtype=jnp.bfloat16)
    out_bf = jax.block_until_ready(out_bf)
    attn_bf = jax.block_until_ready(attn_bf)
    assert jnp.allclose(out_bf, out_ref, atol=5e-2, rtol=5e-2)
    assert jnp.allclose(attn_bf.astype(jnp.float32), attn_probs_ref,
                        atol=2e-2, rtol=2e-2)

    # 3) Skip the (B,H,S,S) attention-prob HBM write entirely (fastest path).
    out_na = encoder_layer(src, mask, n_heads=H, q_tile=TQ,
                           weights=bf16_weights, return_attn=False)
    out_na = jax.block_until_ready(out_na)
    assert jnp.allclose(out_na, out_bf, atol=1e-5, rtol=1e-5)

    print("KERNEL_OK")
</pallas_src>

<mosaic_0001>
module attributes {stable_mosaic.version = 11 : i64} {
  func.func @_encoder_layer_kernel(%arg0: i32, %arg1: i32, %arg2: memref<1x16x32xf32, #tpu.memory_space<vmem>>, %arg3: memref<1x1x16xi32, #tpu.memory_space<vmem>>, %arg4: memref<32x96xf32, #tpu.memory_space<vmem>>, %arg5: memref<1x96xf32, #tpu.memory_space<vmem>>, %arg6: memref<32x32xf32, #tpu.memory_space<vmem>>, %arg7: memref<1x32xf32, #tpu.memory_space<vmem>>, %arg8: memref<1x32xf32, #tpu.memory_space<vmem>>, %arg9: memref<1x32xf32, #tpu.memory_space<vmem>>, %arg10: memref<32x64xf32, #tpu.memory_space<vmem>>, %arg11: memref<1x64xf32, #tpu.memory_space<vmem>>, %arg12: memref<64x32xf32, #tpu.memory_space<vmem>>, %arg13: memref<1x32xf32, #tpu.memory_space<vmem>>, %arg14: memref<1x32xf32, #tpu.memory_space<vmem>>, %arg15: memref<1x32xf32, #tpu.memory_space<vmem>>, %arg16: memref<1x8x32xf32, #tpu.memory_space<vmem>>, %arg17: memref<1x4x8x16xf32, #tpu.memory_space<vmem>>, %arg18: memref<16x32xf32, #tpu.memory_space<vmem>>, %arg19: memref<16x32xf32, #tpu.memory_space<vmem>>) attributes {dimension_semantics = [#tpu.dimension_semantics<parallel>, #tpu.dimension_semantics<arbitrary>], iteration_bounds = array<i64: 2, 2>, scalar_prefetch = 0 : i64, scratch_operands = 2 : i64, tpu.core_type = #tpu.core_type<tc>, window_params = [{transform_indices = @transform_0, window_bounds = array<i64: 1, 16, 32>}, {transform_indices = @transform_1, window_bounds = array<i64: 1, 1, 16>}, {pipeline_mode = #tpu.pipeline_mode<synchronous>, transform_indices = @transform_2, window_bounds = array<i64: 32, 96>}, {pipeline_mode = #tpu.pipeline_mode<synchronous>, transform_indices = @transform_3, window_bounds = array<i64: 1, 96>}, {pipeline_mode = #tpu.pipeline_mode<synchronous>, transform_indices = @transform_4, window_bounds = array<i64: 32, 32>}, {pipeline_mode = #tpu.pipeline_mode<synchronous>, transform_indices = @transform_5, window_bounds = array<i64: 1, 32>}, {pipeline_mode = #tpu.pipeline_mode<synchronous>, transform_indices = @transform_6, window_bounds = array<i64: 1, 32>}, {pipeline_mode = #tpu.pipeline_mode<synchronous>, transform_indices = @transform_7, window_bounds = array<i64: 1, 32>}, {pipeline_mode = #tpu.pipeline_mode<synchronous>, transform_indices = @transform_8, window_bounds = array<i64: 32, 64>}, {pipeline_mode = #tpu.pipeline_mode<synchronous>, transform_indices = @transform_9, window_bounds = array<i64: 1, 64>}, {pipeline_mode = #tpu.pipeline_mode<synchronous>, transform_indices = @transform_10, window_bounds = array<i64: 64, 32>}, {pipeline_mode = #tpu.pipeline_mode<synchronous>, transform_indices = @transform_11, window_bounds = array<i64: 1, 32>}, {pipeline_mode = #tpu.pipeline_mode<synchronous>, transform_indices = @transform_12, window_bounds = array<i64: 1, 32>}, {pipeline_mode = #tpu.pipeline_mode<synchronous>, transform_indices = @transform_13, window_bounds = array<i64: 1, 32>}, {transform_indices = @transform_14, window_bounds = array<i64: 1, 8, 32>}, {transform_indices = @transform_15, window_bounds = array<i64: 1, 4, 8, 16>}]} {
    %c0_i32 = arith.constant 0 : i32
    %0 = arith.cmpi eq, %arg1, %c0_i32 : i32
    %1 = arith.extui %0 : i1 to i32
    %c0_i32_0 = arith.constant 0 : i32
    %2 = arith.cmpi ne, %1, %c0_i32_0 : i32
    scf.if %2 {
      %c0_101 = arith.constant 0 : index
      %c0_102 = arith.constant 0 : index
      %c0_103 = arith.constant 0 : index
      %182 = vector.load %arg2[%c0_101, %c0_102, %c0_103] : memref<1x16x32xf32, #tpu.memory_space<vmem>>, vector<1x16x32xf32>
      %183 = vector.shape_cast %182 : vector<1x16x32xf32> to vector<16x32xf32>
      %c0_104 = arith.constant 0 : index
      %c32 = arith.constant 32 : index
      %184 = vector.load %arg4[%c0_104, %c32] : memref<32x96xf32, #tpu.memory_space<vmem>>, vector<32x64xf32>
      %cst_105 = arith.constant dense<0.000000e+00> : vector<16x64xf32>
      %185 = tpu.matmul %183, %184, %cst_105 {dimension_numbers = #tpu.dot_dimension_numbers<[1], [0], [0], [1], [0, 0, 1, 1], [], []>} : vector<16x32xf32>, vector<32x64xf32>, vector<16x64xf32> -> vector<16x64xf32>
      %c0_106 = arith.constant 0 : index
      %c32_107 = arith.constant 32 : index
      %186 = vector.load %arg5[%c0_106, %c32_107] : memref<1x96xf32, #tpu.memory_space<vmem>>, vector<1x64xf32>
      %187 = vector.broadcast %186 : vector<1x64xf32> to vector<16x64xf32>
      %188 = arith.addf %185, %187 : vector<16x64xf32>
      %189 = vector.extract_strided_slice %188 {offsets = [0, 0], sizes = [16, 32], strides = [1, 1]} : vector<16x64xf32> to vector<16x32xf32>
      %c0_108 = arith.constant 0 : index
      %c0_109 = arith.constant 0 : index
      %190 = vector.load %arg18[%c0_108, %c0_109] : memref<16x32xf32, #tpu.memory_space<vmem>>, vector<16x32xf32>
      tpu.vector_store %arg18[%c0_108, %c0_109], %189 {strides = array<i32>} : memref<16x32xf32, #tpu.memory_space<vmem>>, vector<16x32xf32>,
      %191 = vector.extract_strided_slice %188 {offsets = [0, 32], sizes = [16, 32], strides = [1, 1]} : vector<16x64xf32> to vector<16x32xf32>
      %c0_110 = arith.constant 0 : index
      %c0_111 = arith.constant 0 : index
      %192 = vector.load %arg19[%c0_110, %c0_111] : memref<16x32xf32, #tpu.memory_space<vmem>>, vector<16x32xf32>
      tpu.vector_store %arg19[%c0_110, %c0_111], %191 {strides = array<i32>} : memref<16x32xf32, #tpu.memory_space<vmem>>, vector<16x32xf32>,
    } else {
    }
    %c8_i32 = arith.constant 8 : i32
    %3 = arith.muli %arg1, %c8_i32 : i32
    %4 = tpu.assume_multiple %3, 8 : i32
    %c0 = arith.constant 0 : index
    %5 = arith.index_cast %4 : i32 to index
    %c0_1 = arith.constant 0 : index
    %6 = vector.load %arg2[%c0, %5, %c0_1] : memref<1x16x32xf32, #tpu.memory_space<vmem>>, vector<1x8x32xf32>
    %7 = vector.shape_cast %6 : vector<1x8x32xf32> to vector<8x32xf32>
    %c0_2 = arith.constant 0 : index
    %c0_3 = arith.constant 0 : index
    %8 = vector.load %arg4[%c0_2, %c0_3] : memref<32x96xf32, #tpu.memory_space<vmem>>, vector<32x32xf32>
    %cst = arith.constant dense<0.000000e+00> : vector<8x32xf32>
    %9 = tpu.matmul %7, %8, %cst {dimension_numbers = #tpu.dot_dimension_numbers<[1], [0], [0], [1], [0, 0, 1, 1], [], []>} : vector<8x32xf32>, vector<32x32xf32>, vector<8x32xf32> -> vector<8x32xf32>
    %c0_4 = arith.constant 0 : index
    %c0_5 = arith.constant 0 : index
    %10 = vector.load %arg5[%c0_4, %c0_5] : memref<1x96xf32, #tpu.memory_space<vmem>>, vector<1x32xf32>
    %11 = vector.broadcast %10 : vector<1x32xf32> to vector<8x32xf32>
    %12 = arith.addf %9, %11 : vector<8x32xf32>
    %cst_6 = arith.constant 0.353553385 : f32
    %13 = vector.broadcast %cst_6 : f32 to vector<8x32xf32>
    %14 = arith.mulf %12, %13 : vector<8x32xf32>
    %c0_7 = arith.constant 0 : index
    %c0_8 = arith.constant 0 : index
    %c0_9 = arith.constant 0 : index
    %15 = vector.load %arg3[%c0_7, %c0_8, %c0_9] : memref<1x1x16xi32, #tpu.memory_space<vmem>>, vector<1x1x16xi32>
    %16 = vector.shape_cast %15 : vector<1x1x16xi32> to vector<1x16xi32>
    %c0_i32_10 = arith.constant 0 : i32
    %17 = vector.broadcast %c0_i32_10 : i32 to vector<1x16xi32>
    %18 = arith.cmpi eq, %16, %17 : vector<1x16xi32>
    %cst_11 = arith.constant -1.000000e+10 : f32
    %cst_12 = arith.constant 0.000000e+00 : f32
    %19 = vector.broadcast %cst_11 : f32 to vector<1x16xf32>
    %20 = vector.broadcast %cst_12 : f32 to vector<1x16xf32>
    %21 = arith.select %18, %19, %20 : vector<1x16xi1>, vector<1x16xf32>
    %c0_13 = arith.constant 0 : index
    %c0_14 = arith.constant 0 : index
    %22 = vector.load %arg7[%c0_13, %c0_14] : memref<1x32xf32, #tpu.memory_space<vmem>>, vector<1x32xf32>
    %23 = vector.shape_cast %22 : vector<1x32xf32> to vector<1x32xf32>
    %24 = vector.broadcast %23 : vector<1x32xf32> to vector<8x32xf32>
    %25 = vector.extract_strided_slice %14 {offsets = [0, 0], sizes = [8, 8], strides = [1, 1]} : vector<8x32xf32> to vector<8x8xf32>
    %c0_15 = arith.constant 0 : index
    %c0_16 = arith.constant 0 : index
    %26 = vector.load %arg18[%c0_15, %c0_16] : memref<16x32xf32, #tpu.memory_space<vmem>>, vector<16x8xf32>
    %c0_17 = arith.constant 0 : index
    %c0_18 = arith.constant 0 : index
    %27 = vector.load %arg19[%c0_17, %c0_18] : memref<16x32xf32, #tpu.memory_space<vmem>>, vector<16x8xf32>
    %cst_19 = arith.constant dense<0.000000e+00> : vector<8x16xf32>
    %28 = tpu.matmul %25, %26, %cst_19 {dimension_numbers = #tpu.dot_dimension_numbers<[1], [1], [0], [0], [0, 0, 1, 0], [], []>} : vector<8x8xf32>, vector<16x8xf32>, vector<8x16xf32> -> vector<8x16xf32>
    %29 = vector.broadcast %21 : vector<1x16xf32> to vector<8x16xf32>
    %30 = arith.addf %28, %29 : vector<8x16xf32>
    %cst_20 = arith.constant dense<0xFF800000> : vector<8xf32>
    %31 = vector.multi_reduction <maximumf>, %30, %cst_20 [1] : vector<8x16xf32> to vector<8xf32>
    %32 = vector.shape_cast %31 : vector<8xf32> to vector<8x1xf32>
    %33 = vector.broadcast %32 : vector<8x1xf32> to vector<8x16xf32>
    %34 = arith.subf %30, %33 : vector<8x16xf32>
    %35 = math.exp %34 : vector<8x16xf32>
    %cst_21 = arith.constant dense<0.000000e+00> : vector<8xf32>
    %36 = vector.multi_reduction <add>, %35, %cst_21 [1] : vector<8x16xf32> to vector<8xf32>
    %37 = vector.shape_cast %36 : vector<8xf32> to vector<8x1xf32>
    %38 = tpu.reciprocal %37 : vector<8x1xf32> -> vector<8x1xf32>
    %39 = vector.broadcast %38 : vector<8x1xf32> to vector<8x16xf32>
    %40 = arith.mulf %35, %39 : vector<8x16xf32>
    %c0_22 = arith.constant 0 : index
    %c0_23 = arith.constant 0 : index
    %c0_24 = arith.constant 0 : index
    %c0_25 = arith.constant 0 : index
    %41 = vector.load %arg17[%c0_22, %c0_23, %c0_24, %c0_25] : memref<1x4x8x16xf32, #tpu.memory_space<vmem>>, vector<1x1x8x16xf32>
    %42 = vector.shape_cast %41 : vector<1x1x8x16xf32> to vector<8x16xf32>
    %43 = vector.shape_cast %40 : vector<8x16xf32> to vector<1x1x8x16xf32>
    tpu.vector_store %arg17[%c0_22, %c0_23, %c0_24, %c0_25], %43 {strides = array<i32>} : memref<1x4x8x16xf32, #tpu.memory_space<vmem>>, vector<1x1x8x16xf32>,
    %cst_26 = arith.constant dense<0.000000e+00> : vector<8x8xf32>
    %44 = tpu.matmul %40, %27, %cst_26 {dimension_numbers = #tpu.dot_dimension_numbers<[1], [0], [0], [1], [0, 0, 1, 1], [], []>} : vector<8x16xf32>, vector<16x8xf32>, vector<8x8xf32> -> vector<8x8xf32>
    %c0_27 = arith.constant 0 : index
    %c0_28 = arith.constant 0 : index
    %45 = vector.load %arg6[%c0_27, %c0_28] : memref<32x32xf32, #tpu.memory_space<vmem>>, vector<8x32xf32>
    %cst_29 = arith.constant dense<0.000000e+00> : vector<8x32xf32>
    %46 = tpu.matmul %44, %45, %cst_29 {dimension_numbers = #tpu.dot_dimension_numbers<[1], [0], [0], [1], [0, 0, 1, 1], [], []>} : vector<8x8xf32>, vector<8x32xf32>, vector<8x32xf32> -> vector<8x32xf32>
    %47 = arith.addf %24, %46 : vector<8x32xf32>
    %48 = vector.extract_strided_slice %14 {offsets = [0, 8], sizes = [8, 8], strides = [1, 1]} : vector<8x32xf32> to vector<8x8xf32>
    %c0_30 = arith.constant 0 : index
    %c8 = arith.constant 8 : index
    %49 = vector.load %arg18[%c0_30, %c8] : memref<16x32xf32, #tpu.memory_space<vmem>>, vector<16x8xf32>
    %c0_31 = arith.constant 0 : index
    %c8_32 = arith.constant 8 : index
    %50 = vector.load %arg19[%c0_31, %c8_32] : memref<16x32xf32, #tpu.memory_space<vmem>>, vector<16x8xf32>
    %cst_33 = arith.constant dense<0.000000e+00> : vector<8x16xf32>
    %51 = tpu.matmul %48, %49, %cst_33 {dimension_numbers = #tpu.dot_dimension_numbers<[1], [1], [0], [0], [0, 0, 1, 0], [], []>} : vector<8x8xf32>, vector<16x8xf32>, vector<8x16xf32> -> vector<8x16xf32>
    %52 = vector.broadcast %21 : vector<1x16xf32> to vector<8x16xf32>
    %53 = arith.addf %51, %52 : vector<8x16xf32>
    %cst_34 = arith.constant dense<0xFF800000> : vector<8xf32>
    %54 = vector.multi_reduction <maximumf>, %53, %cst_34 [1] : vector<8x16xf32> to vector<8xf32>
    %55 = vector.shape_cast %54 : vector<8xf32> to vector<8x1xf32>
    %56 = vector.broadcast %55 : vector<8x1xf32> to vector<8x16xf32>
    %57 = arith.subf %53, %56 : vector<8x16xf32>
    %58 = math.exp %57 : vector<8x16xf32>
    %cst_35 = arith.constant dense<0.000000e+00> : vector<8xf32>
    %59 = vector.multi_reduction <add>, %58, %cst_35 [1] : vector<8x16xf32> to vector<8xf32>
    %60 = vector.shape_cast %59 : vector<8xf32> to vector<8x1xf32>
    %61 = tpu.reciprocal %60 : vector<8x1xf32> -> vector<8x1xf32>
    %62 = vector.broadcast %61 : vector<8x1xf32> to vector<8x16xf32>
    %63 = arith.mulf %58, %62 : vector<8x16xf32>
    %c0_36 = arith.constant 0 : index
    %c1 = arith.constant 1 : index
    %c0_37 = arith.constant 0 : index
    %c0_38 = arith.constant 0 : index
    %64 = vector.load %arg17[%c0_36, %c1, %c0_37, %c0_38] : memref<1x4x8x16xf32, #tpu.memory_space<vmem>>, vector<1x1x8x16xf32>
    %65 = vector.shape_cast %64 : vector<1x1x8x16xf32> to vector<8x16xf32>
    %66 = vector.shape_cast %63 : vector<8x16xf32> to vector<1x1x8x16xf32>
    tpu.vector_store %arg17[%c0_36, %c1, %c0_37, %c0_38], %66 {strides = array<i32>} : memref<1x4x8x16xf32, #tpu.memory_space<vmem>>, vector<1x1x8x16xf32>,
    %cst_39 = arith.constant dense<0.000000e+00> : vector<8x8xf32>
    %67 = tpu.matmul %63, %50, %cst_39 {dimension_numbers = #tpu.dot_dimension_numbers<[1], [0], [0], [1], [0, 0, 1, 1], [], []>} : vector<8x16xf32>, vector<16x8xf32>, vector<8x8xf32> -> vector<8x8xf32>
    %c8_40 = arith.constant 8 : index
    %c0_41 = arith.constant 0 : index
    %68 = vector.load %arg6[%c8_40, %c0_41] : memref<32x32xf32, #tpu.memory_space<vmem>>, vector<8x32xf32>
    %cst_42 = arith.constant dense<0.000000e+00> : vector<8x32xf32>
    %69 = tpu.matmul %67, %68, %cst_42 {dimension_numbers = #tpu.dot_dimension_numbers<[1], [0], [0], [1], [0, 0, 1, 1], [], []>} : vector<8x8xf32>, vector<8x32xf32>, vector<8x32xf32> -> vector<8x32xf32>
    %70 = arith.addf %47, %69 : vector<8x32xf32>
    %71 = vector.extract_strided_slice %14 {offsets = [0, 16], sizes = [8, 8], strides = [1, 1]} : vector<8x32xf32> to vector<8x8xf32>
    %c0_43 = arith.constant 0 : index
    %c16 = arith.constant 16 : index
    %72 = vector.load %arg18[%c0_43, %c16] : memref<16x32xf32, #tpu.memory_space<vmem>>, vector<16x8xf32>
    %c0_44 = arith.constant 0 : index
    %c16_45 = arith.constant 16 : index
    %73 = vector.load %arg19[%c0_44, %c16_45] : memref<16x32xf32, #tpu.memory_space<vmem>>, vector<16x8xf32>
    %cst_46 = arith.constant dense<0.000000e+00> : vector<8x16xf32>
    %74 = tpu.matmul %71, %72, %cst_46 {dimension_numbers = #tpu.dot_dimension_numbers<[1], [1], [0], [0], [0, 0, 1, 0], [], []>} : vector<8x8xf32>, vector<16x8xf32>, vector<8x16xf32> -> vector<8x16xf32>
    %75 = vector.broadcast %21 : vector<1x16xf32> to vector<8x16xf32>
    %76 = arith.addf %74, %75 : vector<8x16xf32>
    %cst_47 = arith.constant dense<0xFF800000> : vector<8xf32>
    %77 = vector.multi_reduction <maximumf>, %76, %cst_47 [1] : vector<8x16xf32> to vector<8xf32>
    %78 = vector.shape_cast %77 : vector<8xf32> to vector<8x1xf32>
    %79 = vector.broadcast %78 : vector<8x1xf32> to vector<8x16xf32>
    %80 = arith.subf %76, %79 : vector<8x16xf32>
    %81 = math.exp %80 : vector<8x16xf32>
    %cst_48 = arith.constant dense<0.000000e+00> : vector<8xf32>
    %82 = vector.multi_reduction <add>, %81, %cst_48 [1] : vector<8x16xf32> to vector<8xf32>
    %83 = vector.shape_cast %82 : vector<8xf32> to vector<8x1xf32>
    %84 = tpu.reciprocal %83 : vector<8x1xf32> -> vector<8x1xf32>
    %85 = vector.broadcast %84 : vector<8x1xf32> to vector<8x16xf32>
    %86 = arith.mulf %81, %85 : vector<8x16xf32>
    %c0_49 = arith.constant 0 : index
    %c2 = arith.constant 2 : index
    %c0_50 = arith.constant 0 : index
    %c0_51 = arith.constant 0 : index
    %87 = vector.load %arg17[%c0_49, %c2, %c0_50, %c0_51] : memref<1x4x8x16xf32, #tpu.memory_space<vmem>>, vector<1x1x8x16xf32>
    %88 = vector.shape_cast %87 : vector<1x1x8x16xf32> to vector<8x16xf32>
    %89 = vector.shape_cast %86 : vector<8x16xf32> to vector<1x1x8x16xf32>
    tpu.vector_store %arg17[%c0_49, %c2, %c0_50, %c0_51], %89 {strides = array<i32>} : memref<1x4x8x16xf32, #tpu.memory_space<vmem>>, vector<1x1x8x16xf32>,
    %cst_52 = arith.constant dense<0.000000e+00> : vector<8x8xf32>
    %90 = tpu.matmul %86, %73, %cst_52 {dimension_numbers = #tpu.dot_dimension_numbers<[1], [0], [0], [1], [0, 0, 1, 1], [], []>} : vector<8x16xf32>, vector<16x8xf32>, vector<8x8xf32> -> vector<8x8xf32>
    %c16_53 = arith.constant 16 : index
    %c0_54 = arith.constant 0 : index
    %91 = vector.load %arg6[%c16_53, %c0_54] : memref<32x32xf32, #tpu.memory_space<vmem>>, vector<8x32xf32>
    %cst_55 = arith.constant dense<0.000000e+00> : vector<8x32xf32>
    %92 = tpu.matmul %90, %91, %cst_55 {dimension_numbers = #tpu.dot_dimension_numbers<[1], [0], [0], [1], [0, 0, 1, 1], [], []>} : vector<8x8xf32>, vector<8x32xf32>, vector<8x32xf32> -> vector<8x32xf32>
    %93 = arith.addf %70, %92 : vector<8x32xf32>
    %94 = vector.extract_strided_slice %14 {offsets = [0, 24], sizes = [8, 8], strides = [1, 1]} : vector<8x32xf32> to vector<8x8xf32>
    %c0_56 = arith.constant 0 : index
    %c24 = arith.constant 24 : index
    %95 = vector.load %arg18[%c0_56, %c24] : memref<16x32xf32, #tpu.memory_space<vmem>>, vector<16x8xf32>
    %c0_57 = arith.constant 0 : index
    %c24_58 = arith.constant 24 : index
    %96 = vector.load %arg19[%c0_57, %c24_58] : memref<16x32xf32, #tpu.memory_space<vmem>>, vector<16x8xf32>
    %cst_59 = arith.constant dense<0.000000e+00> : vector<8x16xf32>
    %97 = tpu.matmul %94, %95, %cst_59 {dimension_numbers = #tpu.dot_dimension_numbers<[1], [1], [0], [0], [0, 0, 1, 0], [], []>} : vector<8x8xf32>, vector<16x8xf32>, vector<8x16xf32> -> vector<8x16xf32>
    %98 = vector.broadcast %21 : vector<1x16xf32> to vector<8x16xf32>
    %99 = arith.addf %97, %98 : vector<8x16xf32>
    %cst_60 = arith.constant dense<0xFF800000> : vector<8xf32>
    %100 = vector.multi_reduction <maximumf>, %99, %cst_60 [1] : vector<8x16xf32> to vector<8xf32>
    %101 = vector.shape_cast %100 : vector<8xf32> to vector<8x1xf32>
    %102 = vector.broadcast %101 : vector<8x1xf32> to vector<8x16xf32>
    %103 = arith.subf %99, %102 : vector<8x16xf32>
    %104 = math.exp %103 : vector<8x16xf32>
    %cst_61 = arith.constant dense<0.000000e+00> : vector<8xf32>
    %105 = vector.multi_reduction <add>, %104, %cst_61 [1] : vector<8x16xf32> to vector<8xf32>
    %106 = vector.shape_cast %105 : vector<8xf32> to vector<8x1xf32>
    %107 = tpu.reciprocal %106 : vector<8x1xf32> -> vector<8x1xf32>
    %108 = vector.broadcast %107 : vector<8x1xf32> to vector<8x16xf32>
    %109 = arith.mulf %104, %108 : vector<8x16xf32>
    %c0_62 = arith.constant 0 : index
    %c3 = arith.constant 3 : index
    %c0_63 = arith.constant 0 : index
    %c0_64 = arith.constant 0 : index
    %110 = vector.load %arg17[%c0_62, %c3, %c0_63, %c0_64] : memref<1x4x8x16xf32, #tpu.memory_space<vmem>>, vector<1x1x8x16xf32>
    %111 = vector.shape_cast %110 : vector<1x1x8x16xf32> to vector<8x16xf32>
    %112 = vector.shape_cast %109 : vector<8x16xf32> to vector<1x1x8x16xf32>
    tpu.vector_store %arg17[%c0_62, %c3, %c0_63, %c0_64], %112 {strides = array<i32>} : memref<1x4x8x16xf32, #tpu.memory_space<vmem>>, vector<1x1x8x16xf32>,
    %cst_65 = arith.constant dense<0.000000e+00> : vector<8x8xf32>
    %113 = tpu.matmul %109, %96, %cst_65 {dimension_numbers = #tpu.dot_dimension_numbers<[1], [0], [0], [1], [0, 0, 1, 1], [], []>} : vector<8x16xf32>, vector<16x8xf32>, vector<8x8xf32> -> vector<8x8xf32>
    %c24_66 = arith.constant 24 : index
    %c0_67 = arith.constant 0 : index
    %114 = vector.load %arg6[%c24_66, %c0_67] : memref<32x32xf32, #tpu.memory_space<vmem>>, vector<8x32xf32>
    %cst_68 = arith.constant dense<0.000000e+00> : vector<8x32xf32>
    %115 = tpu.matmul %113, %114, %cst_68 {dimension_numbers = #tpu.dot_dimension_numbers<[1], [0], [0], [1], [0, 0, 1, 1], [], []>} : vector<8x8xf32>, vector<8x32xf32>, vector<8x32xf32> -> vector<8x32xf32>
    %116 = arith.addf %93, %115 : vector<8x32xf32>
    %117 = arith.addf %7, %116 : vector<8x32xf32>
    %cst_69 = arith.constant dense<0.000000e+00> : vector<8xf32>
    %118 = vector.multi_reduction <add>, %117, %cst_69 [1] : vector<8x32xf32> to vector<8xf32>
    %119 = vector.shape_cast %118 : vector<8xf32> to vector<8x1xf32>
    %cst_70 = arith.constant 3.200000e+01 : f32
    %120 = vector.broadcast %cst_70 : f32 to vector<8x1xf32>
    %121 = arith.divf %119, %120 : vector<8x1xf32>
    %122 = vector.broadcast %121 : vector<8x1xf32> to vector<8x32xf32>
    %123 = arith.subf %117, %122 : vector<8x32xf32>
    %124 = arith.mulf %123, %123 : vector<8x32xf32>
    %cst_71 = arith.constant dense<0.000000e+00> : vector<8xf32>
    %125 = vector.multi_reduction <add>, %124, %cst_71 [1] : vector<8x32xf32> to vector<8xf32>
    %126 = vector.shape_cast %125 : vector<8xf32> to vector<8x1xf32>
    %cst_72 = arith.constant 3.200000e+01 : f32
    %127 = vector.broadcast %cst_72 : f32 to vector<8x1xf32>
    %128 = arith.divf %126, %127 : vector<8x1xf32>
    %129 = vector.broadcast %121 : vector<8x1xf32> to vector<8x32xf32>
    %130 = arith.subf %117, %129 : vector<8x32xf32>
    %cst_73 = arith.constant 9.99999974E-6 : f32
    %131 = vector.broadcast %cst_73 : f32 to vector<8x1xf32>
    %132 = arith.addf %128, %131 : vector<8x1xf32>
    %133 = math.rsqrt %132 : vector<8x1xf32>
    %134 = vector.broadcast %133 : vector<8x1xf32> to vector<8x32xf32>
    %135 = arith.mulf %130, %134 : vector<8x32xf32>
    %c0_74 = arith.constant 0 : index
    %c0_75 = arith.constant 0 : index
    %136 = vector.load %arg8[%c0_74, %c0_75] : memref<1x32xf32, #tpu.memory_space<vmem>>, vector<1x32xf32>
    %137 = vector.broadcast %136 : vector<1x32xf32> to vector<8x32xf32>
    %138 = arith.mulf %135, %137 : vector<8x32xf32>
    %c0_76 = arith.constant 0 : index
    %c0_77 = arith.constant 0 : index
    %139 = vector.load %arg9[%c0_76, %c0_77] : memref<1x32xf32, #tpu.memory_space<vmem>>, vector<1x32xf32>
    %140 = vector.broadcast %139 : vector<1x32xf32> to vector<8x32xf32>
    %141 = arith.addf %138, %140 : vector<8x32xf32>
    %c0_78 = arith.constant 0 : index
    %c0_79 = arith.constant 0 : index
    %142 = vector.load %arg10[%c0_78, %c0_79] : memref<32x64xf32, #tpu.memory_space<vmem>>, vector<32x64xf32>
    %cst_80 = arith.constant dense<0.000000e+00> : vector<8x64xf32>
    %143 = tpu.matmul %141, %142, %cst_80 {dimension_numbers = #tpu.dot_dimension_numbers<[1], [0], [0], [1], [0, 0, 1, 1], [], []>} : vector<8x32xf32>, vector<32x64xf32>, vector<8x64xf32> -> vector<8x64xf32>
    %c0_81 = arith.constant 0 : index
    %c0_82 = arith.constant 0 : index
    %144 = vector.load %arg11[%c0_81, %c0_82] : memref<1x64xf32, #tpu.memory_space<vmem>>, vector<1x64xf32>
    %145 = vector.broadcast %144 : vector<1x64xf32> to vector<8x64xf32>
    %146 = arith.addf %143, %145 : vector<8x64xf32>
    %cst_83 = arith.constant 0.000000e+00 : f32
    %147 = vector.broadcast %cst_83 : f32 to vector<8x64xf32>
    %148 = arith.maximumf %146, %147 : vector<8x64xf32>
    %c0_84 = arith.constant 0 : index
    %c0_85 = arith.constant 0 : index
    %149 = vector.load %arg12[%c0_84, %c0_85] : memref<64x32xf32, #tpu.memory_space<vmem>>, vector<64x32xf32>
    %cst_86 = arith.constant dense<0.000000e+00> : vector<8x32xf32>
    %150 = tpu.matmul %148, %149, %cst_86 {dimension_numbers = #tpu.dot_dimension_numbers<[1], [0], [0], [1], [0, 0, 1, 1], [], []>} : vector<8x64xf32>, vector<64x32xf32>, vector<8x32xf32> -> vector<8x32xf32>
    %c0_87 = arith.constant 0 : index
    %c0_88 = arith.constant 0 : index
    %151 = vector.load %arg13[%c0_87, %c0_88] : memref<1x32xf32, #tpu.memory_space<vmem>>, vector<1x32xf32>
    %152 = vector.broadcast %151 : vector<1x32xf32> to vector<8x32xf32>
    %153 = arith.addf %150, %152 : vector<8x32xf32>
    %154 = arith.addf %141, %153 : vector<8x32xf32>
    %cst_89 = arith.constant dense<0.000000e+00> : vector<8xf32>
    %155 = vector.multi_reduction <add>, %154, %cst_89 [1] : vector<8x32xf32> to vector<8xf32>
    %156 = vector.shape_cast %155 : vector<8xf32> to vector<8x1xf32>
    %cst_90 = arith.constant 3.200000e+01 : f32
    %157 = vector.broadcast %cst_90 : f32 to vector<8x1xf32>
    %158 = arith.divf %156, %157 : vector<8x1xf32>
    %159 = vector.broadcast %158 : vector<8x1xf32> to vector<8x32xf32>
    %160 = arith.subf %154, %159 : vector<8x32xf32>
    %161 = arith.mulf %160, %160 : vector<8x32xf32>
    %cst_91 = arith.constant dense<0.000000e+00> : vector<8xf32>
    %162 = vector.multi_reduction <add>, %161, %cst_91 [1] : vector<8x32xf32> to vector<8xf32>
    %163 = vector.shape_cast %162 : vector<8xf32> to vector<8x1xf32>
    %cst_92 = arith.constant 3.200000e+01 : f32
    %164 = vector.broadcast %cst_92 : f32 to vector<8x1xf32>
    %165 = arith.divf %163, %164 : vector<8x1xf32>
    %166 = vector.broadcast %158 : vector<8x1xf32> to vector<8x32xf32>
    %167 = arith.subf %154, %166 : vector<8x32xf32>
    %cst_93 = arith.constant 9.99999974E-6 : f32
    %168 = vector.broadcast %cst_93 : f32 to vector<8x1xf32>
    %169 = arith.addf %165, %168 : vector<8x1xf32>
    %170 = math.rsqrt %169 : vector<8x1xf32>
    %171 = vector.broadcast %170 : vector<8x1xf32> to vector<8x32xf32>
    %172 = arith.mulf %167, %171 : vector<8x32xf32>
    %c0_94 = arith.constant 0 : index
    %c0_95 = arith.constant 0 : index
    %173 = vector.load %arg14[%c0_94, %c0_95] : memref<1x32xf32, #tpu.memory_space<vmem>>, vector<1x32xf32>
    %174 = vector.broadcast %173 : vector<1x32xf32> to vector<8x32xf32>
    %175 = arith.mulf %172, %174 : vector<8x32xf32>
    %c0_96 = arith.constant 0 : index
    %c0_97 = arith.constant 0 : index
    %176 = vector.load %arg15[%c0_96, %c0_97] : memref<1x32xf32, #tpu.memory_space<vmem>>, vector<1x32xf32>
    %177 = vector.broadcast %176 : vector<1x32xf32> to vector<8x32xf32>
    %178 = arith.addf %175, %177 : vector<8x32xf32>
    %c0_98 = arith.constant 0 : index
    %c0_99 = arith.constant 0 : index
    %c0_100 = arith.constant 0 : index
    %179 = vector.load %arg16[%c0_98, %c0_99, %c0_100] : memref<1x8x32xf32, #tpu.memory_space<vmem>>, vector<1x8x32xf32>
    %180 = vector.shape_cast %179 : vector<1x8x32xf32> to vector<8x32xf32>
    %181 = vector.shape_cast %178 : vector<8x32xf32> to vector<1x8x32xf32>
    tpu.vector_store %arg16[%c0_98, %c0_99, %c0_100], %181 {strides = array<i32>} : memref<1x8x32xf32, #tpu.memory_space<vmem>>, vector<1x8x32xf32>,
    return
  }
  func.func @transform_0(%arg0: i32, %arg1: i32) -> (i32, i32, i32) {
    %c0_i32 = arith.constant 0 : i32
    %c0_i32_0 = arith.constant 0 : i32
    %c0_i32_1 = arith.constant 0 : i32
    return %arg0, %c0_i32, %c0_i32_0 : i32, i32, i32
  }
  func.func @transform_1(%arg0: i32, %arg1: i32) -> (i32, i32, i32) {
    %c0_i32 = arith.constant 0 : i32
    %c0_i32_0 = arith.constant 0 : i32
    %c0_i32_1 = arith.constant 0 : i32
    return %arg0, %c0_i32, %c0_i32_0 : i32, i32, i32
  }
  func.func @transform_2(%arg0: i32, %arg1: i32) -> (i32, i32) {
    %c0_i32 = arith.constant 0 : i32
    %c0_i32_0 = arith.constant 0 : i32
    %c0_i32_1 = arith.constant 0 : i32
    return %c0_i32, %c0_i32_0 : i32, i32
  }
  func.func @transform_3(%arg0: i32, %arg1: i32) -> (i32, i32) {
    %c0_i32 = arith.constant 0 : i32
    %c0_i32_0 = arith.constant 0 : i32
    %c0_i32_1 = arith.constant 0 : i32
    return %c0_i32, %c0_i32_0 : i32, i32
  }
  func.func @transform_4(%arg0: i32, %arg1: i32) -> (i32, i32) {
    %c0_i32 = arith.constant 0 : i32
    %c0_i32_0 = arith.constant 0 : i32
    %c0_i32_1 = arith.constant 0 : i32
    return %c0_i32, %c0_i32_0 : i32, i32
  }
  func.func @transform_5(%arg0: i32, %arg1: i32) -> (i32, i32) {
    %c0_i32 = arith.constant 0 : i32
    %c0_i32_0 = arith.constant 0 : i32
    %c0_i32_1 = arith.constant 0 : i32
    return %c0_i32, %c0_i32_0 : i32, i32
  }
  func.func @transform_6(%arg0: i32, %arg1: i32) -> (i32, i32) {
    %c0_i32 = arith.constant 0 : i32
    %c0_i32_0 = arith.constant 0 : i32
    %c0_i32_1 = arith.constant 0 : i32
    return %c0_i32, %c0_i32_0 : i32, i32
  }
  func.func @transform_7(%arg0: i32, %arg1: i32) -> (i32, i32) {
    %c0_i32 = arith.constant 0 : i32
    %c0_i32_0 = arith.constant 0 : i32
    %c0_i32_1 = arith.constant 0 : i32
    return %c0_i32, %c0_i32_0 : i32, i32
  }
  func.func @transform_8(%arg0: i32, %arg1: i32) -> (i32, i32) {
    %c0_i32 = arith.constant 0 : i32
    %c0_i32_0 = arith.constant 0 : i32
    %c0_i32_1 = arith.constant 0 : i32
    return %c0_i32, %c0_i32_0 : i32, i32
  }
  func.func @transform_9(%arg0: i32, %arg1: i32) -> (i32, i32) {
    %c0_i32 = arith.constant 0 : i32
    %c0_i32_0 = arith.constant 0 : i32
    %c0_i32_1 = arith.constant 0 : i32
    return %c0_i32, %c0_i32_0 : i32, i32
  }
  func.func @transform_10(%arg0: i32, %arg1: i32) -> (i32, i32) {
    %c0_i32 = arith.constant 0 : i32
    %c0_i32_0 = arith.constant 0 : i32
    %c0_i32_1 = arith.constant 0 : i32
    return %c0_i32, %c0_i32_0 : i32, i32
  }
  func.func @transform_11(%arg0: i32, %arg1: i32) -> (i32, i32) {
    %c0_i32 = arith.constant 0 : i32
    %c0_i32_0 = arith.constant 0 : i32
    %c0_i32_1 = arith.constant 0 : i32
    return %c0_i32, %c0_i32_0 : i32, i32
  }
  func.func @transform_12(%arg0: i32, %arg1: i32) -> (i32, i32) {
    %c0_i32 = arith.constant 0 : i32
    %c0_i32_0 = arith.constant 0 : i32
    %c0_i32_1 = arith.constant 0 : i32
    return %c0_i32, %c0_i32_0 : i32, i32
  }
  func.func @transform_13(%arg0: i32, %arg1: i32) -> (i32, i32) {
    %c0_i32 = arith.constant 0 : i32
    %c0_i32_0 = arith.constant 0 : i32
    %c0_i32_1 = arith.constant 0 : i32
    return %c0_i32, %c0_i32_0 : i32, i32
  }
  func.func @transform_14(%arg0: i32, %arg1: i32) -> (i32, i32, i32) {
    %c0_i32 = arith.constant 0 : i32
    %c0_i32_0 = arith.constant 0 : i32
    return %arg0, %arg1, %c0_i32 : i32, i32, i32
  }
  func.func @transform_15(%arg0: i32, %arg1: i32) -> (i32, i32, i32, i32) {
    %c0_i32 = arith.constant 0 : i32
    %c0_i32_0 = arith.constant 0 : i32
    %c0_i32_1 = arith.constant 0 : i32
    return %arg0, %c0_i32, %arg1, %c0_i32_0 : i32, i32, i32, i32
  }
}

module attributes {stable_mosaic.version = 11 : i64} {
  func.func @_encoder_layer_kernel(%arg0: i32, %arg1: i32, %arg2: memref<1x16x32xf32, #tpu.memory_space<vmem>>, %arg3: memref<1x1x16xi32, #tpu.memory_space<vmem>>, %arg4: memref<32x96xf32, #tpu.memory_space<vmem>>, %arg5: memref<1x96xf32, #tpu.memory_space<vmem>>, %arg6: memref<32x32xf32, #tpu.memory_space<vmem>>, %arg7: memref<1x32xf32, #tpu.memory_space<vmem>>, %arg8: memref<1x32xf32, #tpu.memory_space<vmem>>, %arg9: memref<1x32xf32, #tpu.memory_space<vmem>>, %arg10: memref<32x64xf32, #tpu.memory_space<vmem>>, %arg11: memref<1x64xf32, #tpu.memory_space<vmem>>, %arg12: memref<64x32xf32, #tpu.memory_space<vmem>>, %arg13: memref<1x32xf32, #tpu.memory_space<vmem>>, %arg14: memref<1x32xf32, #tpu.memory_space<vmem>>, %arg15: memref<1x32xf32, #tpu.memory_space<vmem>>, %arg16: memref<1x8x32xf32, #tpu.memory_space<vmem>>, %arg17: memref<1x4x8x16xf32, #tpu.memory_space<vmem>>, %arg18: memref<16x32xf32, #tpu.memory_space<vmem>>, %arg19: memref<16x32xf32, #tpu.memory_space<vmem>>) attributes {dimension_semantics = [#tpu.dimension_semantics<parallel>, #tpu.dimension_semantics<arbitrary>], iteration_bounds = array<i64: 2, 2>, scalar_prefetch = 0 : i64, scratch_operands = 2 : i64, tpu.core_type = #tpu.core_type<tc>, window_params = [{transform_indices = @transform_0, window_bounds = array<i64: 1, 16, 32>}, {transform_indices = @transform_1, window_bounds = array<i64: 1, 1, 16>}, {pipeline_mode = #tpu.pipeline_mode<synchronous>, transform_indices = @transform_2, window_bounds = array<i64: 32, 96>}, {pipeline_mode = #tpu.pipeline_mode<synchronous>, transform_indices = @transform_3, window_bounds = array<i64: 1, 96>}, {pipeline_mode = #tpu.pipeline_mode<synchronous>, transform_indices = @transform_4, window_bounds = array<i64: 32, 32>}, {pipeline_mode = #tpu.pipeline_mode<synchronous>, transform_indices = @transform_5, window_bounds = array<i64: 1, 32>}, {pipeline_mode = #tpu.pipeline_mode<synchronous>, transform_indices = @transform_6, window_bounds = array<i64: 1, 32>}, {pipeline_mode = #tpu.pipeline_mode<synchronous>, transform_indices = @transform_7, window_bounds = array<i64: 1, 32>}, {pipeline_mode = #tpu.pipeline_mode<synchronous>, transform_indices = @transform_8, window_bounds = array<i64: 32, 64>}, {pipeline_mode = #tpu.pipeline_mode<synchronous>, transform_indices = @transform_9, window_bounds = array<i64: 1, 64>}, {pipeline_mode = #tpu.pipeline_mode<synchronous>, transform_indices = @transform_10, window_bounds = array<i64: 64, 32>}, {pipeline_mode = #tpu.pipeline_mode<synchronous>, transform_indices = @transform_11, window_bounds = array<i64: 1, 32>}, {pipeline_mode = #tpu.pipeline_mode<synchronous>, transform_indices = @transform_12, window_bounds = array<i64: 1, 32>}, {pipeline_mode = #tpu.pipeline_mode<synchronous>, transform_indices = @transform_13, window_bounds = array<i64: 1, 32>}, {transform_indices = @transform_14, window_bounds = array<i64: 1, 8, 32>}, {transform_indices = @transform_15, window_bounds = array<i64: 1, 4, 8, 16>}]} {
    %c0_i32 = arith.constant 0 : i32
    %0 = arith.cmpi eq, %arg1, %c0_i32 : i32
    %1 = arith.extui %0 : i1 to i32
    %c0_i32_0 = arith.constant 0 : i32
    %2 = arith.cmpi ne, %1, %c0_i32_0 : i32
    scf.if %2 {
      %c0_101 = arith.constant 0 : index
      %c0_102 = arith.constant 0 : index
      %c0_103 = arith.constant 0 : index
      %182 = vector.load %arg2[%c0_101, %c0_102, %c0_103] : memref<1x16x32xf32, #tpu.memory_space<vmem>>, vector<1x16x32xf32>
      %183 = vector.shape_cast %182 : vector<1x16x32xf32> to vector<16x32xf32>
      %c0_104 = arith.constant 0 : index
      %c32 = arith.constant 32 : index
      %184 = vector.load %arg4[%c0_104, %c32] : memref<32x96xf32, #tpu.memory_space<vmem>>, vector<32x64xf32>
      %cst_105 = arith.constant dense<0.000000e+00> : vector<16x64xf32>
      %185 = tpu.matmul %183, %184, %cst_105 {dimension_numbers = #tpu.dot_dimension_numbers<[1], [0], [0], [1], [0, 0, 1, 1], [], []>} : vector<16x32xf32>, vector<32x64xf32>, vector<16x64xf32> -> vector<16x64xf32>
      %c0_106 = arith.constant 0 : index
      %c32_107 = arith.constant 32 : index
      %186 = vector.load %arg5[%c0_106, %c32_107] : memref<1x96xf32, #tpu.memory_space<vmem>>, vector<1x64xf32>
      %187 = vector.broadcast %186 : vector<1x64xf32> to vector<16x64xf32>
      %188 = arith.addf %185, %187 : vector<16x64xf32>
      %189 = vector.extract_strided_slice %188 {offsets = [0, 0], sizes = [16, 32], strides = [1, 1]} : vector<16x64xf32> to vector<16x32xf32>
      %c0_108 = arith.constant 0 : index
      %c0_109 = arith.constant 0 : index
      %190 = vector.load %arg18[%c0_108, %c0_109] : memref<16x32xf32, #tpu.memory_space<vmem>>, vector<16x32xf32>
      tpu.vector_store %arg18[%c0_108, %c0_109], %189 {strides = array<i32>} : memref<16x32xf32, #tpu.memory_space<vmem>>, vector<16x32xf32>,
      %191 = vector.extract_strided_slice %188 {offsets = [0, 32], sizes = [16, 32], strides = [1, 1]} : vector<16x64xf32> to vector<16x32xf32>
      %c0_110 = arith.constant 0 : index
      %c0_111 = arith.constant 0 : index
      %192 = vector.load %arg19[%c0_110, %c0_111] : memref<16x32xf32, #tpu.memory_space<vmem>>, vector<16x32xf32>
      tpu.vector_store %arg19[%c0_110, %c0_111], %191 {strides = array<i32>} : memref<16x32xf32, #tpu.memory_space<vmem>>, vector<16x32xf32>,
    } else {
    }
    %c8_i32 = arith.constant 8 : i32
    %3 = arith.muli %arg1, %c8_i32 : i32
    %4 = tpu.assume_multiple %3, 8 : i32
    %c0 = arith.constant 0 : index
    %5 = arith.index_cast %4 : i32 to index
    %c0_1 = arith.constant 0 : index
    %6 = vector.load %arg2[%c0, %5, %c0_1] : memref<1x16x32xf32, #tpu.memory_space<vmem>>, vector<1x8x32xf32>
    %7 = vector.shape_cast %6 : vector<1x8x32xf32> to vector<8x32xf32>
    %c0_2 = arith.constant 0 : index
    %c0_3 = arith.constant 0 : index
    %8 = vector.load %arg4[%c0_2, %c0_3] : memref<32x96xf32, #tpu.memory_space<vmem>>, vector<32x32xf32>
    %cst = arith.constant dense<0.000000e+00> : vector<8x32xf32>
    %9 = tpu.matmul %7, %8, %cst {dimension_numbers = #tpu.dot_dimension_numbers<[1], [0], [0], [1], [0, 0, 1, 1], [], []>} : vector<8x32xf32>, vector<32x32xf32>, vector<8x32xf32> -> vector<8x32xf32>
    %c0_4 = arith.constant 0 : index
    %c0_5 = arith.constant 0 : index
    %10 = vector.load %arg5[%c0_4, %c0_5] : memref<1x96xf32, #tpu.memory_space<vmem>>, vector<1x32xf32>
    %11 = vector.broadcast %10 : vector<1x32xf32> to vector<8x32xf32>
    %12 = arith.addf %9, %11 : vector<8x32xf32>
    %cst_6 = arith.constant 0.353553385 : f32
    %13 = vector.broadcast %cst_6 : f32 to vector<8x32xf32>
    %14 = arith.mulf %12, %13 : vector<8x32xf32>
    %c0_7 = arith.constant 0 : index
    %c0_8 = arith.constant 0 : index
    %c0_9 = arith.constant 0 : index
    %15 = vector.load %arg3[%c0_7, %c0_8, %c0_9] : memref<1x1x16xi32, #tpu.memory_space<vmem>>, vector<1x1x16xi32>
    %16 = vector.shape_cast %15 : vector<1x1x16xi32> to vector<1x16xi32>
    %c0_i32_10 = arith.constant 0 : i32
    %17 = vector.broadcast %c0_i32_10 : i32 to vector<1x16xi32>
    %18 = arith.cmpi eq, %16, %17 : vector<1x16xi32>
    %cst_11 = arith.constant -1.000000e+10 : f32
    %cst_12 = arith.constant 0.000000e+00 : f32
    %19 = vector.broadcast %cst_11 : f32 to vector<1x16xf32>
    %20 = vector.broadcast %cst_12 : f32 to vector<1x16xf32>
    %21 = arith.select %18, %19, %20 : vector<1x16xi1>, vector<1x16xf32>
    %c0_13 = arith.constant 0 : index
    %c0_14 = arith.constant 0 : index
    %22 = vector.load %arg7[%c0_13, %c0_14] : memref<1x32xf32, #tpu.memory_space<vmem>>, vector<1x32xf32>
    %23 = vector.shape_cast %22 : vector<1x32xf32> to vector<1x32xf32>
    %24 = vector.broadcast %23 : vector<1x32xf32> to vector<8x32xf32>
    %25 = vector.extract_strided_slice %14 {offsets = [0, 0], sizes = [8, 8], strides = [1, 1]} : vector<8x32xf32> to vector<8x8xf32>
    %c0_15 = arith.constant 0 : index
    %c0_16 = arith.constant 0 : index
    %26 = vector.load %arg18[%c0_15, %c0_16] : memref<16x32xf32, #tpu.memory_space<vmem>>, vector<16x8xf32>
    %c0_17 = arith.constant 0 : index
    %c0_18 = arith.constant 0 : index
    %27 = vector.load %arg19[%c0_17, %c0_18] : memref<16x32xf32, #tpu.memory_space<vmem>>, vector<16x8xf32>
    %cst_19 = arith.constant dense<0.000000e+00> : vector<8x16xf32>
    %28 = tpu.matmul %25, %26, %cst_19 {dimension_numbers = #tpu.dot_dimension_numbers<[1], [1], [0], [0], [0, 0, 1, 0], [], []>} : vector<8x8xf32>, vector<16x8xf32>, vector<8x16xf32> -> vector<8x16xf32>
    %29 = vector.broadcast %21 : vector<1x16xf32> to vector<8x16xf32>
    %30 = arith.addf %28, %29 : vector<8x16xf32>
    %cst_20 = arith.constant dense<0xFF800000> : vector<8xf32>
    %31 = vector.multi_reduction <maximumf>, %30, %cst_20 [1] : vector<8x16xf32> to vector<8xf32>
    %32 = vector.shape_cast %31 : vector<8xf32> to vector<8x1xf32>
    %33 = vector.broadcast %32 : vector<8x1xf32> to vector<8x16xf32>
    %34 = arith.subf %30, %33 : vector<8x16xf32>
    %35 = math.exp %34 : vector<8x16xf32>
    %cst_21 = arith.constant dense<0.000000e+00> : vector<8xf32>
    %36 = vector.multi_reduction <add>, %35, %cst_21 [1] : vector<8x16xf32> to vector<8xf32>
    %37 = vector.shape_cast %36 : vector<8xf32> to vector<8x1xf32>
    %38 = tpu.reciprocal %37 : vector<8x1xf32> -> vector<8x1xf32>
    %39 = vector.broadcast %38 : vector<8x1xf32> to vector<8x16xf32>
    %40 = arith.mulf %35, %39 : vector<8x16xf32>
    %c0_22 = arith.constant 0 : index
    %c0_23 = arith.constant 0 : index
    %c0_24 = arith.constant 0 : index
    %c0_25 = arith.constant 0 : index
    %41 = vector.load %arg17[%c0_22, %c0_23, %c0_24, %c0_25] : memref<1x4x8x16xf32, #tpu.memory_space<vmem>>, vector<1x1x8x16xf32>
    %42 = vector.shape_cast %41 : vector<1x1x8x16xf32> to vector<8x16xf32>
    %43 = vector.shape_cast %40 : vector<8x16xf32> to vector<1x1x8x16xf32>
    tpu.vector_store %arg17[%c0_22, %c0_23, %c0_24, %c0_25], %43 {strides = array<i32>} : memref<1x4x8x16xf32, #tpu.memory_space<vmem>>, vector<1x1x8x16xf32>,
    %cst_26 = arith.constant dense<0.000000e+00> : vector<8x8xf32>
    %44 = tpu.matmul %40, %27, %cst_26 {dimension_numbers = #tpu.dot_dimension_numbers<[1], [0], [0], [1], [0, 0, 1, 1], [], []>} : vector<8x16xf32>, vector<16x8xf32>, vector<8x8xf32> -> vector<8x8xf32>
    %c0_27 = arith.constant 0 : index
    %c0_28 = arith.constant 0 : index
    %45 = vector.load %arg6[%c0_27, %c0_28] : memref<32x32xf32, #tpu.memory_space<vmem>>, vector<8x32xf32>
    %cst_29 = arith.constant dense<0.000000e+00> : vector<8x32xf32>
    %46 = tpu.matmul %44, %45, %cst_29 {dimension_numbers = #tpu.dot_dimension_numbers<[1], [0], [0], [1], [0, 0, 1, 1], [], []>} : vector<8x8xf32>, vector<8x32xf32>, vector<8x32xf32> -> vector<8x32xf32>
    %47 = arith.addf %24, %46 : vector<8x32xf32>
    %48 = vector.extract_strided_slice %14 {offsets = [0, 8], sizes = [8, 8], strides = [1, 1]} : vector<8x32xf32> to vector<8x8xf32>
    %c0_30 = arith.constant 0 : index
    %c8 = arith.constant 8 : index
    %49 = vector.load %arg18[%c0_30, %c8] : memref<16x32xf32, #tpu.memory_space<vmem>>, vector<16x8xf32>
    %c0_31 = arith.constant 0 : index
    %c8_32 = arith.constant 8 : index
    %50 = vector.load %arg19[%c0_31, %c8_32] : memref<16x32xf32, #tpu.memory_space<vmem>>, vector<16x8xf32>
    %cst_33 = arith.constant dense<0.000000e+00> : vector<8x16xf32>
    %51 = tpu.matmul %48, %49, %cst_33 {dimension_numbers = #tpu.dot_dimension_numbers<[1], [1], [0], [0], [0, 0, 1, 0], [], []>} : vector<8x8xf32>, vector<16x8xf32>, vector<8x16xf32> -> vector<8x16xf32>
    %52 = vector.broadcast %21 : vector<1x16xf32> to vector<8x16xf32>
    %53 = arith.addf %51, %52 : vector<8x16xf32>
    %cst_34 = arith.constant dense<0xFF800000> : vector<8xf32>
    %54 = vector.multi_reduction <maximumf>, %53, %cst_34 [1] : vector<8x16xf32> to vector<8xf32>
    %55 = vector.shape_cast %54 : vector<8xf32> to vector<8x1xf32>
    %56 = vector.broadcast %55 : vector<8x1xf32> to vector<8x16xf32>
    %57 = arith.subf %53, %56 : vector<8x16xf32>
    %58 = math.exp %57 : vector<8x16xf32>
    %cst_35 = arith.constant dense<0.000000e+00> : vector<8xf32>
    %59 = vector.multi_reduction <add>, %58, %cst_35 [1] : vector<8x16xf32> to vector<8xf32>
    %60 = vector.shape_cast %59 : vector<8xf32> to vector<8x1xf32>
    %61 = tpu.reciprocal %60 : vector<8x1xf32> -> vector<8x1xf32>
    %62 = vector.broadcast %61 : vector<8x1xf32> to vector<8x16xf32>
    %63 = arith.mulf %58, %62 : vector<8x16xf32>
    %c0_36 = arith.constant 0 : index
    %c1 = arith.constant 1 : index
    %c0_37 = arith.constant 0 : index
    %c0_38 = arith.constant 0 : index
    %64 = vector.load %arg17[%c0_36, %c1, %c0_37, %c0_38] : memref<1x4x8x16xf32, #tpu.memory_space<vmem>>, vector<1x1x8x16xf32>
    %65 = vector.shape_cast %64 : vector<1x1x8x16xf32> to vector<8x16xf32>
    %66 = vector.shape_cast %63 : vector<8x16xf32> to vector<1x1x8x16xf32>
    tpu.vector_store %arg17[%c0_36, %c1, %c0_37, %c0_38], %66 {strides = array<i32>} : memref<1x4x8x16xf32, #tpu.memory_space<vmem>>, vector<1x1x8x16xf32>,
    %cst_39 = arith.constant dense<0.000000e+00> : vector<8x8xf32>
    %67 = tpu.matmul %63, %50, %cst_39 {dimension_numbers = #tpu.dot_dimension_numbers<[1], [0], [0], [1], [0, 0, 1, 1], [], []>} : vector<8x16xf32>, vector<16x8xf32>, vector<8x8xf32> -> vector<8x8xf32>
    %c8_40 = arith.constant 8 : index
    %c0_41 = arith.constant 0 : index
    %68 = vector.load %arg6[%c8_40, %c0_41] : memref<32x32xf32, #tpu.memory_space<vmem>>, vector<8x32xf32>
    %cst_42 = arith.constant dense<0.000000e+00> : vector<8x32xf32>
    %69 = tpu.matmul %67, %68, %cst_42 {dimension_numbers = #tpu.dot_dimension_numbers<[1], [0], [0], [1], [0, 0, 1, 1], [], []>} : vector<8x8xf32>, vector<8x32xf32>, vector<8x32xf32> -> vector<8x32xf32>
    %70 = arith.addf %47, %69 : vector<8x32xf32>
    %71 = vector.extract_strided_slice %14 {offsets = [0, 16], sizes = [8, 8], strides = [1, 1]} : vector<8x32xf32> to vector<8x8xf32>
    %c0_43 = arith.constant 0 : index
    %c16 = arith.constant 16 : index
    %72 = vector.load %arg18[%c0_43, %c16] : memref<16x32xf32, #tpu.memory_space<vmem>>, vector<16x8xf32>
    %c0_44 = arith.constant 0 : index
    %c16_45 = arith.constant 16 : index
    %73 = vector.load %arg19[%c0_44, %c16_45] : memref<16x32xf32, #tpu.memory_space<vmem>>, vector<16x8xf32>
    %cst_46 = arith.constant dense<0.000000e+00> : vector<8x16xf32>
    %74 = tpu.matmul %71, %72, %cst_46 {dimension_numbers = #tpu.dot_dimension_numbers<[1], [1], [0], [0], [0, 0, 1, 0], [], []>} : vector<8x8xf32>, vector<16x8xf32>, vector<8x16xf32> -> vector<8x16xf32>
    %75 = vector.broadcast %21 : vector<1x16xf32> to vector<8x16xf32>
    %76 = arith.addf %74, %75 : vector<8x16xf32>
    %cst_47 = arith.constant dense<0xFF800000> : vector<8xf32>
    %77 = vector.multi_reduction <maximumf>, %76, %cst_47 [1] : vector<8x16xf32> to vector<8xf32>
    %78 = vector.shape_cast %77 : vector<8xf32> to vector<8x1xf32>
    %79 = vector.broadcast %78 : vector<8x1xf32> to vector<8x16xf32>
    %80 = arith.subf %76, %79 : vector<8x16xf32>
    %81 = math.exp %80 : vector<8x16xf32>
    %cst_48 = arith.constant dense<0.000000e+00> : vector<8xf32>
    %82 = vector.multi_reduction <add>, %81, %cst_48 [1] : vector<8x16xf32> to vector<8xf32>
    %83 = vector.shape_cast %82 : vector<8xf32> to vector<8x1xf32>
    %84 = tpu.reciprocal %83 : vector<8x1xf32> -> vector<8x1xf32>
    %85 = vector.broadcast %84 : vector<8x1xf32> to vector<8x16xf32>
    %86 = arith.mulf %81, %85 : vector<8x16xf32>
    %c0_49 = arith.constant 0 : index
    %c2 = arith.constant 2 : index
    %c0_50 = arith.constant 0 : index
    %c0_51 = arith.constant 0 : index
    %87 = vector.load %arg17[%c0_49, %c2, %c0_50, %c0_51] : memref<1x4x8x16xf32, #tpu.memory_space<vmem>>, vector<1x1x8x16xf32>
    %88 = vector.shape_cast %87 : vector<1x1x8x16xf32> to vector<8x16xf32>
    %89 = vector.shape_cast %86 : vector<8x16xf32> to vector<1x1x8x16xf32>
    tpu.vector_store %arg17[%c0_49, %c2, %c0_50, %c0_51], %89 {strides = array<i32>} : memref<1x4x8x16xf32, #tpu.memory_space<vmem>>, vector<1x1x8x16xf32>,
    %cst_52 = arith.constant dense<0.000000e+00> : vector<8x8xf32>
    %90 = tpu.matmul %86, %73, %cst_52 {dimension_numbers = #tpu.dot_dimension_numbers<[1], [0], [0], [1], [0, 0, 1, 1], [], []>} : vector<8x16xf32>, vector<16x8xf32>, vector<8x8xf32> -> vector<8x8xf32>
    %c16_53 = arith.constant 16 : index
    %c0_54 = arith.constant 0 : index
    %91 = vector.load %arg6[%c16_53, %c0_54] : memref<32x32xf32, #tpu.memory_space<vmem>>, vector<8x32xf32>
    %cst_55 = arith.constant dense<0.000000e+00> : vector<8x32xf32>
    %92 = tpu.matmul %90, %91, %cst_55 {dimension_numbers = #tpu.dot_dimension_numbers<[1], [0], [0], [1], [0, 0, 1, 1], [], []>} : vector<8x8xf32>, vector<8x32xf32>, vector<8x32xf32> -> vector<8x32xf32>
    %93 = arith.addf %70, %92 : vector<8x32xf32>
    %94 = vector.extract_strided_slice %14 {offsets = [0, 24], sizes = [8, 8], strides = [1, 1]} : vector<8x32xf32> to vector<8x8xf32>
    %c0_56 = arith.constant 0 : index
    %c24 = arith.constant 24 : index
    %95 = vector.load %arg18[%c0_56, %c24] : memref<16x32xf32, #tpu.memory_space<vmem>>, vector<16x8xf32>
    %c0_57 = arith.constant 0 : index
    %c24_58 = arith.constant 24 : index
    %96 = vector.load %arg19[%c0_57, %c24_58] : memref<16x32xf32, #tpu.memory_space<vmem>>, vector<16x8xf32>
    %cst_59 = arith.constant dense<0.000000e+00> : vector<8x16xf32>
    %97 = tpu.matmul %94, %95, %cst_59 {dimension_numbers = #tpu.dot_dimension_numbers<[1], [1], [0], [0], [0, 0, 1, 0], [], []>} : vector<8x8xf32>, vector<16x8xf32>, vector<8x16xf32> -> vector<8x16xf32>
    %98 = vector.broadcast %21 : vector<1x16xf32> to vector<8x16xf32>
    %99 = arith.addf %97, %98 : vector<8x16xf32>
    %cst_60 = arith.constant dense<0xFF800000> : vector<8xf32>
    %100 = vector.multi_reduction <maximumf>, %99, %cst_60 [1] : vector<8x16xf32> to vector<8xf32>
    %101 = vector.shape_cast %100 : vector<8xf32> to vector<8x1xf32>
    %102 = vector.broadcast %101 : vector<8x1xf32> to vector<8x16xf32>
    %103 = arith.subf %99, %102 : vector<8x16xf32>
    %104 = math.exp %103 : vector<8x16xf32>
    %cst_61 = arith.constant dense<0.000000e+00> : vector<8xf32>
    %105 = vector.multi_reduction <add>, %104, %cst_61 [1] : vector<8x16xf32> to vector<8xf32>
    %106 = vector.shape_cast %105 : vector<8xf32> to vector<8x1xf32>
    %107 = tpu.reciprocal %106 : vector<8x1xf32> -> vector<8x1xf32>
    %108 = vector.broadcast %107 : vector<8x1xf32> to vector<8x16xf32>
    %109 = arith.mulf %104, %108 : vector<8x16xf32>
    %c0_62 = arith.constant 0 : index
    %c3 = arith.constant 3 : index
    %c0_63 = arith.constant 0 : index
    %c0_64 = arith.constant 0 : index
    %110 = vector.load %arg17[%c0_62, %c3, %c0_63, %c0_64] : memref<1x4x8x16xf32, #tpu.memory_space<vmem>>, vector<1x1x8x16xf32>
    %111 = vector.shape_cast %110 : vector<1x1x8x16xf32> to vector<8x16xf32>
    %112 = vector.shape_cast %109 : vector<8x16xf32> to vector<1x1x8x16xf32>
    tpu.vector_store %arg17[%c0_62, %c3, %c0_63, %c0_64], %112 {strides = array<i32>} : memref<1x4x8x16xf32, #tpu.memory_space<vmem>>, vector<1x1x8x16xf32>,
    %cst_65 = arith.constant dense<0.000000e+00> : vector<8x8xf32>
    %113 = tpu.matmul %109, %96, %cst_65 {dimension_numbers = #tpu.dot_dimension_numbers<[1], [0], [0], [1], [0, 0, 1, 1], [], []>} : vector<8x16xf32>, vector<16x8xf32>, vector<8x8xf32> -> vector<8x8xf32>
    %c24_66 = arith.constant 24 : index
    %c0_67 = arith.constant 0 : index
    %114 = vector.load %arg6[%c24_66, %c0_67] : memref<32x32xf32, #tpu.memory_space<vmem>>, vector<8x32xf32>
    %cst_68 = arith.constant dense<0.000000e+00> : vector<8x32xf32>
    %115 = tpu.matmul %113, %114, %cst_68 {dimension_numbers = #tpu.dot_dimension_numbers<[1], [0], [0], [1], [0, 0, 1, 1], [], []>} : vector<8x8xf32>, vector<8x32xf32>, vector<8x32xf32> -> vector<8x32xf32>
    %116 = arith.addf %93, %115 : vector<8x32xf32>
    %117 = arith.addf %7, %116 : vector<8x32xf32>
    %cst_69 = arith.constant dense<0.000000e+00> : vector<8xf32>
    %118 = vector.multi_reduction <add>, %117, %cst_69 [1] : vector<8x32xf32> to vector<8xf32>
    %119 = vector.shape_cast %118 : vector<8xf32> to vector<8x1xf32>
    %cst_70 = arith.constant 3.200000e+01 : f32
    %120 = vector.broadcast %cst_70 : f32 to vector<8x1xf32>
    %121 = arith.divf %119, %120 : vector<8x1xf32>
    %122 = vector.broadcast %121 : vector<8x1xf32> to vector<8x32xf32>
    %123 = arith.subf %117, %122 : vector<8x32xf32>
    %124 = arith.mulf %123, %123 : vector<8x32xf32>
    %cst_71 = arith.constant dense<0.000000e+00> : vector<8xf32>
    %125 = vector.multi_reduction <add>, %124, %cst_71 [1] : vector<8x32xf32> to vector<8xf32>
    %126 = vector.shape_cast %125 : vector<8xf32> to vector<8x1xf32>
    %cst_72 = arith.constant 3.200000e+01 : f32
    %127 = vector.broadcast %cst_72 : f32 to vector<8x1xf32>
    %128 = arith.divf %126, %127 : vector<8x1xf32>
    %129 = vector.broadcast %121 : vector<8x1xf32> to vector<8x32xf32>
    %130 = arith.subf %117, %129 : vector<8x32xf32>
    %cst_73 = arith.constant 9.99999974E-6 : f32
    %131 = vector.broadcast %cst_73 : f32 to vector<8x1xf32>
    %132 = arith.addf %128, %131 : vector<8x1xf32>
    %133 = math.rsqrt %132 : vector<8x1xf32>
    %134 = vector.broadcast %133 : vector<8x1xf32> to vector<8x32xf32>
    %135 = arith.mulf %130, %134 : vector<8x32xf32>
    %c0_74 = arith.constant 0 : index
    %c0_75 = arith.constant 0 : index
    %136 = vector.load %arg8[%c0_74, %c0_75] : memref<1x32xf32, #tpu.memory_space<vmem>>, vector<1x32xf32>
    %137 = vector.broadcast %136 : vector<1x32xf32> to vector<8x32xf32>
    %138 = arith.mulf %135, %137 : vector<8x32xf32>
    %c0_76 = arith.constant 0 : index
    %c0_77 = arith.constant 0 : index
    %139 = vector.load %arg9[%c0_76, %c0_77] : memref<1x32xf32, #tpu.memory_space<vmem>>, vector<1x32xf32>
    %140 = vector.broadcast %139 : vector<1x32xf32> to vector<8x32xf32>
    %141 = arith.addf %138, %140 : vector<8x32xf32>
    %c0_78 = arith.constant 0 : index
    %c0_79 = arith.constant 0 : index
    %142 = vector.load %arg10[%c0_78, %c0_79] : memref<32x64xf32, #tpu.memory_space<vmem>>, vector<32x64xf32>
    %cst_80 = arith.constant dense<0.000000e+00> : vector<8x64xf32>
    %143 = tpu.matmul %141, %142, %cst_80 {dimension_numbers = #tpu.dot_dimension_numbers<[1], [0], [0], [1], [0, 0, 1, 1], [], []>} : vector<8x32xf32>, vector<32x64xf32>, vector<8x64xf32> -> vector<8x64xf32>
    %c0_81 = arith.constant 0 : index
    %c0_82 = arith.constant 0 : index
    %144 = vector.load %arg11[%c0_81, %c0_82] : memref<1x64xf32, #tpu.memory_space<vmem>>, vector<1x64xf32>
    %145 = vector.broadcast %144 : vector<1x64xf32> to vector<8x64xf32>
    %146 = arith.addf %143, %145 : vector<8x64xf32>
    %cst_83 = arith.constant 0.000000e+00 : f32
    %147 = vector.broadcast %cst_83 : f32 to vector<8x64xf32>
    %148 = arith.maximumf %146, %147 : vector<8x64xf32>
    %c0_84 = arith.constant 0 : index
    %c0_85 = arith.constant 0 : index
    %149 = vector.load %arg12[%c0_84, %c0_85] : memref<64x32xf32, #tpu.memory_space<vmem>>, vector<64x32xf32>
    %cst_86 = arith.constant dense<0.000000e+00> : vector<8x32xf32>
    %150 = tpu.matmul %148, %149, %cst_86 {dimension_numbers = #tpu.dot_dimension_numbers<[1], [0], [0], [1], [0, 0, 1, 1], [], []>} : vector<8x64xf32>, vector<64x32xf32>, vector<8x32xf32> -> vector<8x32xf32>
    %c0_87 = arith.constant 0 : index
    %c0_88 = arith.constant 0 : index
    %151 = vector.load %arg13[%c0_87, %c0_88] : memref<1x32xf32, #tpu.memory_space<vmem>>, vector<1x32xf32>
    %152 = vector.broadcast %151 : vector<1x32xf32> to vector<8x32xf32>
    %153 = arith.addf %150, %152 : vector<8x32xf32>
    %154 = arith.addf %141, %153 : vector<8x32xf32>
    %cst_89 = arith.constant dense<0.000000e+00> : vector<8xf32>
    %155 = vector.multi_reduction <add>, %154, %cst_89 [1] : vector<8x32xf32> to vector<8xf32>
    %156 = vector.shape_cast %155 : vector<8xf32> to vector<8x1xf32>
    %cst_90 = arith.constant 3.200000e+01 : f32
    %157 = vector.broadcast %cst_90 : f32 to vector<8x1xf32>
    %158 = arith.divf %156, %157 : vector<8x1xf32>
    %159 = vector.broadcast %158 : vector<8x1xf32> to vector<8x32xf32>
    %160 = arith.subf %154, %159 : vector<8x32xf32>
    %161 = arith.mulf %160, %160 : vector<8x32xf32>
    %cst_91 = arith.constant dense<0.000000e+00> : vector<8xf32>
    %162 = vector.multi_reduction <add>, %161, %cst_91 [1] : vector<8x32xf32> to vector<8xf32>
    %163 = vector.shape_cast %162 : vector<8xf32> to vector<8x1xf32>
    %cst_92 = arith.constant 3.200000e+01 : f32
    %164 = vector.broadcast %cst_92 : f32 to vector<8x1xf32>
    %165 = arith.divf %163, %164 : vector<8x1xf32>
    %166 = vector.broadcast %158 : vector<8x1xf32> to vector<8x32xf32>
    %167 = arith.subf %154, %166 : vector<8x32xf32>
    %cst_93 = arith.constant 9.99999974E-6 : f32
    %168 = vector.broadcast %cst_93 : f32 to vector<8x1xf32>
    %169 = arith.addf %165, %168 : vector<8x1xf32>
    %170 = math.rsqrt %169 : vector<8x1xf32>
    %171 = vector.broadcast %170 : vector<8x1xf32> to vector<8x32xf32>
    %172 = arith.mulf %167, %171 : vector<8x32xf32>
    %c0_94 = arith.constant 0 : index
    %c0_95 = arith.constant 0 : index
    %173 = vector.load %arg14[%c0_94, %c0_95] : memref<1x32xf32, #tpu.memory_space<vmem>>, vector<1x32xf32>
    %174 = vector.broadcast %173 : vector<1x32xf32> to vector<8x32xf32>
    %175 = arith.mulf %172, %174 : vector<8x32xf32>
    %c0_96 = arith.constant 0 : index
    %c0_97 = arith.constant 0 : index
    %176 = vector.load %arg15[%c0_96, %c0_97] : memref<1x32xf32, #tpu.memory_space<vmem>>, vector<1x32xf32>
    %177 = vector.broadcast %176 : vector<1x32xf32> to vector<8x32xf32>
    %178 = arith.addf %175, %177 : vector<8x32xf32>
    %c0_98 = arith.constant 0 : index
    %c0_99 = arith.constant 0 : index
    %c0_100 = arith.constant 0 : index
    %179 = vector.load %arg16[%c0_98, %c0_99, %c0_100] : memref<1x8x32xf32, #tpu.memory_space<vmem>>, vector<1x8x32xf32>
    %180 = vector.shape_cast %179 : vector<1x8x32xf32> to vector<8x32xf32>
    %181 = vector.shape_cast %178 : vector<8x32xf32> to vector<1x8x32xf32>
    tpu.vector_store %arg16[%c0_98, %c0_99, %c0_100], %181 {strides = array<i32>} : memref<1x8x32xf32, #tpu.memory_space<vmem>>, vector<1x8x32xf32>,
    return
  }
  func.func @transform_0(%arg0: i32, %arg1: i32) -> (i32, i32, i32) {
    %c0_i32 = arith.constant 0 : i32
    %c0_i32_0 = arith.constant 0 : i32
    %c0_i32_1 = arith.constant 0 : i32
    return %arg0, %c0_i32, %c0_i32_0 : i32, i32, i32
  }
  func.func @transform_1(%arg0: i32, %arg1: i32) -> (i32, i32, i32) {
    %c0_i32 = arith.constant 0 : i32
    %c0_i32_0 = arith.constant 0 : i32
    %c0_i32_1 = arith.constant 0 : i32
    return %arg0, %c0_i32, %c0_i32_0 : i32, i32, i32
  }
  func.func @transform_2(%arg0: i32, %arg1: i32) -> (i32, i32) {
    %c0_i32 = arith.constant 0 : i32
    %c0_i32_0 = arith.constant 0 : i32
    %c0_i32_1 = arith.constant 0 : i32
    return %c0_i32, %c0_i32_0 : i32, i32
  }
  func.func @transform_3(%arg0: i32, %arg1: i32) -> (i32, i32) {
    %c0_i32 = arith.constant 0 : i32
    %c0_i32_0 = arith.constant 0 : i32
    %c0_i32_1 = arith.constant 0 : i32
    return %c0_i32, %c0_i32_0 : i32, i32
  }
  func.func @transform_4(%arg0: i32, %arg1: i32) -> (i32, i32) {
    %c0_i32 = arith.constant 0 : i32
    %c0_i32_0 = arith.constant 0 : i32
    %c0_i32_1 = arith.constant 0 : i32
    return %c0_i32, %c0_i32_0 : i32, i32
  }
  func.func @transform_5(%arg0: i32, %arg1: i32) -> (i32, i32) {
    %c0_i32 = arith.constant 0 : i32
    %c0_i32_0 = arith.constant 0 : i32
    %c0_i32_1 = arith.constant 0 : i32
    return %c0_i32, %c0_i32_0 : i32, i32
  }
  func.func @transform_6(%arg0: i32, %arg1: i32) -> (i32, i32) {
    %c0_i32 = arith.constant 0 : i32
    %c0_i32_0 = arith.constant 0 : i32
    %c0_i32_1 = arith.constant 0 : i32
    return %c0_i32, %c0_i32_0 : i32, i32
  }
  func.func @transform_7(%arg0: i32, %arg1: i32) -> (i32, i32) {
    %c0_i32 = arith.constant 0 : i32
    %c0_i32_0 = arith.constant 0 : i32
    %c0_i32_1 = arith.constant 0 : i32
    return %c0_i32, %c0_i32_0 : i32, i32
  }
  func.func @transform_8(%arg0: i32, %arg1: i32) -> (i32, i32) {
    %c0_i32 = arith.constant 0 : i32
    %c0_i32_0 = arith.constant 0 : i32
    %c0_i32_1 = arith.constant 0 : i32
    return %c0_i32, %c0_i32_0 : i32, i32
  }
  func.func @transform_9(%arg0: i32, %arg1: i32) -> (i32, i32) {
    %c0_i32 = arith.constant 0 : i32
    %c0_i32_0 = arith.constant 0 : i32
    %c0_i32_1 = arith.constant 0 : i32
    return %c0_i32, %c0_i32_0 : i32, i32
  }
  func.func @transform_10(%arg0: i32, %arg1: i32) -> (i32, i32) {
    %c0_i32 = arith.constant 0 : i32
    %c0_i32_0 = arith.constant 0 : i32
    %c0_i32_1 = arith.constant 0 : i32
    return %c0_i32, %c0_i32_0 : i32, i32
  }
  func.func @transform_11(%arg0: i32, %arg1: i32) -> (i32, i32) {
    %c0_i32 = arith.constant 0 : i32
    %c0_i32_0 = arith.constant 0 : i32
    %c0_i32_1 = arith.constant 0 : i32
    return %c0_i32, %c0_i32_0 : i32, i32
  }
  func.func @transform_12(%arg0: i32, %arg1: i32) -> (i32, i32) {
    %c0_i32 = arith.constant 0 : i32
    %c0_i32_0 = arith.constant 0 : i32
    %c0_i32_1 = arith.constant 0 : i32
    return %c0_i32, %c0_i32_0 : i32, i32
  }
  func.func @transform_13(%arg0: i32, %arg1: i32) -> (i32, i32) {
    %c0_i32 = arith.constant 0 : i32
    %c0_i32_0 = arith.constant 0 : i32
    %c0_i32_1 = arith.constant 0 : i32
    return %c0_i32, %c0_i32_0 : i32, i32
  }
  func.func @transform_14(%arg0: i32, %arg1: i32) -> (i32, i32, i32) {
    %c0_i32 = arith.constant 0 : i32
    %c0_i32_0 = arith.constant 0 : i32
    return %arg0, %arg1, %c0_i32 : i32, i32, i32
  }
  func.func @transform_15(%arg0: i32, %arg1: i32) -> (i32, i32, i32, i32) {
    %c0_i32 = arith.constant 0 : i32
    %c0_i32_0 = arith.constant 0 : i32
    %c0_i32_1 = arith.constant 0 : i32
    return %arg0, %c0_i32, %arg1, %c0_i32_0 : i32, i32, i32, i32
  }
}

</mosaic_0001>

<bundles_post_ra>
// kernel: tpu_custom_call.1
= control target key start
LH: loop header
LB: loop body
LE: loop exit
PB: predicated region body
PF: predicated region fallthrough
CT: control target
= control target key end

     0   :  { %s3568_s0 = inlined_call_operand.vmem [shape: f32[2,16,32], index: 0, kind: input, shape index: {}]   ;;  %s3569_s1 = inlined_call_operand.vmem [shape: s32[2,1,16], index: 1, kind: input, shape index: {}]   ;;  %s3570_s2 = inlined_call_operand.vmem [shape: f32[32,96], index: 2, kind: input, shape index: {}]   ;;  %s3571_s3 = inlined_call_operand.vmem [shape: f32[1,96], index: 3, kind: input, shape index: {}]   ;;  %s3572_s4 = inlined_call_operand.vmem [shape: f32[32,32], index: 4, kind: input, shape index: {}]   ;;  %s3573_s5 = inlined_call_operand.vmem [shape: f32[1,32], index: 5, kind: input, shape index: {}]   ;;  %s3574_s6 = inlined_call_operand.vmem [shape: f32[1,32], index: 6, kind: input, shape index: {}]   ;;  %s3575_s7 = inlined_call_operand.hbm [shape: f32[1,32], index: 7, kind: input, shape index: {}]   ;;  %s3576_s8 = inlined_call_operand.hbm [shape: f32[32,64], index: 8, kind: input, shape index: {}]   ;;  %s3577_s9 = inlined_call_operand.hbm [shape: f32[1,64], index: 9, kind: input, shape index: {}]   ;;  %s3578_s10 = inlined_call_operand.vmem [shape: f32[64,32], index: 10, kind: input, shape index: {}]   ;;  %s3579_s11 = inlined_call_operand.vmem [shape: f32[1,32], index: 11, kind: input, shape index: {}]   ;;  %s3580_s12 = inlined_call_operand.vmem [shape: f32[1,32], index: 12, kind: input, shape index: {}]   ;;  %s3581_s13 = inlined_call_operand.vmem [shape: f32[1,32], index: 13, kind: input, shape index: {}]   ;;  %s3582_s14 = inlined_call_operand.hbm [shape: f32[2,16,32], index: 14, kind: output, shape index: {0}]   ;;  %s3583_s15 = inlined_call_operand.hbm [shape: f32[2,4,16,16], index: 15, kind: output, shape index: {1}]  }
   0x1   :  { %3601 = sst [smem:[#allocation27_spill]] %s3574_s6 }
   0x2   :  { %3602 = sst [smem:[#allocation28_spill]] %s3579_s11 }
   0x3   :  { %3603 = sst [smem:[#allocation29_spill]] %s3580_s12 }
   0x4   :  { %3604 = sst [smem:[#allocation30_spill]] %s3581_s13 }
   0x5   :  { %3605 = sst [smem:[#allocation31_spill]] %s3582_s14 }
   0x6   :  { %3606 = sst [smem:[#allocation32_spill]] %s3583_s15 }
   0x7   :  { %21 = vsyncpa [#allocation5], 0 }
   0x8   :  { %22 = vsyncpa [#allocation8], 0 }
   0x9   :  { %23 = vsyncpa [#allocation6], 0 }
   0xa   :  { %25 = vsyncpa [#allocation6 + $0x1], 0 }
   0xb   :  { %26 = vsyncpa [#allocation12], 0 }
   0xc   :  { %28 = vsyncpa [#allocation12 + $0x1], 0  ;;  %s3050_s18 = smov 0   ;;  %s3052_s19 = smov 0  }
   0xd   :  { %s3054_s20 = smov 0   ;;  %s3056_s21 = smov 0  }
   0xe   :  { %s3058_s22 = smov 0   ;;  %s3060_s23 = smov 0  }
   0xf   :  { %s3062_s24 = smov 0   ;;  %s3064_s25 = smov 0  }
  0x10 LB: > { %3607 = sst [smem:[#allocation17_spill]] %s2923_s18  ;;  %s2246_s26 = sadd.s32 4294967295, %s2951_s25   ;;  %s2951_s25 = sphi %s3064_s25, %s34_s25   ;;  %s2947_s24 = sphi %s3062_s24, %s3644_s24   ;;  %s2943_s23 = sphi %s3060_s23, %s3643_s23   ;;  %s2939_s22 = sphi %s3058_s22, %s3648_s22   ;;  %s2935_s21 = sphi %s3056_s21, %s3641_s21   ;;  %s2931_s20 = sphi %s3054_s20, %s3647_s20   ;;  %s2927_s19 = sphi %s3052_s19, %s3646_s19   ;;  %s2923_s18 = sphi %s3050_s18, %s3645_s18  }
  0x11   : > { %3608 = sst [smem:[#allocation18_spill]] %s2931_s20  ;;  %s2247_s27 = sadd.s32 4294967294, %s2951_s25  }
  0x12   : > { %3609 = sst [smem:[#allocation19_spill]] %s2943_s23  ;;  %s43_s28 = sadd.s32 1, %s2943_s23 }
  0x13   : > { %3610 = sst [smem:[#allocation20_spill]] %s2947_s24  ;;  %s46_s29 = sadd.s32 1, %s2947_s24 }
  0x14   : > { %3611 = sst [smem:[#allocation21_spill]] %s2951_s25  ;;  %p44_p0 = scmp.ge.s32.totalorder %s43_s28, 2 }
  0x15   : > { %s359_s30 = sadd.s32 1, %s2931_s20  ;;  %p369_p1 = scmp.ne.s32.totalorder %s2931_s20, %s2927_s19 }
  0x16   : > { %p370_p2 = scmp.eq.s32.totalorder %s2246_s26, 3  ;;  %s3650_s28 = smov (%p44_p0, %s43_s28), 0 }
  0x17   : > { %3612 = sst [smem:[#allocation22_spill]] %s3650_s28  ;;  %s3652_s29 = smov (!%p44_p0, %s46_s29), %s2947_s24 }
  0x18   : > { %s355_s16 = ssub.s32 %s2943_s23, %s3650_s28  ;;  %p3102_p3 = por %p370_p2, %p369_p1 }
  0x19   : > { %p48_p4 = scmp.ge.s32.totalorder %s3652_s29, 2  ;;  %p375_p5 = scmp.ne.s32.totalorder %s2927_s19, %s2923_s18 }
  0x1a   : > { %s3613_s17 = scalar_select %p3102_p3, 1, 0 }
  0x1b   : > { %p376_p6 = scmp.eq.s32.totalorder %s2247_s27, 3  ;;  %p2248_p7 = scmp.ge.s32.totalorder %s2951_s25, 1 }
  0x1c   : > { %3614 = sst [smem:[#allocation23_spill]] %s3613_s17  ;;  %s3654_s29 = smov (%p48_p4, %s3652_s29), 0 }
  0x1d   : > { %3615 = sst [smem:[#allocation24_spill]] %s3654_s29  ;;  %p3111_p8 = por %p376_p6, %p375_p5 }
  0x1e   : > { %p411_p9 = scmp.lt.s32.totalorder %s2951_s25, 5  ;;  %s354_s13 = ssub.s32 %s2947_s24, %s3654_s29 }
  0x1f   : > { %s3616_s14 = scalar_select %p3111_p8, 1, 0 }
  0x20   : > { %s356_s12 = sor.u32 %s355_s16, %s354_s13  ;;  %p3118_p10 = pnand %p2248_p7, %p411_p9 }
  0x21   : > { %3617 = sst [smem:[#allocation25_spill]] %s3616_s14  ;;  %p357_p11 = scmp.eq.s32.totalorder %s356_s12, 0 }
  0x22   : > { %s3618_s28 = scalar_select %p3118_p10, 1, 0 }
  0x23   : > { %p3122_p12 = scmp.eq.s32.totalorder %s2246_s26, 0  ;;  %p2570_p13 = pneg %p3118_p10 }
  0x24   : > { %s3129_s27 = scalar_select %p357_p11, %s2931_s20, %s359_s30  }
  0x25   : > { %s3619_s23 = scalar_select %p3122_p12, 1, 0 }
  0x26   : > { %3620 = sst [smem:[#allocation26_spill]] %s3129_s27  ;;  %p3133_p0 = pnand %p3122_p12, %p2570_p13 }
  0x27   : > { %s2953_s13 = smov [#allocation7]   ;;  %s2733_s26 = scalar_lea.hbm %s3576_s8, 512 }
  0x28   : > { %s449_s16 = sshll.u32 %s2953_s13, 4  ;;  %p2734_p1 = scmp.ne.s32.totalorder %s3576_s8, %s2733_s26  ;;  %s450_s16 = int_to_ptr.vmem [resolvable:$true] %s449_s16 }
  0x29   : > { %p3145_p2 = pneg %p3133_p0  ;;  %p2740_p6 = scmp.lt.u32.totalorder %s2733_s26, %s3576_s8 }
  0x2b   : > { %p2736_p4 = pnand %p3145_p2, %p2734_p1 }
  0x2d   : > { %p2737_p5 = pneg %p2736_p4 }
  0x2f   : > { %p2742_p7 = pnand %p2740_p6, %p2737_p5 }
  0x31   : > { %2745 = shalt.err (!%p2742_p7)
}
  0x32   : > { %s2746_s29 = scalar_lea.vmem %s450_s16, 512  ;;  %p2754_p8 = scmp.lt.s32.totalorder %s450_s16, %s450_s16 }
  0x33   : > { %p2747_p9 = scmp.ne.s32.totalorder %s450_s16, %s2746_s29  ;;  %p2755_p3 = scmp.lt.s32.totalorder %s2746_s29, %s2746_s29 }
  0x35   : > { %p2749_p11 = pnand %p2747_p9, %p3145_p2  ;;  %p2756_p12 = por %p2755_p3, %p2754_p8 }
  0x37   : > { %p2750_p13 = pneg %p2749_p11 }
  0x39   : > { %p2757_p10 = pnand %p2756_p12, %p2750_p13 }
  0x3b   : > { %2760 = shalt.err (!%p2757_p10)
}
  0x3c   : > { %s2954_s18 = smov 128   ;;  %s2955_s24 = smov 8  }
  0x3d   : > { %2576 = dma.hbm_to_vmem [thread:$0]  (!%p3133_p0), %s3576_s8, 512, %s450_s16, [#allocation8], %s2954_s18, %s2954_s18, %s2955_s24  }
  0x3e   : > { %s2956_s26 = smov [#allocation4]   ;;  %s2957_s20 = smov [#allocation9]  }
  0x3f   : > { %s439_s13 = sshll.u32 %s2956_s26, 4  ;;  %s463_s25 = sshll.u32 %s2957_s20, 4  ;;  %s440_s13 = int_to_ptr.vmem [resolvable:$true] %s439_s13  ;;  %s3161_s25 = int_to_ptr.vmem [resolvable:$true] %s463_s25 }
  0x40   : > { %s2761_s17 = scalar_lea.hbm %s3575_s7, 16 }
  0x41   : > { %p2762_p3 = scmp.ne.s32.totalorder %s3575_s7, %s2761_s17  ;;  %p2768_p12 = scmp.lt.u32.totalorder %s2761_s17, %s3575_s7 }
  0x43   : > { %p2764_p8 = pnand %p2762_p3, %p3145_p2 }
  0x45   : > { %p2765_p10 = pneg %p2764_p8 }
  0x47   : > { %p2770_p1 = pnand %p2768_p12, %p2765_p10 }
  0x49   : > { %2773 = shalt.err (!%p2770_p1)
}
  0x4a   : > { %s2774_s20 = scalar_lea.vmem %s440_s13, 16  ;;  %s2781_s15 = scalar_lea.vmem %s440_s13, 32 }
  0x4b   : > { %p2775_p4 = scmp.ne.s32.totalorder %s440_s13, %s2774_s20  ;;  %p2782_p7 = scmp.lt.s32.totalorder %s440_s13, %s440_s13 }
  0x4c   : > { %p2783_p9 = scmp.lt.s32.totalorder %s2781_s15, %s2774_s20 }
  0x4d   : > { %p2777_p5 = pnand %p2775_p4, %p3145_p2 }
  0x4e   : > { %p2784_p11 = por %p2783_p9, %p2782_p7 }
  0x4f   : > { %p2778_p6 = pneg %p2777_p5 }
  0x51   : > { %p2785_p13 = pnand %p2784_p11, %p2778_p6 }
  0x53   : > { %2788 = shalt.err (!%p2785_p13)
}
  0x54   : > { %2573 = dma.hbm_to_vmem [thread:$0]  (!%p3133_p0), %s3575_s7, 16, %s440_s13, [#allocation5]  }
  0x55   : > { %s2789_s24 = scalar_lea.hbm %s3577_s9, 16 }
  0x56   : > { %p2790_p3 = scmp.ne.s32.totalorder %s3577_s9, %s2789_s24  ;;  %p2796_p12 = scmp.lt.u32.totalorder %s2789_s24, %s3577_s9 }
  0x58   : > { %p2792_p8 = pnand %p2790_p3, %p3145_p2 }
  0x5a   : > { %p2793_p10 = pneg %p2792_p8 }
  0x5c   : > { %p2798_p1 = pnand %p2796_p12, %p2793_p10 }
  0x5e   : > { %2801 = shalt.err (!%p2798_p1)
}
  0x5f   : > { %s2802_s13 = scalar_lea.vmem %s3161_s25, 16  ;;  %s2809_s16 = scalar_lea.vmem %s3161_s25, 32 }
  0x60   : > { %p2803_p4 = scmp.ne.s32.totalorder %s3161_s25, %s2802_s13  ;;  %p2810_p7 = scmp.lt.s32.totalorder %s3161_s25, %s3161_s25 }
  0x61   : > { %p2811_p9 = scmp.lt.s32.totalorder %s2809_s16, %s2802_s13 }
  0x62   : > { %p2805_p5 = pnand %p2803_p4, %p3145_p2 }
  0x63   : > { %p2812_p11 = por %p2811_p9, %p2810_p7 }
  0x64   : > { %p2806_p6 = pneg %p2805_p5 }
  0x66   : > { %p2813_p13 = pnand %p2812_p11, %p2806_p6 }
  0x68   : > { %2816 = shalt.err (!%p2813_p13)
}
  0x69   : > { %2579 = dma.hbm_to_vmem [thread:$0]  (!%p3133_p0), %s3577_s9, 16, %s3161_s25, [#allocation8]  }
  0x6a   : > { %p3623_p3 = scmp.ne.s32.totalorder %s3618_s28, 0 }
  0x6b   : > { %p3624_p2 = scmp.ne.s32.totalorder (!%p3623_p3), %s3619_s23, 0 }
  0x6c   : > { %502 = sbr.rel (%p3623_p3) target bundleno = 4117 (0x1015), region = 76 }
  0x73   : > { %2906 = dma.done.wait (%p3624_p2), [#allocation5], 16  }
  0x74   : > { %2908 = vsyncadd (%p3624_p2), [#allocation5], 4294967280 }
  0x75   : > { %2910 = dma.done.wait (%p3624_p2), [#allocation8], 528  }
  0x76   : > { %2912 = vsyncadd (%p3624_p2), [#allocation8], 4294966768  ;;  %s3216_s14 = sand.u32 1, %s2927_s19   ;;  %p566_p0 = scmp.lt.s32.totalorder %s2939_s22, 1 }
  0x77   : > { %s2257_s25 = sshll.u32 %s3216_s14, 3  ;;  %s2258_s28 = sshll.u32 %s3216_s14, 5 }
  0x78   : > { %s3222_s30 = scalar_select %p566_p0, %s2939_s22, 1 }
  0x79   : > { %s3234_s26 = scalar_lea.vmem [#allocation10], %s2257_s25  ;;  %s3236_s29 = scalar_lea.vmem [#allocation11], %s2258_s28 }
  0x7a   : > { %s2308_s6 = sshll.u32 %s3222_s30, 4  ;;  %s573_s23 = scalar_lea.vmem %s3569_s1, %s3222_s30 }
  0x7b   : > { %s3232_s12 = scalar_lea.vmem %s3568_s0, %s2308_s6  ;;  %p2261_p8 = scmp.ne.s32.totalorder %s2935_s21, 0 }
  0x7c   : > { %v580_v0 = vld [vmem:[%s3570_s2] sm:$0xff] (!%p2261_p8)  ;;  %v581_v1 = vld [vmem:[%s3570_s2 + $0x8] sm:$0xff] (!%p2261_p8)  ;;  %v582_v2 = vld [vmem:[%s3570_s2 + $0x10] sm:$0xff] (!%p2261_p8)  ;;  %vm609_vm0 = vcmask (!%p2261_p8), 261120   ;;  %s2958_s18 = smov (!%p2261_p8), 96  }
  0x7d   : > { %577 = sbr.rel (%p2261_p8) target bundleno = 585 (0x249), region = 92  ;;  %v2673_v3 = vpack.i.bf16 (!%p2261_p8), %v581_v1, %v580_v0  ;;  %v583_v4 = vld [vmem:[%s3570_s2 + $0x18] sm:$0xff] (!%p2261_p8)  ;;  %v578_v5 = vld [vmem:[%s3232_s12] sm:$0xff] (!%p2261_p8)  ;;  %v579_v16 = vld [vmem:[%s3232_s12 + $0x8] sm:$0xff] (!%p2261_p8) }
  0x7e   : > { %2374 = vmatprep.mubr.msk.f32.mxu0 (!%p2261_p8), %vm609_vm0, %v578_v5  ;;  %v2262_v6 = vld [vmem:[%s3571_s3] ss:$0 sm:$0xff] (!%p2261_p8)  ;;  %v2678_v7 = vpack.i.bf16 (!%p2261_p8), %v583_v4, %v582_v2 }
  0x7f   : > { %2674 = vrot.lane.b32.xlu0 (!%p2261_p8), %v2673_v3, %s2958_s18  ;;  %606 = vrot.lane.b32.xlu1 (!%p2261_p8), %v2262_v6, %s2958_s18 }
  0x83   : > { %2679 = vrot.lane.b32.xlu0 (!%p2261_p8), %v2678_v7, %s2958_s18 }
  0xf1   : > { %v2675_v8 = vpop.permute.xlu0 %2674  ;;  %v607_v17 = vpop.permute.xlu1 %606 }
  0xf2   : > { %v2677_v9 = vunpack.i.h.bf16 %v2675_v8  ;;  %v2676_v10 = vunpack.i.l.bf16 %v2675_v8 }
  0xf4   : > { %v2494_v11 = vpack.c.bf16 %v2677_v9, %v2676_v10 }
  0xf5   : > { %v2680_v12 = vpop.permute.xlu0 %2679 }
  0xf6   : > { %v2682_v13 = vunpack.i.h.bf16 %v2680_v12  ;;  %v2681_v14 = vunpack.i.l.bf16 %v2680_v12  ;;  %2495 = vmatprep.subr.bf16.mxu0 %v2494_v11 }
  0xf7   : > { %2497 = vmatpush3.bf16.msra.mxu0 %v2494_v11 }
  0xf8   : > { %v2498_v15 = vpack.c.bf16 %v2682_v13, %v2681_v14 }
  0xfa   : > { %2499 = vmatprep.subr.bf16.mxu0 %v2498_v15 }
  0xfb   : > { %2501 = vmatpush3.bf16.msra.mxu0 %v2498_v15 }
  0xfe   : > { %2375 = vmatmul.mubr.msk.f32.vlgmr.msra.gmra.mrb[0].mxu0 %vm609_vm0, %v579_v16 }
 0x1d1   : > { %v2376_v18 = vpop.f32.mrb[0].mxu0 }
 0x1d2   : > { %v688_v19 = vadd.f32 %v2376_v18, %v607_v17  ;;  %v682_v20 = vpop.f32.mrb[1].mxu0 }
 0x1d3   : > { %v683_v21 = vadd.f32 %v682_v20, %v607_v17 }
 0x1d4   : > { %692 = vst.msk [vmem:[#allocation2 + $0x8] sm:$0xff] %vm609_vm0, %v688_v19  ;;  %697 = vrot.lane.b32.xlu0 %v688_v19, %s2958_s18 }
 0x1d5   : > { %691 = vst.msk [vmem:[#allocation2] sm:$0xff] %vm609_vm0, %v683_v21  ;;  %695 = vrot.lane.b32.xlu1 %v683_v21, %s2958_s18 }
 0x246   : > { %v698_v22 = vpop.permute.xlu0 %697 }
 0x247   : > { %702 = vst.msk [vmem:[#allocation3 + $0x8] sm:$0xff] %vm609_vm0, %v698_v22  ;;  %v696_v23 = vpop.permute.xlu1 %695 }
 0x248   : > { %701 = vst.msk [vmem:[#allocation3] sm:$0xff] %vm609_vm0, %v696_v23 }
 0x249 PF: > { %v706_v24 = vld [vmem:[%s3570_s2] sm:$0xff]  ;;  %v707_v25 = vld [vmem:[%s3570_s2 + $0x8] sm:$0xff]  ;;  %v708_v26 = vld [vmem:[%s3570_s2 + $0x10] sm:$0xff]  ;;  %v2959_v27 = vmov 0.0|0.0   ;;  %vm2960_vm1 = vmmov 0   ;;  %v2961_v30 = vmov 0.0   ;;  %v807_v43 = vlaneseq }
 0x24a   : > { %2502 = vmatprep.subr.bf16.mxu0 %v2959_v27  ;;  %v2503_v28 = vpack.c.bf16 %v707_v25, %v706_v24  ;;  %v709_v29 = vld [vmem:[%s3570_s2 + $0x18] sm:$0xff]  ;;  %2385 = vmatprep.mubr.msk.f32.mxu0 %vm2960_vm1, %v2961_v30  ;;  %s2265_s28 = sshll.u32 %s2935_s21, 3  ;;  %v802_v31 = vld [vmem:[#allocation2] sm:$0xff]  ;;  %v803_v32 = vld [vmem:[#allocation2 + $0x8] sm:$0xff]  ;;  %vm812_vm2 = vcmask 64512   ;;  %vm717_vm4 = vcmask 261120  }
 0x24b   : > { %2508 = vmatprep.subr.bf16.mxu1 %v2959_v27  ;;  %v2509_v33 = vpack.c.bf16 %v803_v32, %v802_v31  ;;  %vm3281_vm3 = vmpackc.low %vm812_vm2, %vm812_vm2  ;;  %2392 = vmatprep.mubr.msk.f32.mxu1 %vm2960_vm1, %v2961_v30  ;;  %v2506_v35 = vpack.c.bf16 %v709_v29, %v708_v26  ;;  %s704_s6 = scalar_lea.vmem %s3232_s12, %s2265_s28  ;;  %v3299_v37 = vpack.i.bf16 %v803_v32, %v802_v31  ;;  %s2962_s12 = smov 120   ;;  %v2266_v38 = vld [vmem:[%s3571_s3] ss:$0 sm:$0xff]  ;;  %v808_v45 = vshrl.u32 %v807_v43, 7 }
 0x24c   : > { %2504 = vmatpush3.bf16.msra.mxu0 %v2503_v28  ;;  %v3292_v36 = vld [vmem:[%s704_s6] sm:$0xff]  ;;  %s2963_s24 = smov 112   ;;  %vm892_vm6 = vcmask 130048   ;;  %s2964_s16 = smov 104   ;;  %vm1955_vm7 = vcmask 523264  }
 0x24d   : > { %2505 = vmatprep.subr.bf16.mxu0 %v2959_v27  ;;  %2511 = vmatpush3.bf16.xpose.msk.msra.mxu1 %vm3281_vm3, %v2509_v33  ;;  %v792_v44 = vld [vmem:[%s573_s23] sm:$0x1]  ;;  %v809_v46 = vsub.s32 0, %v808_v45  ;;  %s3627_s17 = sld [smem:[#allocation27_spill]]  ;;  %s3629_s20 = sld [smem:[#allocation23_spill]] }
 0x24e   : > { %2519 = vmatprep.subr.bf16.mxu1 %v2959_v27  ;;  %2684 = vrot.lane.b32.xlu1 %v3299_v37, %s2962_s12  ;;  %vm793_vm5 = vcmp.eq.s32.totalorder %v792_v44, 0  ;;  %v805_v59 = vld [vmem:[#allocation3 + $0x8] sm:$0xff]  ;;  %v978_v0 = vld [vmem:[%s3572_s4] sm:$0xff]  ;;  %s2304_s15 = sshll.u32 %s2939_s22, 3  ;;  %s2095_s28 = sshll.u32 %s3236_s29, 4  ;;  %s3474_s28 = int_to_ptr.vmem [resolvable:$true] %s2095_s28 }
 0x24f   : > { %v794_v47 = vsel %vm793_vm5, -1e+10, %v2961_v30  ;;  %v804_v58 = vld [vmem:[#allocation3] sm:$0xff]  ;;  %s2092_s11 = sadd.s32 %s2935_s21, %s2304_s15  ;;  %s2817_s27 = scalar_lea.vmem %s3474_s28, 512 }
 0x250   : > { %2507 = vmatpush3.bf16.msra.mxu0 %v2506_v35  ;;  %v3322_v48 = vrot.slane %v794_v47, %v809_v46  ;;  %v2513_v60 = vpack.c.bf16 %v805_v59, %v804_v58  ;;  %v3358_v21 = vpack.i.bf16 %v805_v59, %v804_v58  ;;  %s2305_s25 = sshll.u32 %s2092_s11, 7  ;;  %p2818_p10 = scmp.ne.s32.totalorder %s3474_s28, %s2817_s27 }
 0x251   : > { %2512 = vmatprep.subr.bf16.mxu0 %v2959_v27  ;;  %s2965_s13 = smov [#allocation11]  }
 0x252   : > { %s2821_s30 = sshll.u32 %s2965_s13, 4  ;;  %s2822_s30 = int_to_ptr.vmem [resolvable:$false] %s2821_s30 }
 0x253   : > { %2386 = vmatmul.mubr.msk.f32.vlgmr.msra.gmra.mrb[0].mxu0 %vm717_vm4, %v3292_v36  ;;  %p3631_p12 = scmp.ne.s32.totalorder %s3629_s20, 0  ;;  %p2824_p5 = scmp.lt.s32.totalorder %s3474_s28, %s2822_s30 }
 0x254   : > { %2399 = vmatprep.mubr.msk.f32.mxu0 %vm2960_vm1, %v2961_v30  ;;  %2514 = vmatpush3.bf16.msra.mxu0 %v2513_v60 }
 0x255   : > { %2402 = vmatprep.subr.mxu0 %v2961_v30  ;;  %p2819_p1 = pnand %p2818_p10, %p3631_p12 }
 0x257   : > { %p2820_p4 = pneg %p2819_p1 }
 0x2c0   : > { %v2685_v1 = vpop.permute.xlu1 %2684 }
 0x2c1   : > { %v2687_v2 = vunpack.i.h.bf16 %v2685_v1  ;;  %v2686_v3 = vunpack.i.l.bf16 %v2685_v1 }
 0x2c3   : > { %v2516_v4 = vpack.c.bf16 %v2687_v2, %v2686_v3 }
 0x326   : > { %v787_v39 = vpop.f32.mrb[0].mxu0 }
 0x327   : > { %v788_v40 = vadd.f32 %v2266_v38, %v787_v39  ;;  %v2387_v41 = vpop.f32.mrb[1].mxu0 }
 0x329   : > { %v3306_v42 = vmul.f32 0.35355338, %v788_v40 }
 0x32b   : > { %1057 = vrot.lane.b32.xlu1 %v3306_v42, %s2962_s12  ;;  %2393 = vmatmul.mubr.msk.f32.vlgmr.msra.gmra.mrb[0].mxu1 %vm812_vm2, %v3306_v42 }
 0x32c   : > { %2418 = vmatprep.mubr.msk.f32.mxu1 %vm2960_vm1, %v2961_v30 }
 0x32f   : > { %1314 = vrot.lane.b32.xlu1 %v3306_v42, %s2963_s24 }
 0x39d   : > { %v1058_v11 = vpop.permute.xlu1 %1057 }
 0x3a1   : > { %v1315_v12 = vpop.permute.xlu1 %1314 }
 0x3fe   : > { %v888_v49 = vpop.f32.mrb[0].mxu1 }
 0x3ff   : > { %v889_v50 = vadd.f32 %v888_v49, %v3322_v48  ;;  %v2394_v51 = vpop.f32.mrb[1].mxu1 }
 0x401   : > { %v893_v52 = vsel %vm892_vm6, %v889_v50, -inf }
 0x402   : > { %894 = vmax.xlane.f32.xlu0 %v893_v52 }
 0x48f   : > { %v895_v53 = vpop.xlane.xlu0 %894 }
 0x490   : > { %v896_v54 = vsub.f32 %v889_v50, %v895_v53  ;;  %v1235_v53 = vld [vmem:[%s3572_s4 + $0x8] sm:$0xff] }
 0x492   : > { %v897_v55 = vmul.f32 1.442695, %v896_v54 }
 0x494   : > { %2713 = vpow2.f32 %v897_v55 }
 0x49e   : > { %v2714_v56 = vpop.eup %2713 }
 0x49f   : > { %v899_v57 = vsel %vm892_vm6, %v2714_v56, 0.0 }
 0x4a0   : > { %900 = vadd.xlane.f32.xlu0 %v899_v57 }
 0x4b6   : > { %2689 = vrot.lane.b32.xlu0 %v3299_v37, %s2963_s24 }
 0x52d   : > { %v901_v61 = vpop.xlane.xlu0 %900 }
 0x52e   : > { %2715 = vrcp.f32 %v901_v61 }
 0x531   : > { %v2690_v5 = vpop.permute.xlu0 %2689 }
 0x532   : > { %v2692_v8 = vunpack.i.h.bf16 %v2690_v5  ;;  %v2691_v9 = vunpack.i.l.bf16 %v2690_v5  ;;  %v2268_v5 = vld [vmem:[%s3573_s5] ss:$0 sm:$0xff] }
 0x534   : > { %v2523_v10 = vpack.c.bf16 %v2692_v8, %v2691_v9 }
 0x538   : > { %v2716_v62 = vpop.eup %2715 }
 0x539   : > { %v903_v63 = vmul.f32 %v2716_v62, %v2714_v56 }
 0x53b   : > { %904 = vst.msk [vmem:[%s3236_s29] sm:$0xff] %vm892_vm6, %v903_v63  ;;  %2400 = vmatmul.mubr.msk.f32.vlgmr.msra.gmra.mrb[2].mxu0 %vm892_vm6, %v903_v63 }
 0x53c   : > { %2403 = vmatpush3.msra.mxu0 %v978_v0  ;;  %2404 = vmatprep.mubr.msk.f32.mxu0 %vm2960_vm1, %v2961_v30  ;;  %v1492_v0 = vld [vmem:[%s3572_s4 + $0x10] sm:$0xff] }
 0x53d   : > { %2515 = vmatprep.subr.bf16.mxu0 %v2959_v27 }
 0x60e   : > { %v974_v6 = vpop.f32.mrb[2].mxu0 }
 0x60f   : > { %v2401_v7 = vpop.f32.mrb[3].mxu0  ;;  %2405 = vmatmul.mubr.msk.f32.vlgmr.msra.gmra.mrb[4].mxu0 %vm812_vm2, %v974_v6 }
 0x610   : > { %2518 = vmatpush3.bf16.xpose.msk.msra.mxu0 %vm3281_vm3, %v2516_v4  ;;  %2411 = vmatprep.mubr.msk.f32.mxu0 %vm2960_vm1, %v2961_v30 }
 0x611   : > { %2522 = vmatprep.subr.bf16.mxu0 %v2959_v27 }
 0x617   : > { %2412 = vmatmul.mubr.msk.f32.vlgmr.msra.gmra.mrb[6].mxu0 %vm812_vm2, %v1058_v11 }
 0x618   : > { %2525 = vmatpush3.bf16.xpose.msk.msra.mxu0 %vm3281_vm3, %v2523_v10  ;;  %2430 = vmatprep.mubr.msk.f32.mxu0 %vm2960_vm1, %v2961_v30 }
 0x619   : > { %2529 = vmatprep.subr.bf16.mxu0 %v2959_v27 }
 0x61f   : > { %2431 = vmatmul.mubr.msk.f32.vlgmr.msra.gmra.mrb[8].mxu0 %vm812_vm2, %v1315_v12 }
 0x620   : > { %2449 = vmatprep.mubr.msk.f32.mxu0 %vm2960_vm1, %v2961_v30 }
 0x6e2   : > { %v3354_v13 = vpop.f32.mrb[4].mxu0 }
 0x6e3   : > { %v2406_v14 = vpop.f32.mrb[5].mxu0  ;;  %v1052_v6 = vadd.f32 %v2268_v5, %v3354_v13 }
 0x6ea   : > { %v1137_v15 = vpop.f32.mrb[6].mxu0 }
 0x6eb   : > { %v1138_v16 = vadd.f32 %v1137_v15, %v3322_v48  ;;  %v2413_v17 = vpop.f32.mrb[7].mxu0 }
 0x6ed   : > { %v1141_v18 = vsel %vm892_vm6, %v1138_v16, -inf }
 0x6ee   : > { %1142 = vmax.xlane.f32.xlu1 %v1141_v18 }
 0x6f2   : > { %v1394_v19 = vpop.f32.mrb[8].mxu0 }
 0x6f3   : > { %v2432_v20 = vpop.f32.mrb[9].mxu0  ;;  %v1395_v22 = vadd.f32 %v1394_v19, %v3322_v48  ;;  %v1749_v19 = vld [vmem:[%s3572_s4 + $0x18] sm:$0xff] }
 0x6f5   : > { %v1398_v23 = vsel %vm892_vm6, %v1395_v22, -inf }
 0x6ff   : > { %2694 = vrot.lane.b32.xlu1 %v3358_v21, %s2962_s12 }
 0x703   : > { %1571 = vrot.lane.b32.xlu1 %v3306_v42, %s2964_s16 }
 0x727   : > { %1399 = vmax.xlane.f32.xlu1 %v1398_v23 }
 0x738   : > { %2704 = vrot.lane.b32.xlu1 %v3358_v21, %s2963_s24  ;;  %s2066_s24 = scalar_lea.sflag [#allocation12], %s3216_s14 }
 0x77b   : > { %v1143_v24 = vpop.xlane.xlu1 %1142 }
 0x77c   : > { %v1144_v25 = vsub.f32 %v1138_v16, %v1143_v24 }
 0x77e   : > { %v1145_v26 = vmul.f32 1.442695, %v1144_v25 }
 0x77f   : > { %v2695_v28 = vpop.permute.xlu1 %2694 }
 0x780   : > { %2717 = vpow2.f32 %v1145_v26  ;;  %v2697_v29 = vunpack.i.h.bf16 %v2695_v28  ;;  %v2696_v31 = vunpack.i.l.bf16 %v2695_v28 }
 0x782   : > { %v2520_v32 = vpack.c.bf16 %v2697_v29, %v2696_v31 }
 0x783   : > { %v1572_v38 = vpop.permute.xlu1 %1571 }
 0x784   : > { %2521 = vmatpush3.bf16.msra.mxu1 %v2520_v32 }
 0x785   : > { %2421 = vmatprep.subr.mxu1 %v2961_v30 }
 0x78a   : > { %v2718_v33 = vpop.eup %2717 }
 0x78b   : > { %v1147_v35 = vsel %vm892_vm6, %v2718_v33, 0.0 }
 0x78c   : > { %1148 = vadd.xlane.f32.xlu0 %v1147_v35 }
 0x7a2   : > { %2699 = vrot.lane.b32.xlu0 %v3299_v37, %s2964_s16 }
 0x7b4   : > { %v1400_v39 = vpop.xlane.xlu1 %1399 }
 0x7b5   : > { %v1401_v40 = vsub.f32 %v1395_v22, %v1400_v39 }
 0x7b7   : > { %v1402_v41 = vmul.f32 1.442695, %v1401_v40  ;;  %v1855_v40 = vld [vmem:[#allocation7] sm:$0xff] }
 0x7b8   : > { %v2705_v54 = vpop.permute.xlu1 %2704 }
 0x7b9   : > { %2719 = vpow2.f32 %v1402_v41  ;;  %v2707_v55 = vunpack.i.h.bf16 %v2705_v54  ;;  %v2706_v56 = vunpack.i.l.bf16 %v2705_v54  ;;  %v1856_v41 = vld [vmem:[#allocation7 + $0x8] sm:$0xff] }
 0x7bb   : > { %v2527_v57 = vpack.c.bf16 %v2707_v55, %v2706_v56  ;;  %v2292_v56 = vld [vmem:[%s3627_s17] ss:$0 sm:$0xff]  ;;  %s3630_s17 = sld [smem:[#allocation32_spill]] }
 0x7c1   : > { %s3472_s18 = scalar_lea.hbm %s3630_s17, %s2305_s25 }
 0x7c3   : > { %v2720_v42 = vpop.eup %2719 }
 0x7c4   : > { %v1404_v43 = vsel %vm892_vm6, %v2720_v42, 0.0 }
 0x7c5   : > { %1405 = vadd.xlane.f32.xlu0 %v1404_v43  ;;  %v1858_v43 = vld [vmem:[#allocation7 + $0x18] sm:$0xff] }
 0x819   : > { %v1149_v44 = vpop.xlane.xlu0 %1148 }
 0x81a   : > { %2721 = vrcp.f32 %v1149_v44 }
 0x81d   : > { %v2700_v45 = vpop.permute.xlu0 %2699 }
 0x81e   : > { %v2702_v46 = vunpack.i.h.bf16 %v2700_v45  ;;  %v2701_v47 = vunpack.i.l.bf16 %v2700_v45  ;;  %v1941_v45 = vld [vmem:[%s3578_s10 + $0x8] sm:$0xff] }
 0x820   : > { %v2530_v49 = vpack.c.bf16 %v2702_v46, %v2701_v47  ;;  %v1942_v46 = vld [vmem:[%s3578_s10 + $0x10] sm:$0xff] }
 0x822   : > { %2532 = vmatpush3.bf16.xpose.msk.msra.mxu0 %vm3281_vm3, %v2530_v49  ;;  %v1943_v49 = vld [vmem:[%s3578_s10 + $0x18] sm:$0xff] }
 0x823   : > { %2536 = vmatprep.subr.bf16.mxu0 %v2959_v27 }
 0x824   : > { %v2722_v37 = vpop.eup %2721 }
 0x825   : > { %v1151_v50 = vmul.f32 %v2722_v37, %v2718_v33  ;;  %v2546_v37 = vpack.c.bf16 %v1943_v49, %v1942_v46 }
 0x827   : > { %2277 = vst.msk [vmem:[%s3236_s29 + $0x8] sm:$0xff] %vm892_vm6, %v1151_v50  ;;  %2419 = vmatmul.mubr.msk.f32.vlgmr.msra.gmra.mrb[2].mxu1 %vm892_vm6, %v1151_v50  ;;  %v1944_v50 = vld [vmem:[%s3578_s10 + $0x20] sm:$0xff] }
 0x828   : > { %2423 = vmatprep.mubr.msk.f32.mxu1 %vm2960_vm1, %v2961_v30  ;;  %2422 = vmatpush3.msra.mxu1 %v1235_v53 }
 0x829   : > { %2450 = vmatmul.mubr.msk.f32.vlgmr.msra.gmra.mrb[10].mxu0 %vm812_vm2, %v1572_v38  ;;  %2526 = vmatprep.subr.bf16.mxu1 %v2959_v27 }
 0x82a   : > { %2472 = vmatprep.mubr.msk.f32.mxu0 %vm2960_vm1, %v2961_v30 }
 0x852   : > { %v1406_v51 = vpop.xlane.xlu0 %1405 }
 0x853   : > { %2723 = vrcp.f32 %v1406_v51  ;;  %v1945_v51 = vld [vmem:[%s3578_s10 + $0x28] sm:$0xff] }
 0x85d   : > { %v2724_v34 = vpop.eup %2723 }
 0x85e   : > { %v1408_v52 = vmul.f32 %v2724_v34, %v2720_v42  ;;  %v2537_v42 = vpack.c.bf16 %v1856_v41, %v1855_v40  ;;  %v2549_v34 = vpack.c.bf16 %v1945_v51, %v1944_v50 }
 0x860   : > { %2283 = vst.msk [vmem:[%s3236_s29 + $0x10] sm:$0xff] %vm892_vm6, %v1408_v52  ;;  %2538 = vmatpush3.bf16.msra.mxu0 %v2537_v42 }
 0x861   : > { %2539 = vmatprep.subr.bf16.mxu0 %v2959_v27 }
 0x8fa   : > { %v1231_v58 = vpop.f32.mrb[2].mxu1 }
 0x8fb   : > { %v2420_v59 = vpop.f32.mrb[3].mxu1  ;;  %2424 = vmatmul.mubr.msk.f32.vlgmr.msra.gmra.mrb[4].mxu1 %vm812_vm2, %v1231_v58  ;;  %v2293_v58 = vld [vmem:[#allocation4] ss:$0 sm:$0xff] }
 0x8fc   : > { %2528 = vmatpush3.bf16.msra.mxu1 %v2527_v57  ;;  %v1651_v60 = vpop.f32.mrb[10].mxu0  ;;  %2437 = vmatprep.mubr.msk.f32.mxu1 %vm2960_vm1, %v2961_v30 }
 0x8fd   : > { %v1652_v61 = vadd.f32 %v1651_v60, %v3322_v48  ;;  %v2451_v62 = vpop.f32.mrb[11].mxu0  ;;  %2440 = vmatprep.subr.mxu1 %v2961_v30 }
 0x8ff   : > { %2438 = vmatmul.mubr.msk.f32.vlgmr.msra.gmra.mrb[6].mxu1 %vm892_vm6, %v1408_v52  ;;  %v1655_v63 = vsel %vm892_vm6, %v1652_v61, -inf }
 0x900   : > { %1656 = vmax.xlane.f32.xlu0 %v1655_v63  ;;  %2442 = vmatprep.mubr.msk.f32.mxu1 %vm2960_vm1, %v2961_v30  ;;  %v2294_v63 = vld [vmem:[#allocation9] ss:$0 sm:$0xff] }
 0x901   : > { %2441 = vmatpush3.msra.mxu1 %v1492_v0 }
 0x902   : > { %2533 = vmatprep.subr.bf16.mxu1 %v2959_v27 }
 0x98d   : > { %v1657_v1 = vpop.xlane.xlu0 %1656 }
 0x98e   : > { %v1658_v48 = vsub.f32 %v1652_v61, %v1657_v1  ;;  %v1946_v61 = vld [vmem:[%s3578_s10 + $0x30] sm:$0xff] }
 0x990   : > { %v1659_v2 = vmul.f32 1.442695, %v1658_v48 }
 0x992   : > { %2725 = vpow2.f32 %v1659_v2 }
 0x99c   : > { %v2726_v3 = vpop.eup %2725 }
 0x99d   : > { %v1661_v4 = vsel %vm892_vm6, %v2726_v3, 0.0 }
 0x99e   : > { %1662 = vadd.xlane.f32.xlu0 %v1661_v4 }
 0x9b4   : > { %2709 = vrot.lane.b32.xlu0 %v3358_v21, %s2964_s16  ;;  %s3628_s16 = sld [smem:[#allocation28_spill]] }
 0x9ce   : > { %v1305_v7 = vpop.f32.mrb[4].mxu1 }
 0x9cf   : > { %v1309_v8 = vadd.f32 %v1305_v7, %v1052_v6  ;;  %v2425_v9 = vpop.f32.mrb[5].mxu1 }
 0x9d2   : > { %v1488_v10 = vpop.f32.mrb[6].mxu1 }
 0x9d3   : > { %v2439_v11 = vpop.f32.mrb[7].mxu1  ;;  %2443 = vmatmul.mubr.msk.f32.vlgmr.msra.gmra.mrb[8].mxu1 %vm812_vm2, %v1488_v10 }
 0x9d4   : > { %2456 = vmatprep.mubr.msk.f32.mxu1 %vm2960_vm1, %v2961_v30 }
 0xa2b   : > { %v1663_v12 = vpop.xlane.xlu0 %1662 }
 0xa2c   : > { %2727 = vrcp.f32 %v1663_v12 }
 0xa2f   : > { %v2710_v14 = vpop.permute.xlu0 %2709 }
 0xa30   : > { %v2712_v15 = vunpack.i.h.bf16 %v2710_v14  ;;  %v2711_v16 = vunpack.i.l.bf16 %v2710_v14 }
 0xa32   : > { %v2534_v17 = vpack.c.bf16 %v2712_v15, %v2711_v16 }
 0xa34   : > { %2535 = vmatpush3.bf16.msra.mxu1 %v2534_v17 }
 0xa35   : > { %2459 = vmatprep.subr.mxu1 %v2961_v30 }
 0xa36   : > { %v2728_v13 = vpop.eup %2727 }
 0xa37   : > { %v1665_v18 = vmul.f32 %v2728_v13, %v2726_v3  ;;  %v2296_v3 = vld [vmem:[%s3628_s16] ss:$0 sm:$0xff] }
 0xa39   : > { %2289 = vst.msk [vmem:[%s3236_s29 + $0x18] sm:$0xff] %vm892_vm6, %v1665_v18  ;;  %2457 = vmatmul.mubr.msk.f32.vlgmr.msra.gmra.mrb[10].mxu1 %vm892_vm6, %v1665_v18  ;;  %s2823_s29 = scalar_lea.vmem %s2822_s30, 1024 }
 0xa3a   : > { %2460 = vmatpush3.msra.mxu1 %v1749_v19  ;;  %2461 = vmatprep.mubr.msk.f32.mxu1 %vm2960_vm1, %v2961_v30  ;;  %p2825_p6 = scmp.lt.s32.totalorder %s2823_s29, %s2817_s27 }
 0xa3b   : > { %2542 = vmatprep.subr.bf16.mxu1 %v2959_v27 }
 0xa3c   : > { %p2826_p7 = por %p2825_p6, %p2824_p5 }
 0xa3e   : > { %p2827_p9 = pnand %p2826_p7, %p2820_p4 }
 0xaa6   : > { %v1562_v20 = vpop.f32.mrb[8].mxu1 }
 0xaa7   : > { %v1566_v21 = vadd.f32 %v1562_v20, %v1309_v8  ;;  %v2444_v22 = vpop.f32.mrb[9].mxu1 }
 0xb0c   : > { %v1745_v23 = vpop.f32.mrb[10].mxu1 }
 0xb0d   : > { %v2458_v24 = vpop.f32.mrb[11].mxu1  ;;  %2462 = vmatmul.mubr.msk.f32.vlgmr.msra.gmra.mrb[12].mxu1 %vm812_vm2, %v1745_v23 }
 0xb0e   : > { %2491 = vmatprep.mubr.msk.f32.mxu1 %vm2960_vm1, %v2961_v30  ;;  %v1857_v30 = vld [vmem:[#allocation7 + $0x10] sm:$0xff] }
 0xb0f   : > { %v2540_v44 = vpack.c.bf16 %v1858_v43, %v1857_v30 }
 0xb11   : > { %2541 = vmatpush3.bf16.msra.mxu0 %v2540_v44 }
 0xbe0   : > { %v1819_v25 = vpop.f32.mrb[12].mxu1 }
 0xbe1   : > { %v1823_v26 = vadd.f32 %v1819_v25, %v1566_v21  ;;  %v2463_v28 = vpop.f32.mrb[13].mxu1 }
 0xbe3   : > { %v1824_v29 = vadd.f32 %v1823_v26, %v3292_v36  ;;  %v1940_v36 = vld [vmem:[%s3578_s10] sm:$0xff] }
 0xbe4   : > { %v2543_v47 = vpack.c.bf16 %v1941_v45, %v1940_v36 }
 0xbe5   : > { %v1825_v31 = vsel %vm717_vm4, %v1824_v29, 0.0 }
 0xbe6   : > { %1826 = vadd.xlane.f32.xlu1 %v1825_v31  ;;  %2544 = vmatpush3.bf16.msra.mxu1 %v2543_v47 }
 0xbe7   : > { %2545 = vmatprep.subr.bf16.mxu1 %v2959_v27 }
 0xbea   : > { %2547 = vmatpush3.bf16.msra.mxu1 %v2546_v37 }
 0xbeb   : > { %2548 = vmatprep.subr.bf16.mxu1 %v2959_v27 }
 0xbee   : > { %2550 = vmatpush3.bf16.msra.mxu1 %v2549_v34 }
 0xbef   : > { %2551 = vmatprep.subr.bf16.mxu1 %v2959_v27  ;;  %v1947_v27 = vld [vmem:[%s3578_s10 + $0x38] sm:$0xff] }
 0xbf0   : > { %v2552_v62 = vpack.c.bf16 %v1947_v27, %v1946_v61 }
 0xbf2   : > { %2553 = vmatpush3.bf16.msra.mxu1 %v2552_v62 }
 0xc73   : > { %v1827_v32 = vpop.xlane.xlu1 %1826 }
 0xc74   : > { %v1829_v33 = vmul.f32 0.03125, %v1827_v32 }
 0xc76   : > { %v1830_v35 = vsub.f32 %v1824_v29, %v1829_v33 }
 0xc78   : > { %v1831_v38 = vmul.f32 %v1830_v35, %v1830_v35 }
 0xc7a   : > { %v1832_v39 = vsel %vm717_vm4, %v1831_v38, 0.0 }
 0xc7b   : > { %1833 = vadd.xlane.f32.xlu0 %v1832_v39 }
 0xd08   : > { %v1834_v52 = vpop.xlane.xlu0 %1833 }
 0xd09   : > { %v1835_v53 = vmul.f32 0.03125, %v1834_v52 }
 0xd0b   : > { %v1836_v54 = vadd.f32 1e-05, %v1835_v53 }
 0xd0d   : > { %2729 = vrsqrt.f32 %v1836_v54 }
 0xd17   : > { %v2730_v55 = vpop.eup %2729 }
 0xd18   : > { %v1838_v57 = vmul.f32 %v2730_v55, %v1830_v35 }
 0xd1a   : > { %v1846_v59 = vmul.f32 %v2292_v56, %v1838_v57 }
 0xd1c   : > { %v1854_v60 = vadd.f32 %v2293_v58, %v1846_v59 }
 0xd1e   : > { %2473 = vmatmul.mubr.msk.f32.vlgmr.msra.gmra.mrb[12].mxu0 %vm717_vm4, %v1854_v60 }
 0xdf1   : > { %v1935_v0 = vpop.f32.mrb[12].mxu0 }
 0xdf2   : > { %v1936_v1 = vadd.f32 %v2294_v63, %v1935_v0  ;;  %v2474_v48 = vpop.f32.mrb[13].mxu0 }
 0xdf4   : > { %v1939_v2 = vmax.f32 %v1936_v1, 0.0 }
 0xdf6   : > { %2492 = vmatmul.mubr.msk.f32.vlgmr.msra.gmra.mrb[14].mxu1 %vm1955_vm7, %v1939_v2 }
 0xec9   : > { %v2025_v4 = vpop.f32.mrb[14].mxu1 }
 0xeca   : > { %v2026_v5 = vadd.f32 %v2296_v3, %v2025_v4  ;;  %v2493_v6 = vpop.f32.mrb[15].mxu1 }
 0xecc   : > { %v2029_v7 = vadd.f32 %v2026_v5, %v1854_v60 }
 0xece   : > { %v2030_v8 = vsel %vm717_vm4, %v2029_v7, 0.0 }
 0xecf   : > { %2031 = vadd.xlane.f32.xlu1 %v2030_v8 }
 0xf5c   : > { %v2032_v9 = vpop.xlane.xlu1 %2031 }
 0xf5d   : > { %v2033_v10 = vmul.f32 0.03125, %v2032_v9 }
 0xf5f   : > { %v2034_v11 = vsub.f32 %v2029_v7, %v2033_v10 }
 0xf61   : > { %v2035_v12 = vmul.f32 %v2034_v11, %v2034_v11 }
 0xf63   : > { %v2036_v14 = vsel %vm717_vm4, %v2035_v12, 0.0 }
 0xf64   : > { %2037 = vadd.xlane.f32.xlu1 %v2036_v14 }
 0xf65   : > { %2830 = shalt.err (!%p2827_p9)
}
 0xf66   : > { %s2831_s23 = scalar_lea.hbm %s3472_s18, 512  ;;  %s2835_s11 = scalar_lea.hbm %s3630_s17, 2048 }
 0xf67   : > { %p2832_p11 = scmp.ne.s32.totalorder %s3472_s18, %s2831_s23  ;;  %p2836_p2 = scmp.lt.u32.totalorder %s3472_s18, %s3630_s17 }
 0xf68   : > { %p2837_p0 = scmp.lt.u32.totalorder %s2835_s11, %s2831_s23  ;;  %p2839_p10 = scmp.lt.u32.totalorder %s2831_s23, %s3472_s18 }
 0xf69   : > { %p2833_p13 = pnand %p2832_p11, %p3631_p12 }
 0xf6a   : > { %p2838_p8 = por %p2837_p0, %p2836_p2 }
 0xf6b   : > { %p2834_p3 = pneg %p2833_p13 }
 0xf6c   : > { %p2840_p1 = por %p2839_p10, %p2838_p8 }
 0xf6e   : > { %p2841_p4 = pnand %p2840_p1, %p2834_p3 }
 0xf70   : > { %2844 = shalt.err (!%p2841_p4)
}
 0xf71   : > { %s2966_s12 = smov 128   ;;  %s2967_s27 = smov 256  }
 0xf72   : > { %s2968_s13 = smov 8   ;;  %s2302_s30 = sshll.u32 %s2939_s22, 1 }
 0xf73   : > { %2567 = dma.vmem_to_hbm [thread:$0]  (%p3631_p12), %s3474_s28, 512, %s3472_s18, %s2066_s24, %s2966_s12, %s2967_s27, %s2968_s13  }
 0xf74   : > { %s2077_s29 = sadd.s32 %s2935_s21, %s2302_s30  ;;  %s3632_s15 = sld [smem:[#allocation29_spill]] }
 0xf75   : > { %s3633_s6 = sld [smem:[#allocation30_spill]]  ;;  %s2303_s28 = sshll.u32 %s2077_s29, 7 }
 0xf76   : > { %s2081_s18 = sshll.u32 %s3234_s26, 4  ;;  %s3634_s27 = sld [smem:[#allocation31_spill]]  ;;  %s3514_s18 = int_to_ptr.vmem [resolvable:$true] %s2081_s18 }
 0xf77   : > { %s2061_s21 = scalar_lea.sflag [#allocation6], %s3216_s14  ;;  %s2845_s13 = scalar_lea.vmem %s3514_s18, 128 }
 0xf78   : > { %p2846_p5 = scmp.ne.s32.totalorder %s3514_s18, %s2845_s13  ;;  %s2969_s30 = smov [#allocation10]  }
 0xf79   : > { %s2849_s29 = sshll.u32 %s2969_s30, 4  ;;  %s2850_s29 = int_to_ptr.vmem [resolvable:$false] %s2849_s29 }
 0xf7a   : > { %v2298_v18 = vld [vmem:[%s3632_s15] ss:$0 sm:$0xff]  ;;  %p2847_p6 = pnand %p2846_p5, %p3631_p12  ;;  %s2851_s23 = scalar_lea.vmem %s2850_s29, 256 }
 0xf7b   : > { %v2299_v20 = vld [vmem:[%s3633_s6] ss:$0 sm:$0xff]  ;;  %p2852_p9 = scmp.lt.s32.totalorder %s3514_s18, %s2850_s29  ;;  %p2853_p11 = scmp.lt.s32.totalorder %s2851_s23, %s2845_s13 }
 0xf7c   : > { %s3512_s22 = scalar_lea.hbm %s3634_s27, %s2303_s28  ;;  %p2848_p7 = pneg %p2847_p6 }
 0xf7d   : > { %p2854_p13 = por %p2853_p11, %p2852_p9 }
 0xf7f   : > { %p2855_p3 = pnand %p2854_p13, %p2848_p7 }
 0xff1   : > { %v2038_v15 = vpop.xlane.xlu1 %2037 }
 0xff2   : > { %v2039_v16 = vmul.f32 0.03125, %v2038_v15 }
 0xff4   : > { %v2040_v17 = vadd.f32 1e-05, %v2039_v16 }
 0xff6   : > { %2731 = vrsqrt.f32 %v2040_v17 }
0x1000   : > { %v2732_v13 = vpop.eup %2731 }
0x1001   : > { %v2042_v19 = vmul.f32 %v2732_v13, %v2034_v11 }
0x1003   : > { %v2050_v21 = vmul.f32 %v2298_v18, %v2042_v19 }
0x1005   : > { %v2058_v22 = vadd.f32 %v2299_v20, %v2050_v21 }
0x1007   : > { %2059 = vst.msk [vmem:[%s3234_s26] sm:$0xff] %vm717_vm4, %v2058_v22 }
0x1008   : > { %2858 = shalt.err (!%p2855_p3)
}
0x1009   : > { %s2859_s14 = scalar_lea.hbm %s3512_s22, 128  ;;  %s2863_s15 = scalar_lea.hbm %s3634_s27, 512 }
0x100a   : > { %p2860_p2 = scmp.ne.s32.totalorder %s3512_s22, %s2859_s14  ;;  %p2864_p10 = scmp.lt.u32.totalorder %s3512_s22, %s3634_s27 }
0x100b   : > { %p2865_p1 = scmp.lt.u32.totalorder %s2863_s15, %s2859_s14  ;;  %p2867_p5 = scmp.lt.u32.totalorder %s2859_s14, %s3512_s22 }
0x100c   : > { %p2861_p0 = pnand %p2860_p2, %p3631_p12 }
0x100d   : > { %p2866_p4 = por %p2865_p1, %p2864_p10 }
0x100e   : > { %p2862_p8 = pneg %p2861_p0 }
0x100f   : > { %p2868_p6 = por %p2867_p5, %p2866_p4 }
0x1011   : > { %p2869_p7 = pnand %p2868_p6, %p2862_p8 }
0x1013   : > { %2872 = shalt.err (!%p2869_p7)
}
0x1014   : > { %2566 = dma.vmem_to_hbm [thread:$0]  (%p3631_p12), %s3514_s18, 128, %s3512_s22, %s2061_s21  }
0x1015 PF: > { %s3635_s6 = sld [smem:[#allocation21_spill]]  ;;  %s3636_s28 = sld [smem:[#allocation17_spill]] }
0x1016   : > { %s3637_s24 = sld [smem:[#allocation25_spill]] }
0x101b   : > { %p2593_p9 = scmp.ge.s32.totalorder %s3635_s6, 2  ;;  %s2110_s12 = sand.u32 1, %s3636_s28  }
0x101c   : > { %p3638_p11 = scmp.ne.s32.totalorder %s3637_s24, 0  ;;  %s2111_s13 = scalar_lea.sflag [#allocation6], %s2110_s12 }
0x101e   : > { %p2581_p13 = pnand %p2593_p9, %p3638_p11 }
0x1020   : > { %2914 = dma.done.wait (!%p2581_p13), %s2111_s13, 128  }
0x1021   : > { %2916 = vsyncadd (!%p2581_p13), %s2111_s13, 4294967168  ;;  %s2120_s30 = scalar_lea.sflag [#allocation12], %s2110_s12 }
0x1022   : > { %2918 = dma.done.wait (!%p2581_p13), %s2120_s30, 512  }
0x1023   : > { %2920 = vsyncadd (!%p2581_p13), %s2120_s30, 4294966784  ;;  %s34_s25 = sadd.s32 1, %s3635_s6   ;;  %s3639_s20 = sld [smem:[#allocation18_spill]] }
0x1024   : > { %p31_p3 = scmp.ge.s32.totalorder %s34_s25, 6   ;;  %s3640_s22 = sld [smem:[#allocation26_spill]] }
0x1025   : > { %s3641_s21 = sld [smem:[#allocation19_spill]]  ;;  %s3642_s29 = sld [smem:[#allocation20_spill]] }
0x1026   : > { %s3643_s23 = sld [smem:[#allocation22_spill]]  ;;  %s3644_s24 = sld [smem:[#allocation24_spill]] }
0x1027   : > { %s3645_s18 = smov %s2927_s19  ;;  %33 = sbr.rel (!%p31_p3) target bundleno = 16 (0x10), region = 152 }
0x1029   : > { %s3646_s19 = smov %s3639_s20 }
0x102a   : > { %s3647_s20 = smov %s3640_s22 }
0x102b   : > { %s3648_s22 = smov %s3642_s29 }
0x102e   :  { %2125 = vsyncpa [#allocation5], 1 }
0x102f   :  { %2127 = vsyncpa [#allocation5 + $0x1], 1 }
0x1030   :  { %2128 = vsyncpa [#allocation8], 1 }
0x1031   :  { %2129 = vsyncpa [#allocation6], 1 }
0x1032   :  { %2131 = vsyncpa [#allocation6 + $0x1], 1 }
0x1033   :  { %2132 = vsyncpa [#allocation12], 1 }
0x1034   :  { %2134 = vsyncpa [#allocation12 + $0x1], 1 }

// kernel: tpu_custom_call.1
= control target key start
LH: loop header
LB: loop body
LE: loop exit
PB: predicated region body
PF: predicated region fallthrough
CT: control target
= control target key end

     0   :  { %s3568_s0 = inlined_call_operand.vmem [shape: f32[2,16,32], index: 0, kind: input, shape index: {}]   ;;  %s3569_s1 = inlined_call_operand.vmem [shape: s32[2,1,16], index: 1, kind: input, shape index: {}]   ;;  %s3570_s2 = inlined_call_operand.vmem [shape: f32[32,96], index: 2, kind: input, shape index: {}]   ;;  %s3571_s3 = inlined_call_operand.vmem [shape: f32[1,96], index: 3, kind: input, shape index: {}]   ;;  %s3572_s4 = inlined_call_operand.vmem [shape: f32[32,32], index: 4, kind: input, shape index: {}]   ;;  %s3573_s5 = inlined_call_operand.vmem [shape: f32[1,32], index: 5, kind: input, shape index: {}]   ;;  %s3574_s6 = inlined_call_operand.vmem [shape: f32[1,32], index: 6, kind: input, shape index: {}]   ;;  %s3575_s7 = inlined_call_operand.hbm [shape: f32[1,32], index: 7, kind: input, shape index: {}]   ;;  %s3576_s8 = inlined_call_operand.hbm [shape: f32[32,64], index: 8, kind: input, shape index: {}]   ;;  %s3577_s9 = inlined_call_operand.hbm [shape: f32[1,64], index: 9, kind: input, shape index: {}]   ;;  %s3578_s10 = inlined_call_operand.vmem [shape: f32[64,32], index: 10, kind: input, shape index: {}]   ;;  %s3579_s11 = inlined_call_operand.vmem [shape: f32[1,32], index: 11, kind: input, shape index: {}]   ;;  %s3580_s12 = inlined_call_operand.vmem [shape: f32[1,32], index: 12, kind: input, shape index: {}]   ;;  %s3581_s13 = inlined_call_operand.vmem [shape: f32[1,32], index: 13, kind: input, shape index: {}]   ;;  %s3582_s14 = inlined_call_operand.hbm [shape: f32[2,16,32], index: 14, kind: output, shape index: {0}]   ;;  %s3583_s15 = inlined_call_operand.hbm [shape: f32[2,4,16,16], index: 15, kind: output, shape index: {1}]  }
   0x1   :  { %3601 = sst [smem:[#allocation27_spill]] %s3574_s6 }
   0x2   :  { %3602 = sst [smem:[#allocation28_spill]] %s3579_s11 }
   0x3   :  { %3603 = sst [smem:[#allocation29_spill]] %s3580_s12 }
   0x4   :  { %3604 = sst [smem:[#allocation30_spill]] %s3581_s13 }
   0x5   :  { %3605 = sst [smem:[#allocation31_spill]] %s3582_s14 }
   0x6   :  { %3606 = sst [smem:[#allocation32_spill]] %s3583_s15 }
   0x7   :  { %21 = vsyncpa [#allocation5], 0 }
   0x8   :  { %22 = vsyncpa [#allocation8], 0 }
   0x9   :  { %23 = vsyncpa [#allocation6], 0 }
   0xa   :  { %25 = vsyncpa [#allocation6 + $0x1], 0 }
   0xb   :  { %26 = vsyncpa [#allocation12], 0 }
   0xc   :  { %28 = vsyncpa [#allocation12 + $0x1], 0  ;;  %s3050_s18 = smov 0   ;;  %s3052_s19 = smov 0  }
   0xd   :  { %s3054_s20 = smov 0   ;;  %s3056_s21 = smov 0  }
   0xe   :  { %s3058_s22 = smov 0   ;;  %s3060_s23 = smov 0  }
   0xf   :  { %s3062_s24 = smov 0   ;;  %s3064_s25 = smov 0  }
  0x10 LB: > { %3607 = sst [smem:[#allocation17_spill]] %s2923_s18  ;;  %s2246_s26 = sadd.s32 4294967295, %s2951_s25   ;;  %s2951_s25 = sphi %s3064_s25, %s34_s25   ;;  %s2947_s24 = sphi %s3062_s24, %s3644_s24   ;;  %s2943_s23 = sphi %s3060_s23, %s3643_s23   ;;  %s2939_s22 = sphi %s3058_s22, %s3648_s22   ;;  %s2935_s21 = sphi %s3056_s21, %s3641_s21   ;;  %s2931_s20 = sphi %s3054_s20, %s3647_s20   ;;  %s2927_s19 = sphi %s3052_s19, %s3646_s19   ;;  %s2923_s18 = sphi %s3050_s18, %s3645_s18  }
  0x11   : > { %3608 = sst [smem:[#allocation18_spill]] %s2931_s20  ;;  %s2247_s27 = sadd.s32 4294967294, %s2951_s25  }
  0x12   : > { %3609 = sst [smem:[#allocation19_spill]] %s2943_s23  ;;  %s43_s28 = sadd.s32 1, %s2943_s23 }
  0x13   : > { %3610 = sst [smem:[#allocation20_spill]] %s2947_s24  ;;  %s46_s29 = sadd.s32 1, %s2947_s24 }
  0x14   : > { %3611 = sst [smem:[#allocation21_spill]] %s2951_s25  ;;  %p44_p0 = scmp.ge.s32.totalorder %s43_s28, 2 }
  0x15   : > { %s359_s30 = sadd.s32 1, %s2931_s20  ;;  %p369_p1 = scmp.ne.s32.totalorder %s2931_s20, %s2927_s19 }
  0x16   : > { %p370_p2 = scmp.eq.s32.totalorder %s2246_s26, 3  ;;  %s3650_s28 = smov (%p44_p0, %s43_s28), 0 }
  0x17   : > { %3612 = sst [smem:[#allocation22_spill]] %s3650_s28  ;;  %s3652_s29 = smov (!%p44_p0, %s46_s29), %s2947_s24 }
  0x18   : > { %s355_s16 = ssub.s32 %s2943_s23, %s3650_s28  ;;  %p3102_p3 = por %p370_p2, %p369_p1 }
  0x19   : > { %p48_p4 = scmp.ge.s32.totalorder %s3652_s29, 2  ;;  %p375_p5 = scmp.ne.s32.totalorder %s2927_s19, %s2923_s18 }
  0x1a   : > { %s3613_s17 = scalar_select %p3102_p3, 1, 0 }
  0x1b   : > { %p376_p6 = scmp.eq.s32.totalorder %s2247_s27, 3  ;;  %p2248_p7 = scmp.ge.s32.totalorder %s2951_s25, 1 }
  0x1c   : > { %3614 = sst [smem:[#allocation23_spill]] %s3613_s17  ;;  %s3654_s29 = smov (%p48_p4, %s3652_s29), 0 }
  0x1d   : > { %3615 = sst [smem:[#allocation24_spill]] %s3654_s29  ;;  %p3111_p8 = por %p376_p6, %p375_p5 }
  0x1e   : > { %p411_p9 = scmp.lt.s32.totalorder %s2951_s25, 5  ;;  %s354_s13 = ssub.s32 %s2947_s24, %s3654_s29 }
  0x1f   : > { %s3616_s14 = scalar_select %p3111_p8, 1, 0 }
  0x20   : > { %s356_s12 = sor.u32 %s355_s16, %s354_s13  ;;  %p3118_p10 = pnand %p2248_p7, %p411_p9 }
  0x21   : > { %3617 = sst [smem:[#allocation25_spill]] %s3616_s14  ;;  %p357_p11 = scmp.eq.s32.totalorder %s356_s12, 0 }
  0x22   : > { %s3618_s28 = scalar_select %p3118_p10, 1, 0 }
  0x23   : > { %p3122_p12 = scmp.eq.s32.totalorder %s2246_s26, 0  ;;  %p2570_p13 = pneg %p3118_p10 }
  0x24   : > { %s3129_s27 = scalar_select %p357_p11, %s2931_s20, %s359_s30  }
  0x25   : > { %s3619_s23 = scalar_select %p3122_p12, 1, 0 }
  0x26   : > { %3620 = sst [smem:[#allocation26_spill]] %s3129_s27  ;;  %p3133_p0 = pnand %p3122_p12, %p2570_p13 }
  0x27   : > { %s2953_s13 = smov [#allocation7]   ;;  %s2733_s26 = scalar_lea.hbm %s3576_s8, 512 }
  0x28   : > { %s449_s16 = sshll.u32 %s2953_s13, 4  ;;  %p2734_p1 = scmp.ne.s32.totalorder %s3576_s8, %s2733_s26  ;;  %s450_s16 = int_to_ptr.vmem [resolvable:$true] %s449_s16 }
  0x29   : > { %p3145_p2 = pneg %p3133_p0  ;;  %p2740_p6 = scmp.lt.u32.totalorder %s2733_s26, %s3576_s8 }
  0x2b   : > { %p2736_p4 = pnand %p3145_p2, %p2734_p1 }
  0x2d   : > { %p2737_p5 = pneg %p2736_p4 }
  0x2f   : > { %p2742_p7 = pnand %p2740_p6, %p2737_p5 }
  0x31   : > { %2745 = shalt.err (!%p2742_p7)
}
  0x32   : > { %s2746_s29 = scalar_lea.vmem %s450_s16, 512  ;;  %p2754_p8 = scmp.lt.s32.totalorder %s450_s16, %s450_s16 }
  0x33   : > { %p2747_p9 = scmp.ne.s32.totalorder %s450_s16, %s2746_s29  ;;  %p2755_p3 = scmp.lt.s32.totalorder %s2746_s29, %s2746_s29 }
  0x35   : > { %p2749_p11 = pnand %p2747_p9, %p3145_p2  ;;  %p2756_p12 = por %p2755_p3, %p2754_p8 }
  0x37   : > { %p2750_p13 = pneg %p2749_p11 }
  0x39   : > { %p2757_p10 = pnand %p2756_p12, %p2750_p13 }
  0x3b   : > { %2760 = shalt.err (!%p2757_p10)
}
  0x3c   : > { %s2954_s18 = smov 128   ;;  %s2955_s24 = smov 8  }
  0x3d   : > { %2576 = dma.hbm_to_vmem [thread:$0]  (!%p3133_p0), %s3576_s8, 512, %s450_s16, [#allocation8], %s2954_s18, %s2954_s18, %s2955_s24  }
  0x3e   : > { %s2956_s26 = smov [#allocation4]   ;;  %s2957_s20 = smov [#allocation9]  }
  0x3f   : > { %s439_s13 = sshll.u32 %s2956_s26, 4  ;;  %s463_s25 = sshll.u32 %s2957_s20, 4  ;;  %s440_s13 = int_to_ptr.vmem [resolvable:$true] %s439_s13  ;;  %s3161_s25 = int_to_ptr.vmem [resolvable:$true] %s463_s25 }
  0x40   : > { %s2761_s17 = scalar_lea.hbm %s3575_s7, 16 }
  0x41   : > { %p2762_p3 = scmp.ne.s32.totalorder %s3575_s7, %s2761_s17  ;;  %p2768_p12 = scmp.lt.u32.totalorder %s2761_s17, %s3575_s7 }
  0x43   : > { %p2764_p8 = pnand %p2762_p3, %p3145_p2 }
  0x45   : > { %p2765_p10 = pneg %p2764_p8 }
  0x47   : > { %p2770_p1 = pnand %p2768_p12, %p2765_p10 }
  0x49   : > { %2773 = shalt.err (!%p2770_p1)
}
  0x4a   : > { %s2774_s20 = scalar_lea.vmem %s440_s13, 16  ;;  %s2781_s15 = scalar_lea.vmem %s440_s13, 32 }
  0x4b   : > { %p2775_p4 = scmp.ne.s32.totalorder %s440_s13, %s2774_s20  ;;  %p2782_p7 = scmp.lt.s32.totalorder %s440_s13, %s440_s13 }
  0x4c   : > { %p2783_p9 = scmp.lt.s32.totalorder %s2781_s15, %s2774_s20 }
  0x4d   : > { %p2777_p5 = pnand %p2775_p4, %p3145_p2 }
  0x4e   : > { %p2784_p11 = por %p2783_p9, %p2782_p7 }
  0x4f   : > { %p2778_p6 = pneg %p2777_p5 }
  0x51   : > { %p2785_p13 = pnand %p2784_p11, %p2778_p6 }
  0x53   : > { %2788 = shalt.err (!%p2785_p13)
}
  0x54   : > { %2573 = dma.hbm_to_vmem [thread:$0]  (!%p3133_p0), %s3575_s7, 16, %s440_s13, [#allocation5]  }
  0x55   : > { %s2789_s24 = scalar_lea.hbm %s3577_s9, 16 }
  0x56   : > { %p2790_p3 = scmp.ne.s32.totalorder %s3577_s9, %s2789_s24  ;;  %p2796_p12 = scmp.lt.u32.totalorder %s2789_s24, %s3577_s9 }
  0x58   : > { %p2792_p8 = pnand %p2790_p3, %p3145_p2 }
  0x5a   : > { %p2793_p10 = pneg %p2792_p8 }
  0x5c   : > { %p2798_p1 = pnand %p2796_p12, %p2793_p10 }
  0x5e   : > { %2801 = shalt.err (!%p2798_p1)
}
  0x5f   : > { %s2802_s13 = scalar_lea.vmem %s3161_s25, 16  ;;  %s2809_s16 = scalar_lea.vmem %s3161_s25, 32 }
  0x60   : > { %p2803_p4 = scmp.ne.s32.totalorder %s3161_s25, %s2802_s13  ;;  %p2810_p7 = scmp.lt.s32.totalorder %s3161_s25, %s3161_s25 }
  0x61   : > { %p2811_p9 = scmp.lt.s32.totalorder %s2809_s16, %s2802_s13 }
  0x62   : > { %p2805_p5 = pnand %p2803_p4, %p3145_p2 }
  0x63   : > { %p2812_p11 = por %p2811_p9, %p2810_p7 }
  0x64   : > { %p2806_p6 = pneg %p2805_p5 }
  0x66   : > { %p2813_p13 = pnand %p2812_p11, %p2806_p6 }
  0x68   : > { %2816 = shalt.err (!%p2813_p13)
}
  0x69   : > { %2579 = dma.hbm_to_vmem [thread:$0]  (!%p3133_p0), %s3577_s9, 16, %s3161_s25, [#allocation8]  }
  0x6a   : > { %p3623_p3 = scmp.ne.s32.totalorder %s3618_s28, 0 }
  0x6b   : > { %p3624_p2 = scmp.ne.s32.totalorder (!%p3623_p3), %s3619_s23, 0 }
  0x6c   : > { %502 = sbr.rel (%p3623_p3) target bundleno = 4117 (0x1015), region = 76 }
  0x73   : > { %2906 = dma.done.wait (%p3624_p2), [#allocation5], 16  }
  0x74   : > { %2908 = vsyncadd (%p3624_p2), [#allocation5], 4294967280 }
  0x75   : > { %2910 = dma.done.wait (%p3624_p2), [#allocation8], 528  }
  0x76   : > { %2912 = vsyncadd (%p3624_p2), [#allocation8], 4294966768  ;;  %s3216_s14 = sand.u32 1, %s2927_s19   ;;  %p566_p0 = scmp.lt.s32.totalorder %s2939_s22, 1 }
  0x77   : > { %s2257_s25 = sshll.u32 %s3216_s14, 3  ;;  %s2258_s28 = sshll.u32 %s3216_s14, 5 }
  0x78   : > { %s3222_s30 = scalar_select %p566_p0, %s2939_s22, 1 }
  0x79   : > { %s3234_s26 = scalar_lea.vmem [#allocation10], %s2257_s25  ;;  %s3236_s29 = scalar_lea.vmem [#allocation11], %s2258_s28 }
  0x7a   : > { %s2308_s6 = sshll.u32 %s3222_s30, 4  ;;  %s573_s23 = scalar_lea.vmem %s3569_s1, %s3222_s30 }
  0x7b   : > { %s3232_s12 = scalar_lea.vmem %s3568_s0, %s2308_s6  ;;  %p2261_p8 = scmp.ne.s32.totalorder %s2935_s21, 0 }
  0x7c   : > { %v580_v0 = vld [vmem:[%s3570_s2] sm:$0xff] (!%p2261_p8)  ;;  %v581_v1 = vld [vmem:[%s3570_s2 + $0x8] sm:$0xff] (!%p2261_p8)  ;;  %v582_v2 = vld [vmem:[%s3570_s2 + $0x10] sm:$0xff] (!%p2261_p8)  ;;  %vm609_vm0 = vcmask (!%p2261_p8), 261120   ;;  %s2958_s18 = smov (!%p2261_p8), 96  }
  0x7d   : > { %577 = sbr.rel (%p2261_p8) target bundleno = 585 (0x249), region = 92  ;;  %v2673_v3 = vpack.i.bf16 (!%p2261_p8), %v581_v1, %v580_v0  ;;  %v583_v4 = vld [vmem:[%s3570_s2 + $0x18] sm:$0xff] (!%p2261_p8)  ;;  %v578_v5 = vld [vmem:[%s3232_s12] sm:$0xff] (!%p2261_p8)  ;;  %v579_v16 = vld [vmem:[%s3232_s12 + $0x8] sm:$0xff] (!%p2261_p8) }
  0x7e   : > { %2374 = vmatprep.mubr.msk.f32.mxu0 (!%p2261_p8), %vm609_vm0, %v578_v5  ;;  %v2262_v6 = vld [vmem:[%s3571_s3] ss:$0 sm:$0xff] (!%p2261_p8)  ;;  %v2678_v7 = vpack.i.bf16 (!%p2261_p8), %v583_v4, %v582_v2 }
  0x7f   : > { %2674 = vrot.lane.b32.xlu0 (!%p2261_p8), %v2673_v3, %s2958_s18  ;;  %606 = vrot.lane.b32.xlu1 (!%p2261_p8), %v2262_v6, %s2958_s18 }
  0x83   : > { %2679 = vrot.lane.b32.xlu0 (!%p2261_p8), %v2678_v7, %s2958_s18 }
  0xf1   : > { %v2675_v8 = vpop.permute.xlu0 %2674  ;;  %v607_v17 = vpop.permute.xlu1 %606 }
  0xf2   : > { %v2677_v9 = vunpack.i.h.bf16 %v2675_v8  ;;  %v2676_v10 = vunpack.i.l.bf16 %v2675_v8 }
  0xf4   : > { %v2494_v11 = vpack.c.bf16 %v2677_v9, %v2676_v10 }
  0xf5   : > { %v2680_v12 = vpop.permute.xlu0 %2679 }
  0xf6   : > { %v2682_v13 = vunpack.i.h.bf16 %v2680_v12  ;;  %v2681_v14 = vunpack.i.l.bf16 %v2680_v12  ;;  %2495 = vmatprep.subr.bf16.mxu0 %v2494_v11 }
  0xf7   : > { %2497 = vmatpush3.bf16.msra.mxu0 %v2494_v11 }
  0xf8   : > { %v2498_v15 = vpack.c.bf16 %v2682_v13, %v2681_v14 }
  0xfa   : > { %2499 = vmatprep.subr.bf16.mxu0 %v2498_v15 }
  0xfb   : > { %2501 = vmatpush3.bf16.msra.mxu0 %v2498_v15 }
  0xfe   : > { %2375 = vmatmul.mubr.msk.f32.vlgmr.msra.gmra.mrb[0].mxu0 %vm609_vm0, %v579_v16 }
 0x1d1   : > { %v2376_v18 = vpop.f32.mrb[0].mxu0 }
 0x1d2   : > { %v688_v19 = vadd.f32 %v2376_v18, %v607_v17  ;;  %v682_v20 = vpop.f32.mrb[1].mxu0 }
 0x1d3   : > { %v683_v21 = vadd.f32 %v682_v20, %v607_v17 }
 0x1d4   : > { %692 = vst.msk [vmem:[#allocation2 + $0x8] sm:$0xff] %vm609_vm0, %v688_v19  ;;  %697 = vrot.lane.b32.xlu0 %v688_v19, %s2958_s18 }
 0x1d5   : > { %691 = vst.msk [vmem:[#allocation2] sm:$0xff] %vm609_vm0, %v683_v21  ;;  %695 = vrot.lane.b32.xlu1 %v683_v21, %s2958_s18 }
 0x246   : > { %v698_v22 = vpop.permute.xlu0 %697 }
 0x247   : > { %702 = vst.msk [vmem:[#allocation3 + $0x8] sm:$0xff] %vm609_vm0, %v698_v22  ;;  %v696_v23 = vpop.permute.xlu1 %695 }
 0x248   : > { %701 = vst.msk [vmem:[#allocation3] sm:$0xff] %vm609_vm0, %v696_v23 }
 0x249 PF: > { %v706_v24 = vld [vmem:[%s3570_s2] sm:$0xff]  ;;  %v707_v25 = vld [vmem:[%s3570_s2 + $0x8] sm:$0xff]  ;;  %v708_v26 = vld [vmem:[%s3570_s2 + $0x10] sm:$0xff]  ;;  %v2959_v27 = vmov 0.0|0.0   ;;  %vm2960_vm1 = vmmov 0   ;;  %v2961_v30 = vmov 0.0   ;;  %v807_v43 = vlaneseq }
 0x24a   : > { %2502 = vmatprep.subr.bf16.mxu0 %v2959_v27  ;;  %v2503_v28 = vpack.c.bf16 %v707_v25, %v706_v24  ;;  %v709_v29 = vld [vmem:[%s3570_s2 + $0x18] sm:$0xff]  ;;  %2385 = vmatprep.mubr.msk.f32.mxu0 %vm2960_vm1, %v2961_v30  ;;  %s2265_s28 = sshll.u32 %s2935_s21, 3  ;;  %v802_v31 = vld [vmem:[#allocation2] sm:$0xff]  ;;  %v803_v32 = vld [vmem:[#allocation2 + $0x8] sm:$0xff]  ;;  %vm812_vm2 = vcmask 64512   ;;  %vm717_vm4 = vcmask 261120  }
 0x24b   : > { %2508 = vmatprep.subr.bf16.mxu1 %v2959_v27  ;;  %v2509_v33 = vpack.c.bf16 %v803_v32, %v802_v31  ;;  %vm3281_vm3 = vmpackc.low %vm812_vm2, %vm812_vm2  ;;  %2392 = vmatprep.mubr.msk.f32.mxu1 %vm2960_vm1, %v2961_v30  ;;  %v2506_v35 = vpack.c.bf16 %v709_v29, %v708_v26  ;;  %s704_s6 = scalar_lea.vmem %s3232_s12, %s2265_s28  ;;  %v3299_v37 = vpack.i.bf16 %v803_v32, %v802_v31  ;;  %s2962_s12 = smov 120   ;;  %v2266_v38 = vld [vmem:[%s3571_s3] ss:$0 sm:$0xff]  ;;  %v808_v45 = vshrl.u32 %v807_v43, 7 }
 0x24c   : > { %2504 = vmatpush3.bf16.msra.mxu0 %v2503_v28  ;;  %v3292_v36 = vld [vmem:[%s704_s6] sm:$0xff]  ;;  %s2963_s24 = smov 112   ;;  %vm892_vm6 = vcmask 130048   ;;  %s2964_s16 = smov 104   ;;  %vm1955_vm7 = vcmask 523264  }
 0x24d   : > { %2505 = vmatprep.subr.bf16.mxu0 %v2959_v27  ;;  %2511 = vmatpush3.bf16.xpose.msk.msra.mxu1 %vm3281_vm3, %v2509_v33  ;;  %v792_v44 = vld [vmem:[%s573_s23] sm:$0x1]  ;;  %v809_v46 = vsub.s32 0, %v808_v45  ;;  %s3627_s17 = sld [smem:[#allocation27_spill]]  ;;  %s3629_s20 = sld [smem:[#allocation23_spill]] }
 0x24e   : > { %2519 = vmatprep.subr.bf16.mxu1 %v2959_v27  ;;  %2684 = vrot.lane.b32.xlu1 %v3299_v37, %s2962_s12  ;;  %vm793_vm5 = vcmp.eq.s32.totalorder %v792_v44, 0  ;;  %v805_v59 = vld [vmem:[#allocation3 + $0x8] sm:$0xff]  ;;  %v978_v0 = vld [vmem:[%s3572_s4] sm:$0xff]  ;;  %s2304_s15 = sshll.u32 %s2939_s22, 3  ;;  %s2095_s28 = sshll.u32 %s3236_s29, 4  ;;  %s3474_s28 = int_to_ptr.vmem [resolvable:$true] %s2095_s28 }
 0x24f   : > { %v794_v47 = vsel %vm793_vm5, -1e+10, %v2961_v30  ;;  %v804_v58 = vld [vmem:[#allocation3] sm:$0xff]  ;;  %s2092_s11 = sadd.s32 %s2935_s21, %s2304_s15  ;;  %s2817_s27 = scalar_lea.vmem %s3474_s28, 512 }
 0x250   : > { %2507 = vmatpush3.bf16.msra.mxu0 %v2506_v35  ;;  %v3322_v48 = vrot.slane %v794_v47, %v809_v46  ;;  %v2513_v60 = vpack.c.bf16 %v805_v59, %v804_v58  ;;  %v3358_v21 = vpack.i.bf16 %v805_v59, %v804_v58  ;;  %s2305_s25 = sshll.u32 %s2092_s11, 7  ;;  %p2818_p10 = scmp.ne.s32.totalorder %s3474_s28, %s2817_s27 }
 0x251   : > { %2512 = vmatprep.subr.bf16.mxu0 %v2959_v27  ;;  %s2965_s13 = smov [#allocation11]  }
 0x252   : > { %s2821_s30 = sshll.u32 %s2965_s13, 4  ;;  %s2822_s30 = int_to_ptr.vmem [resolvable:$false] %s2821_s30 }
 0x253   : > { %2386 = vmatmul.mubr.msk.f32.vlgmr.msra.gmra.mrb[0].mxu0 %vm717_vm4, %v3292_v36  ;;  %p3631_p12 = scmp.ne.s32.totalorder %s3629_s20, 0  ;;  %p2824_p5 = scmp.lt.s32.totalorder %s3474_s28, %s2822_s30 }
 0x254   : > { %2399 = vmatprep.mubr.msk.f32.mxu0 %vm2960_vm1, %v2961_v30  ;;  %2514 = vmatpush3.bf16.msra.mxu0 %v2513_v60 }
 0x255   : > { %2402 = vmatprep.subr.mxu0 %v2961_v30  ;;  %p2819_p1 = pnand %p2818_p10, %p3631_p12 }
 0x257   : > { %p2820_p4 = pneg %p2819_p1 }
 0x2c0   : > { %v2685_v1 = vpop.permute.xlu1 %2684 }
 0x2c1   : > { %v2687_v2 = vunpack.i.h.bf16 %v2685_v1  ;;  %v2686_v3 = vunpack.i.l.bf16 %v2685_v1 }
 0x2c3   : > { %v2516_v4 = vpack.c.bf16 %v2687_v2, %v2686_v3 }
 0x326   : > { %v787_v39 = vpop.f32.mrb[0].mxu0 }
 0x327   : > { %v788_v40 = vadd.f32 %v2266_v38, %v787_v39  ;;  %v2387_v41 = vpop.f32.mrb[1].mxu0 }
 0x329   : > { %v3306_v42 = vmul.f32 0.35355338, %v788_v40 }
 0x32b   : > { %1057 = vrot.lane.b32.xlu1 %v3306_v42, %s2962_s12  ;;  %2393 = vmatmul.mubr.msk.f32.vlgmr.msra.gmra.mrb[0].mxu1 %vm812_vm2, %v3306_v42 }
 0x32c   : > { %2418 = vmatprep.mubr.msk.f32.mxu1 %vm2960_vm1, %v2961_v30 }
 0x32f   : > { %1314 = vrot.lane.b32.xlu1 %v3306_v42, %s2963_s24 }
 0x39d   : > { %v1058_v11 = vpop.permute.xlu1 %1057 }
 0x3a1   : > { %v1315_v12 = vpop.permute.xlu1 %1314 }
 0x3fe   : > { %v888_v49 = vpop.f32.mrb[0].mxu1 }
 0x3ff   : > { %v889_v50 = vadd.f32 %v888_v49, %v3322_v48  ;;  %v2394_v51 = vpop.f32.mrb[1].mxu1 }
 0x401   : > { %v893_v52 = vsel %vm892_vm6, %v889_v50, -inf }
 0x402   : > { %894 = vmax.xlane.f32.xlu0 %v893_v52 }
 0x48f   : > { %v895_v53 = vpop.xlane.xlu0 %894 }
 0x490   : > { %v896_v54 = vsub.f32 %v889_v50, %v895_v53  ;;  %v1235_v53 = vld [vmem:[%s3572_s4 + $0x8] sm:$0xff] }
 0x492   : > { %v897_v55 = vmul.f32 1.442695, %v896_v54 }
 0x494   : > { %2713 = vpow2.f32 %v897_v55 }
 0x49e   : > { %v2714_v56 = vpop.eup %2713 }
 0x49f   : > { %v899_v57 = vsel %vm892_vm6, %v2714_v56, 0.0 }
 0x4a0   : > { %900 = vadd.xlane.f32.xlu0 %v899_v57 }
 0x4b6   : > { %2689 = vrot.lane.b32.xlu0 %v3299_v37, %s2963_s24 }
 0x52d   : > { %v901_v61 = vpop.xlane.xlu0 %900 }
 0x52e   : > { %2715 = vrcp.f32 %v901_v61 }
 0x531   : > { %v2690_v5 = vpop.permute.xlu0 %2689 }
 0x532   : > { %v2692_v8 = vunpack.i.h.bf16 %v2690_v5  ;;  %v2691_v9 = vunpack.i.l.bf16 %v2690_v5  ;;  %v2268_v5 = vld [vmem:[%s3573_s5] ss:$0 sm:$0xff] }
 0x534   : > { %v2523_v10 = vpack.c.bf16 %v2692_v8, %v2691_v9 }
 0x538   : > { %v2716_v62 = vpop.eup %2715 }
 0x539   : > { %v903_v63 = vmul.f32 %v2716_v62, %v2714_v56 }
 0x53b   : > { %904 = vst.msk [vmem:[%s3236_s29] sm:$0xff] %vm892_vm6, %v903_v63  ;;  %2400 = vmatmul.mubr.msk.f32.vlgmr.msra.gmra.mrb[2].mxu0 %vm892_vm6, %v903_v63 }
 0x53c   : > { %2403 = vmatpush3.msra.mxu0 %v978_v0  ;;  %2404 = vmatprep.mubr.msk.f32.mxu0 %vm2960_vm1, %v2961_v30  ;;  %v1492_v0 = vld [vmem:[%s3572_s4 + $0x10] sm:$0xff] }
 0x53d   : > { %2515 = vmatprep.subr.bf16.mxu0 %v2959_v27 }
 0x60e   : > { %v974_v6 = vpop.f32.mrb[2].mxu0 }
 0x60f   : > { %v2401_v7 = vpop.f32.mrb[3].mxu0  ;;  %2405 = vmatmul.mubr.msk.f32.vlgmr.msra.gmra.mrb[4].mxu0 %vm812_vm2, %v974_v6 }
 0x610   : > { %2518 = vmatpush3.bf16.xpose.msk.msra.mxu0 %vm3281_vm3, %v2516_v4  ;;  %2411 = vmatprep.mubr.msk.f32.mxu0 %vm2960_vm1, %v2961_v30 }
 0x611   : > { %2522 = vmatprep.subr.bf16.mxu0 %v2959_v27 }
 0x617   : > { %2412 = vmatmul.mubr.msk.f32.vlgmr.msra.gmra.mrb[6].mxu0 %vm812_vm2, %v1058_v11 }
 0x618   : > { %2525 = vmatpush3.bf16.xpose.msk.msra.mxu0 %vm3281_vm3, %v2523_v10  ;;  %2430 = vmatprep.mubr.msk.f32.mxu0 %vm2960_vm1, %v2961_v30 }
 0x619   : > { %2529 = vmatprep.subr.bf16.mxu0 %v2959_v27 }
 0x61f   : > { %2431 = vmatmul.mubr.msk.f32.vlgmr.msra.gmra.mrb[8].mxu0 %vm812_vm2, %v1315_v12 }
 0x620   : > { %2449 = vmatprep.mubr.msk.f32.mxu0 %vm2960_vm1, %v2961_v30 }
 0x6e2   : > { %v3354_v13 = vpop.f32.mrb[4].mxu0 }
 0x6e3   : > { %v2406_v14 = vpop.f32.mrb[5].mxu0  ;;  %v1052_v6 = vadd.f32 %v2268_v5, %v3354_v13 }
 0x6ea   : > { %v1137_v15 = vpop.f32.mrb[6].mxu0 }
 0x6eb   : > { %v1138_v16 = vadd.f32 %v1137_v15, %v3322_v48  ;;  %v2413_v17 = vpop.f32.mrb[7].mxu0 }
 0x6ed   : > { %v1141_v18 = vsel %vm892_vm6, %v1138_v16, -inf }
 0x6ee   : > { %1142 = vmax.xlane.f32.xlu1 %v1141_v18 }
 0x6f2   : > { %v1394_v19 = vpop.f32.mrb[8].mxu0 }
 0x6f3   : > { %v2432_v20 = vpop.f32.mrb[9].mxu0  ;;  %v1395_v22 = vadd.f32 %v1394_v19, %v3322_v48  ;;  %v1749_v19 = vld [vmem:[%s3572_s4 + $0x18] sm:$0xff] }
 0x6f5   : > { %v1398_v23 = vsel %vm892_vm6, %v1395_v22, -inf }
 0x6ff   : > { %2694 = vrot.lane.b32.xlu1 %v3358_v21, %s2962_s12 }
 0x703   : > { %1571 = vrot.lane.b32.xlu1 %v3306_v42, %s2964_s16 }
 0x727   : > { %1399 = vmax.xlane.f32.xlu1 %v1398_v23 }
 0x738   : > { %2704 = vrot.lane.b32.xlu1 %v3358_v21, %s2963_s24  ;;  %s2066_s24 = scalar_lea.sflag [#allocation12], %s3216_s14 }
 0x77b   : > { %v1143_v24 = vpop.xlane.xlu1 %1142 }
 0x77c   : > { %v1144_v25 = vsub.f32 %v1138_v16, %v1143_v24 }
 0x77e   : > { %v1145_v26 = vmul.f32 1.442695, %v1144_v25 }
 0x77f   : > { %v2695_v28 = vpop.permute.xlu1 %2694 }
 0x780   : > { %2717 = vpow2.f32 %v1145_v26  ;;  %v2697_v29 = vunpack.i.h.bf16 %v2695_v28  ;;  %v2696_v31 = vunpack.i.l.bf16 %v2695_v28 }
 0x782   : > { %v2520_v32 = vpack.c.bf16 %v2697_v29, %v2696_v31 }
 0x783   : > { %v1572_v38 = vpop.permute.xlu1 %1571 }
 0x784   : > { %2521 = vmatpush3.bf16.msra.mxu1 %v2520_v32 }
 0x785   : > { %2421 = vmatprep.subr.mxu1 %v2961_v30 }
 0x78a   : > { %v2718_v33 = vpop.eup %2717 }
 0x78b   : > { %v1147_v35 = vsel %vm892_vm6, %v2718_v33, 0.0 }
 0x78c   : > { %1148 = vadd.xlane.f32.xlu0 %v1147_v35 }
 0x7a2   : > { %2699 = vrot.lane.b32.xlu0 %v3299_v37, %s2964_s16 }
 0x7b4   : > { %v1400_v39 = vpop.xlane.xlu1 %1399 }
 0x7b5   : > { %v1401_v40 = vsub.f32 %v1395_v22, %v1400_v39 }
 0x7b7   : > { %v1402_v41 = vmul.f32 1.442695, %v1401_v40  ;;  %v1855_v40 = vld [vmem:[#allocation7] sm:$0xff] }
 0x7b8   : > { %v2705_v54 = vpop.permute.xlu1 %2704 }
 0x7b9   : > { %2719 = vpow2.f32 %v1402_v41  ;;  %v2707_v55 = vunpack.i.h.bf16 %v2705_v54  ;;  %v2706_v56 = vunpack.i.l.bf16 %v2705_v54  ;;  %v1856_v41 = vld [vmem:[#allocation7 + $0x8] sm:$0xff] }
 0x7bb   : > { %v2527_v57 = vpack.c.bf16 %v2707_v55, %v2706_v56  ;;  %v2292_v56 = vld [vmem:[%s3627_s17] ss:$0 sm:$0xff]  ;;  %s3630_s17 = sld [smem:[#allocation32_spill]] }
 0x7c1   : > { %s3472_s18 = scalar_lea.hbm %s3630_s17, %s2305_s25 }
 0x7c3   : > { %v2720_v42 = vpop.eup %2719 }
 0x7c4   : > { %v1404_v43 = vsel %vm892_vm6, %v2720_v42, 0.0 }
 0x7c5   : > { %1405 = vadd.xlane.f32.xlu0 %v1404_v43  ;;  %v1858_v43 = vld [vmem:[#allocation7 + $0x18] sm:$0xff] }
 0x819   : > { %v1149_v44 = vpop.xlane.xlu0 %1148 }
 0x81a   : > { %2721 = vrcp.f32 %v1149_v44 }
 0x81d   : > { %v2700_v45 = vpop.permute.xlu0 %2699 }
 0x81e   : > { %v2702_v46 = vunpack.i.h.bf16 %v2700_v45  ;;  %v2701_v47 = vunpack.i.l.bf16 %v2700_v45  ;;  %v1941_v45 = vld [vmem:[%s3578_s10 + $0x8] sm:$0xff] }
 0x820   : > { %v2530_v49 = vpack.c.bf16 %v2702_v46, %v2701_v47  ;;  %v1942_v46 = vld [vmem:[%s3578_s10 + $0x10] sm:$0xff] }
 0x822   : > { %2532 = vmatpush3.bf16.xpose.msk.msra.mxu0 %vm3281_vm3, %v2530_v49  ;;  %v1943_v49 = vld [vmem:[%s3578_s10 + $0x18] sm:$0xff] }
 0x823   : > { %2536 = vmatprep.subr.bf16.mxu0 %v2959_v27 }
 0x824   : > { %v2722_v37 = vpop.eup %2721 }
 0x825   : > { %v1151_v50 = vmul.f32 %v2722_v37, %v2718_v33  ;;  %v2546_v37 = vpack.c.bf16 %v1943_v49, %v1942_v46 }
 0x827   : > { %2277 = vst.msk [vmem:[%s3236_s29 + $0x8] sm:$0xff] %vm892_vm6, %v1151_v50  ;;  %2419 = vmatmul.mubr.msk.f32.vlgmr.msra.gmra.mrb[2].mxu1 %vm892_vm6, %v1151_v50  ;;  %v1944_v50 = vld [vmem:[%s3578_s10 + $0x20] sm:$0xff] }
 0x828   : > { %2423 = vmatprep.mubr.msk.f32.mxu1 %vm2960_vm1, %v2961_v30  ;;  %2422 = vmatpush3.msra.mxu1 %v1235_v53 }
 0x829   : > { %2450 = vmatmul.mubr.msk.f32.vlgmr.msra.gmra.mrb[10].mxu0 %vm812_vm2, %v1572_v38  ;;  %2526 = vmatprep.subr.bf16.mxu1 %v2959_v27 }
 0x82a   : > { %2472 = vmatprep.mubr.msk.f32.mxu0 %vm2960_vm1, %v2961_v30 }
 0x852   : > { %v1406_v51 = vpop.xlane.xlu0 %1405 }
 0x853   : > { %2723 = vrcp.f32 %v1406_v51  ;;  %v1945_v51 = vld [vmem:[%s3578_s10 + $0x28] sm:$0xff] }
 0x85d   : > { %v2724_v34 = vpop.eup %2723 }
 0x85e   : > { %v1408_v52 = vmul.f32 %v2724_v34, %v2720_v42  ;;  %v2537_v42 = vpack.c.bf16 %v1856_v41, %v1855_v40  ;;  %v2549_v34 = vpack.c.bf16 %v1945_v51, %v1944_v50 }
 0x860   : > { %2283 = vst.msk [vmem:[%s3236_s29 + $0x10] sm:$0xff] %vm892_vm6, %v1408_v52  ;;  %2538 = vmatpush3.bf16.msra.mxu0 %v2537_v42 }
 0x861   : > { %2539 = vmatprep.subr.bf16.mxu0 %v2959_v27 }
 0x8fa   : > { %v1231_v58 = vpop.f32.mrb[2].mxu1 }
 0x8fb   : > { %v2420_v59 = vpop.f32.mrb[3].mxu1  ;;  %2424 = vmatmul.mubr.msk.f32.vlgmr.msra.gmra.mrb[4].mxu1 %vm812_vm2, %v1231_v58  ;;  %v2293_v58 = vld [vmem:[#allocation4] ss:$0 sm:$0xff] }
 0x8fc   : > { %2528 = vmatpush3.bf16.msra.mxu1 %v2527_v57  ;;  %v1651_v60 = vpop.f32.mrb[10].mxu0  ;;  %2437 = vmatprep.mubr.msk.f32.mxu1 %vm2960_vm1, %v2961_v30 }
 0x8fd   : > { %v1652_v61 = vadd.f32 %v1651_v60, %v3322_v48  ;;  %v2451_v62 = vpop.f32.mrb[11].mxu0  ;;  %2440 = vmatprep.subr.mxu1 %v2961_v30 }
 0x8ff   : > { %2438 = vmatmul.mubr.msk.f32.vlgmr.msra.gmra.mrb[6].mxu1 %vm892_vm6, %v1408_v52  ;;  %v1655_v63 = vsel %vm892_vm6, %v1652_v61, -inf }
 0x900   : > { %1656 = vmax.xlane.f32.xlu0 %v1655_v63  ;;  %2442 = vmatprep.mubr.msk.f32.mxu1 %vm2960_vm1, %v2961_v30  ;;  %v2294_v63 = vld [vmem:[#allocation9] ss:$0 sm:$0xff] }
 0x901   : > { %2441 = vmatpush3.msra.mxu1 %v1492_v0 }
 0x902   : > { %2533 = vmatprep.subr.bf16.mxu1 %v2959_v27 }
 0x98d   : > { %v1657_v1 = vpop.xlane.xlu0 %1656 }
 0x98e   : > { %v1658_v48 = vsub.f32 %v1652_v61, %v1657_v1  ;;  %v1946_v61 = vld [vmem:[%s3578_s10 + $0x30] sm:$0xff] }
 0x990   : > { %v1659_v2 = vmul.f32 1.442695, %v1658_v48 }
 0x992   : > { %2725 = vpow2.f32 %v1659_v2 }
 0x99c   : > { %v2726_v3 = vpop.eup %2725 }
 0x99d   : > { %v1661_v4 = vsel %vm892_vm6, %v2726_v3, 0.0 }
 0x99e   : > { %1662 = vadd.xlane.f32.xlu0 %v1661_v4 }
 0x9b4   : > { %2709 = vrot.lane.b32.xlu0 %v3358_v21, %s2964_s16  ;;  %s3628_s16 = sld [smem:[#allocation28_spill]] }
 0x9ce   : > { %v1305_v7 = vpop.f32.mrb[4].mxu1 }
 0x9cf   : > { %v1309_v8 = vadd.f32 %v1305_v7, %v1052_v6  ;;  %v2425_v9 = vpop.f32.mrb[5].mxu1 }
 0x9d2   : > { %v1488_v10 = vpop.f32.mrb[6].mxu1 }
 0x9d3   : > { %v2439_v11 = vpop.f32.mrb[7].mxu1  ;;  %2443 = vmatmul.mubr.msk.f32.vlgmr.msra.gmra.mrb[8].mxu1 %vm812_vm2, %v1488_v10 }
 0x9d4   : > { %2456 = vmatprep.mubr.msk.f32.mxu1 %vm2960_vm1, %v2961_v30 }
 0xa2b   : > { %v1663_v12 = vpop.xlane.xlu0 %1662 }
 0xa2c   : > { %2727 = vrcp.f32 %v1663_v12 }
 0xa2f   : > { %v2710_v14 = vpop.permute.xlu0 %2709 }
 0xa30   : > { %v2712_v15 = vunpack.i.h.bf16 %v2710_v14  ;;  %v2711_v16 = vunpack.i.l.bf16 %v2710_v14 }
 0xa32   : > { %v2534_v17 = vpack.c.bf16 %v2712_v15, %v2711_v16 }
 0xa34   : > { %2535 = vmatpush3.bf16.msra.mxu1 %v2534_v17 }
 0xa35   : > { %2459 = vmatprep.subr.mxu1 %v2961_v30 }
 0xa36   : > { %v2728_v13 = vpop.eup %2727 }
 0xa37   : > { %v1665_v18 = vmul.f32 %v2728_v13, %v2726_v3  ;;  %v2296_v3 = vld [vmem:[%s3628_s16] ss:$0 sm:$0xff] }
 0xa39   : > { %2289 = vst.msk [vmem:[%s3236_s29 + $0x18] sm:$0xff] %vm892_vm6, %v1665_v18  ;;  %2457 = vmatmul.mubr.msk.f32.vlgmr.msra.gmra.mrb[10].mxu1 %vm892_vm6, %v1665_v18  ;;  %s2823_s29 = scalar_lea.vmem %s2822_s30, 1024 }
 0xa3a   : > { %2460 = vmatpush3.msra.mxu1 %v1749_v19  ;;  %2461 = vmatprep.mubr.msk.f32.mxu1 %vm2960_vm1, %v2961_v30  ;;  %p2825_p6 = scmp.lt.s32.totalorder %s2823_s29, %s2817_s27 }
 0xa3b   : > { %2542 = vmatprep.subr.bf16.mxu1 %v2959_v27 }
 0xa3c   : > { %p2826_p7 = por %p2825_p6, %p2824_p5 }
 0xa3e   : > { %p2827_p9 = pnand %p2826_p7, %p2820_p4 }
 0xaa6   : > { %v1562_v20 = vpop.f32.mrb[8].mxu1 }
 0xaa7   : > { %v1566_v21 = vadd.f32 %v1562_v20, %v1309_v8  ;;  %v2444_v22 = vpop.f32.mrb[9].mxu1 }
 0xb0c   : > { %v1745_v23 = vpop.f32.mrb[10].mxu1 }
 0xb0d   : > { %v2458_v24 = vpop.f32.mrb[11].mxu1  ;;  %2462 = vmatmul.mubr.msk.f32.vlgmr.msra.gmra.mrb[12].mxu1 %vm812_vm2, %v1745_v23 }
 0xb0e   : > { %2491 = vmatprep.mubr.msk.f32.mxu1 %vm2960_vm1, %v2961_v30  ;;  %v1857_v30 = vld [vmem:[#allocation7 + $0x10] sm:$0xff] }
 0xb0f   : > { %v2540_v44 = vpack.c.bf16 %v1858_v43, %v1857_v30 }
 0xb11   : > { %2541 = vmatpush3.bf16.msra.mxu0 %v2540_v44 }
 0xbe0   : > { %v1819_v25 = vpop.f32.mrb[12].mxu1 }
 0xbe1   : > { %v1823_v26 = vadd.f32 %v1819_v25, %v1566_v21  ;;  %v2463_v28 = vpop.f32.mrb[13].mxu1 }
 0xbe3   : > { %v1824_v29 = vadd.f32 %v1823_v26, %v3292_v36  ;;  %v1940_v36 = vld [vmem:[%s3578_s10] sm:$0xff] }
 0xbe4   : > { %v2543_v47 = vpack.c.bf16 %v1941_v45, %v1940_v36 }
 0xbe5   : > { %v1825_v31 = vsel %vm717_vm4, %v1824_v29, 0.0 }
 0xbe6   : > { %1826 = vadd.xlane.f32.xlu1 %v1825_v31  ;;  %2544 = vmatpush3.bf16.msra.mxu1 %v2543_v47 }
 0xbe7   : > { %2545 = vmatprep.subr.bf16.mxu1 %v2959_v27 }
 0xbea   : > { %2547 = vmatpush3.bf16.msra.mxu1 %v2546_v37 }
 0xbeb   : > { %2548 = vmatprep.subr.bf16.mxu1 %v2959_v27 }
 0xbee   : > { %2550 = vmatpush3.bf16.msra.mxu1 %v2549_v34 }
 0xbef   : > { %2551 = vmatprep.subr.bf16.mxu1 %v2959_v27  ;;  %v1947_v27 = vld [vmem:[%s3578_s10 + $0x38] sm:$0xff] }
 0xbf0   : > { %v2552_v62 = vpack.c.bf16 %v1947_v27, %v1946_v61 }
 0xbf2   : > { %2553 = vmatpush3.bf16.msra.mxu1 %v2552_v62 }
 0xc73   : > { %v1827_v32 = vpop.xlane.xlu1 %1826 }
 0xc74   : > { %v1829_v33 = vmul.f32 0.03125, %v1827_v32 }
 0xc76   : > { %v1830_v35 = vsub.f32 %v1824_v29, %v1829_v33 }
 0xc78   : > { %v1831_v38 = vmul.f32 %v1830_v35, %v1830_v35 }
 0xc7a   : > { %v1832_v39 = vsel %vm717_vm4, %v1831_v38, 0.0 }
 0xc7b   : > { %1833 = vadd.xlane.f32.xlu0 %v1832_v39 }
 0xd08   : > { %v1834_v52 = vpop.xlane.xlu0 %1833 }
 0xd09   : > { %v1835_v53 = vmul.f32 0.03125, %v1834_v52 }
 0xd0b   : > { %v1836_v54 = vadd.f32 1e-05, %v1835_v53 }
 0xd0d   : > { %2729 = vrsqrt.f32 %v1836_v54 }
 0xd17   : > { %v2730_v55 = vpop.eup %2729 }
 0xd18   : > { %v1838_v57 = vmul.f32 %v2730_v55, %v1830_v35 }
 0xd1a   : > { %v1846_v59 = vmul.f32 %v2292_v56, %v1838_v57 }
 0xd1c   : > { %v1854_v60 = vadd.f32 %v2293_v58, %v1846_v59 }
 0xd1e   : > { %2473 = vmatmul.mubr.msk.f32.vlgmr.msra.gmra.mrb[12].mxu0 %vm717_vm4, %v1854_v60 }
 0xdf1   : > { %v1935_v0 = vpop.f32.mrb[12].mxu0 }
 0xdf2   : > { %v1936_v1 = vadd.f32 %v2294_v63, %v1935_v0  ;;  %v2474_v48 = vpop.f32.mrb[13].mxu0 }
 0xdf4   : > { %v1939_v2 = vmax.f32 %v1936_v1, 0.0 }
 0xdf6   : > { %2492 = vmatmul.mubr.msk.f32.vlgmr.msra.gmra.mrb[14].mxu1 %vm1955_vm7, %v1939_v2 }
 0xec9   : > { %v2025_v4 = vpop.f32.mrb[14].mxu1 }
 0xeca   : > { %v2026_v5 = vadd.f32 %v2296_v3, %v2025_v4  ;;  %v2493_v6 = vpop.f32.mrb[15].mxu1 }
 0xecc   : > { %v2029_v7 = vadd.f32 %v2026_v5, %v1854_v60 }
 0xece   : > { %v2030_v8 = vsel %vm717_vm4, %v2029_v7, 0.0 }
 0xecf   : > { %2031 = vadd.xlane.f32.xlu1 %v2030_v8 }
 0xf5c   : > { %v2032_v9 = vpop.xlane.xlu1 %2031 }
 0xf5d   : > { %v2033_v10 = vmul.f32 0.03125, %v2032_v9 }
 0xf5f   : > { %v2034_v11 = vsub.f32 %v2029_v7, %v2033_v10 }
 0xf61   : > { %v2035_v12 = vmul.f32 %v2034_v11, %v2034_v11 }
 0xf63   : > { %v2036_v14 = vsel %vm717_vm4, %v2035_v12, 0.0 }
 0xf64   : > { %2037 = vadd.xlane.f32.xlu1 %v2036_v14 }
 0xf65   : > { %2830 = shalt.err (!%p2827_p9)
}
 0xf66   : > { %s2831_s23 = scalar_lea.hbm %s3472_s18, 512  ;;  %s2835_s11 = scalar_lea.hbm %s3630_s17, 2048 }
 0xf67   : > { %p2832_p11 = scmp.ne.s32.totalorder %s3472_s18, %s2831_s23  ;;  %p2836_p2 = scmp.lt.u32.totalorder %s3472_s18, %s3630_s17 }
 0xf68   : > { %p2837_p0 = scmp.lt.u32.totalorder %s2835_s11, %s2831_s23  ;;  %p2839_p10 = scmp.lt.u32.totalorder %s2831_s23, %s3472_s18 }
 0xf69   : > { %p2833_p13 = pnand %p2832_p11, %p3631_p12 }
 0xf6a   : > { %p2838_p8 = por %p2837_p0, %p2836_p2 }
 0xf6b   : > { %p2834_p3 = pneg %p2833_p13 }
 0xf6c   : > { %p2840_p1 = por %p2839_p10, %p2838_p8 }
 0xf6e   : > { %p2841_p4 = pnand %p2840_p1, %p2834_p3 }
 0xf70   : > { %2844 = shalt.err (!%p2841_p4)
}
 0xf71   : > { %s2966_s12 = smov 128   ;;  %s2967_s27 = smov 256  }
 0xf72   : > { %s2968_s13 = smov 8   ;;  %s2302_s30 = sshll.u32 %s2939_s22, 1 }
 0xf73   : > { %2567 = dma.vmem_to_hbm [thread:$0]  (%p3631_p12), %s3474_s28, 512, %s3472_s18, %s2066_s24, %s2966_s12, %s2967_s27, %s2968_s13  }
 0xf74   : > { %s2077_s29 = sadd.s32 %s2935_s21, %s2302_s30  ;;  %s3632_s15 = sld [smem:[#allocation29_spill]] }
 0xf75   : > { %s3633_s6 = sld [smem:[#allocation30_spill]]  ;;  %s2303_s28 = sshll.u32 %s2077_s29, 7 }
 0xf76   : > { %s2081_s18 = sshll.u32 %s3234_s26, 4  ;;  %s3634_s27 = sld [smem:[#allocation31_spill]]  ;;  %s3514_s18 = int_to_ptr.vmem [resolvable:$true] %s2081_s18 }
 0xf77   : > { %s2061_s21 = scalar_lea.sflag [#allocation6], %s3216_s14  ;;  %s2845_s13 = scalar_lea.vmem %s3514_s18, 128 }
 0xf78   : > { %p2846_p5 = scmp.ne.s32.totalorder %s3514_s18, %s2845_s13  ;;  %s2969_s30 = smov [#allocation10]  }
 0xf79   : > { %s2849_s29 = sshll.u32 %s2969_s30, 4  ;;  %s2850_s29 = int_to_ptr.vmem [resolvable:$false] %s2849_s29 }
 0xf7a   : > { %v2298_v18 = vld [vmem:[%s3632_s15] ss:$0 sm:$0xff]  ;;  %p2847_p6 = pnand %p2846_p5, %p3631_p12  ;;  %s2851_s23 = scalar_lea.vmem %s2850_s29, 256 }
 0xf7b   : > { %v2299_v20 = vld [vmem:[%s3633_s6] ss:$0 sm:$0xff]  ;;  %p2852_p9 = scmp.lt.s32.totalorder %s3514_s18, %s2850_s29  ;;  %p2853_p11 = scmp.lt.s32.totalorder %s2851_s23, %s2845_s13 }
 0xf7c   : > { %s3512_s22 = scalar_lea.hbm %s3634_s27, %s2303_s28  ;;  %p2848_p7 = pneg %p2847_p6 }
 0xf7d   : > { %p2854_p13 = por %p2853_p11, %p2852_p9 }
 0xf7f   : > { %p2855_p3 = pnand %p2854_p13, %p2848_p7 }
 0xff1   : > { %v2038_v15 = vpop.xlane.xlu1 %2037 }
 0xff2   : > { %v2039_v16 = vmul.f32 0.03125, %v2038_v15 }
 0xff4   : > { %v2040_v17 = vadd.f32 1e-05, %v2039_v16 }
 0xff6   : > { %2731 = vrsqrt.f32 %v2040_v17 }
0x1000   : > { %v2732_v13 = vpop.eup %2731 }
0x1001   : > { %v2042_v19 = vmul.f32 %v2732_v13, %v2034_v11 }
0x1003   : > { %v2050_v21 = vmul.f32 %v2298_v18, %v2042_v19 }
0x1005   : > { %v2058_v22 = vadd.f32 %v2299_v20, %v2050_v21 }
0x1007   : > { %2059 = vst.msk [vmem:[%s3234_s26] sm:$0xff] %vm717_vm4, %v2058_v22 }
0x1008   : > { %2858 = shalt.err (!%p2855_p3)
}
0x1009   : > { %s2859_s14 = scalar_lea.hbm %s3512_s22, 128  ;;  %s2863_s15 = scalar_lea.hbm %s3634_s27, 512 }
0x100a   : > { %p2860_p2 = scmp.ne.s32.totalorder %s3512_s22, %s2859_s14  ;;  %p2864_p10 = scmp.lt.u32.totalorder %s3512_s22, %s3634_s27 }
0x100b   : > { %p2865_p1 = scmp.lt.u32.totalorder %s2863_s15, %s2859_s14  ;;  %p2867_p5 = scmp.lt.u32.totalorder %s2859_s14, %s3512_s22 }
0x100c   : > { %p2861_p0 = pnand %p2860_p2, %p3631_p12 }
0x100d   : > { %p2866_p4 = por %p2865_p1, %p2864_p10 }
0x100e   : > { %p2862_p8 = pneg %p2861_p0 }
0x100f   : > { %p2868_p6 = por %p2867_p5, %p2866_p4 }
0x1011   : > { %p2869_p7 = pnand %p2868_p6, %p2862_p8 }
0x1013   : > { %2872 = shalt.err (!%p2869_p7)
}
0x1014   : > { %2566 = dma.vmem_to_hbm [thread:$0]  (%p3631_p12), %s3514_s18, 128, %s3512_s22, %s2061_s21  }
0x1015 PF: > { %s3635_s6 = sld [smem:[#allocation21_spill]]  ;;  %s3636_s28 = sld [smem:[#allocation17_spill]] }
0x1016   : > { %s3637_s24 = sld [smem:[#allocation25_spill]] }
0x101b   : > { %p2593_p9 = scmp.ge.s32.totalorder %s3635_s6, 2  ;;  %s2110_s12 = sand.u32 1, %s3636_s28  }
0x101c   : > { %p3638_p11 = scmp.ne.s32.totalorder %s3637_s24, 0  ;;  %s2111_s13 = scalar_lea.sflag [#allocation6], %s2110_s12 }
0x101e   : > { %p2581_p13 = pnand %p2593_p9, %p3638_p11 }
0x1020   : > { %2914 = dma.done.wait (!%p2581_p13), %s2111_s13, 128  }
0x1021   : > { %2916 = vsyncadd (!%p2581_p13), %s2111_s13, 4294967168  ;;  %s2120_s30 = scalar_lea.sflag [#allocation12], %s2110_s12 }
0x1022   : > { %2918 = dma.done.wait (!%p2581_p13), %s2120_s30, 512  }
0x1023   : > { %2920 = vsyncadd (!%p2581_p13), %s2120_s30, 4294966784  ;;  %s34_s25 = sadd.s32 1, %s3635_s6   ;;  %s3639_s20 = sld [smem:[#allocation18_spill]] }
0x1024   : > { %p31_p3 = scmp.ge.s32.totalorder %s34_s25, 6   ;;  %s3640_s22 = sld [smem:[#allocation26_spill]] }
0x1025   : > { %s3641_s21 = sld [smem:[#allocation19_spill]]  ;;  %s3642_s29 = sld [smem:[#allocation20_spill]] }
0x1026   : > { %s3643_s23 = sld [smem:[#allocation22_spill]]  ;;  %s3644_s24 = sld [smem:[#allocation24_spill]] }
0x1027   : > { %s3645_s18 = smov %s2927_s19  ;;  %33 = sbr.rel (!%p31_p3) target bundleno = 16 (0x10), region = 152 }
0x1029   : > { %s3646_s19 = smov %s3639_s20 }
0x102a   : > { %s3647_s20 = smov %s3640_s22 }
0x102b   : > { %s3648_s22 = smov %s3642_s29 }
0x102e   :  { %2125 = vsyncpa [#allocation5], 1 }
0x102f   :  { %2127 = vsyncpa [#allocation5 + $0x1], 1 }
0x1030   :  { %2128 = vsyncpa [#allocation8], 1 }
0x1031   :  { %2129 = vsyncpa [#allocation6], 1 }
0x1032   :  { %2131 = vsyncpa [#allocation6 + $0x1], 1 }
0x1033   :  { %2132 = vsyncpa [#allocation12], 1 }
0x1034   :  { %2134 = vsyncpa [#allocation12 + $0x1], 1 }

</bundles_post_ra>
